<compile_context>
chip_gen: v7x
topology: tpu7x:2x2x1
jax: 0.10.0
libtpu: 0.0.40
codegen_flags: <defaults>
</compile_context>

<pallas_src>
import functools

import jax
import jax.numpy as jnp
from jax.experimental import pallas as pl
from jax.experimental.pallas import tpu as pltpu


_SQRT_HALF = 0.7071067811865476


def _round_up(n, m):
    return -(-n // m) * m


def _next_pow2(n):
    return 1 << (int(n) - 1).bit_length()


def _pow2_mult8(n):
    """Smallest power-of-two multiple of 8 that is >= n."""
    return 8 * _next_pow2(max(-(-int(n) // 8), 1))


@functools.lru_cache(maxsize=1)
def _vmem_capacity_bytes():
    """Per-core VMEM capacity (v5e/v6e: 128 MiB, v7x: 64 MiB); conservative fallback."""
    try:
        cap = int(pltpu.get_tpu_info().vmem_capacity_bytes)
        if cap > 0:
            return cap
    except Exception:
        pass
    return 64 * 1024 * 1024


def _gelu(x):
    # exact (erf) form: matches torch.nn.GELU() default
    return 0.5 * x * (1.0 + jax.lax.erf(x * _SQRT_HALF))


def _weight_norm(v, g):
    # nn.utils.weight_norm default dim=0: per-output-channel L2 norm over (C_in, K)
    norm = jnp.sqrt(jnp.sum(v * v, axis=(1, 2), keepdims=True))
    return g * v / norm


def _vmem_bytes_estimate(t_tile, halo, cin_p, cout_p, K, out_bytes, has_ds):
    """Generous resident-VMEM estimate for one grid step (blocks + live temporaries)."""
    lb = t_tile + halo
    w_bytes = 2 * (K * cin_p * cout_p + K * cout_p * cout_p
                   + (cin_p * cout_p if has_ds else 0))       # bf16 weights
    blocks = (2 * t_tile * cin_p * 2                           # x tile, double-buffered bf16
              + 2 * t_tile * cout_p * out_bytes                # out tile, double-buffered
              + 2 * w_bytes                                    # weights, double-buffered alloc
              + 4 * 8 * cout_p)                                # biases
    carries = halo * (cin_p + cout_p) * 2                      # bf16 carry scratch
    temps = (lb * (cin_p + cout_p) * 2                         # xbuf + h1buf (bf16)
             + t_tile * K * max(cin_p, cout_p) * 2             # im2col operand
             + lb * cout_p * 8                                 # f32 tap product + accumulator
             + t_tile * cout_p * 14)                           # h1 f32, h1 bf16, h2/res/out f32
    return blocks + carries + temps


# --------------------------------------------------------------------------- #
# kernel
# --------------------------------------------------------------------------- #
def _causal_conv(buf, w_ref, b_ref, *, dilation, halo, K, aligned):
    """Causal dilated conv over the current time tile.

    buf:   (halo + TT, C) bf16  -- carry rows followed by the tile rows
    w_ref: (K*C, Cout_p) bf16   -- tap-k weights live in rows [k*C, (k+1)*C)
    b_ref: (1, Cout_p) f32
    Returns (TT, Cout_p) f32 with out[i] = sum_k w[k] . buf[halo + i - (K-1-k)*dilation].
    """
    lb, C = buf.shape
    tt = lb - halo
    padding = (K - 1) * dilation

    if aligned:
        # Every tap offset is a multiple of 16 rows (native bf16 tile), so the
        # K shifted views are plain aligned slices; fold them into one matmul
        # of contraction depth K*C (im2col along lanes).
        taps = []
        for k in range(K):
            a = halo - padding + k * dilation
            taps.append(buf[a:a + tt, :])
        op = jnp.concatenate(taps, axis=1) if K > 1 else taps[0]
        out = jnp.dot(op, w_ref[...], preferred_element_type=jnp.float32)
    else:
        # Shallow dilations: per-tap matmul over the whole buffer, realigned by
        # an XLU sublane roll of the f32 result.  Rolled-in garbage only lands
        # in rows < halo (shift <= padding <= halo), which are dropped below.
        acc = None
        for k in range(K):
            y = jnp.dot(buf, w_ref[k * C:(k + 1) * C, :],
                        preferred_element_type=jnp.float32)
            shift = padding - k * dilation       # out_buf[b] += w[k] . buf[b - shift]
            if shift:
                y = pltpu.roll(y, shift=shift, axis=0)
            acc = y if acc is None else acc + y
        out = acc[halo:, :]
    return out + b_ref[...]


def _temporal_block_kernel(*refs, dilation, halo, K, has_downsample, aligned):
    if has_downsample:
        (x_ref, w1_ref, b1_ref, w2_ref, b2_ref, wd_ref, bd_ref,
         o_ref, xcar_ref, h1car_ref) = refs
    else:
        (x_ref, w1_ref, b1_ref, w2_ref, b2_ref,
         o_ref, xcar_ref, h1car_ref) = refs

    @pl.when(pl.program_id(1) == 0)
    def _():
        # First time tile of every sequence: the causal left context is exact zeros.
        xcar_ref[...] = jnp.zeros_like(xcar_ref)
        h1car_ref[...] = jnp.zeros_like(h1car_ref)

    x_cur = x_ref[0]                                               # (TT, Cin_p) bf16
    xbuf = jnp.concatenate([xcar_ref[...], x_cur], axis=0)         # (halo+TT, Cin_p) bf16
    xcar_ref[...] = x_cur[x_cur.shape[0] - halo:, :]               # carry for next tile

    # conv1 -> chomp -> GELU
    # TODO(synk): nn.Dropout is stochastic in train mode; eval-mode identity here.
    h1 = _gelu(_causal_conv(xbuf, w1_ref, b1_ref, dilation=dilation,
                            halo=halo, K=K, aligned=aligned))      # (TT, Cout_p) f32
    h1b = h1.astype(jnp.bfloat16)

    h1buf = jnp.concatenate([h1car_ref[...], h1b], axis=0)         # (halo+TT, Cout_p) bf16
    h1car_ref[...] = h1b[h1b.shape[0] - halo:, :]

    # conv2 -> chomp -> GELU
    h2 = _gelu(_causal_conv(h1buf, w2_ref, b2_ref, dilation=dilation,
                            halo=halo, K=K, aligned=aligned))

    # residual branch: 1x1 conv when C_in != C_out, identity otherwise
    if has_downsample:
        res = jnp.dot(x_cur, wd_ref[...],
                      preferred_element_type=jnp.float32) + bd_ref[...]
    else:
        res = x_cur.astype(jnp.float32)

    # TODO(synk): on v6e/v7x the GELU tail could run in bf16 (bf16 VALU); kept f32 (v5e-safe).
    o_ref[0] = _gelu(h2 + res).astype(o_ref.dtype)


# --------------------------------------------------------------------------- #
# per-block wrapper
# --------------------------------------------------------------------------- #
def _temporal_block(x, prep, *, kernel_size, dilation, halo, t_tile, out_dtype):
    """x: (N, Lpad, Cin_p) bf16, channels already zero-padded to a multiple of 128."""
    N, Lpad, Cin_p = x.shape
    K = kernel_size
    KCin, Cout_p = prep["w1"].shape
    assert KCin == K * Cin_p, (KCin, K, Cin_p)
    assert prep["w2"].shape == (K * Cout_p, Cout_p)
    has_downsample = "wd" in prep

    aligned = (dilation % 16 == 0)      # every tap offset lands on a native bf16 tile row

    # generation-aware VMEM budget: shrink the time tile until it fits, then
    # clamp vmem_limit below the physical capacity (v7x: 64 MiB) with headroom.
    cap = _vmem_capacity_bytes()
    budget = (7 * cap) // 10
    out_bytes = int(jnp.dtype(out_dtype).itemsize)
    while t_tile > halo and _vmem_bytes_estimate(
            t_tile, halo, Cin_p, Cout_p, K, out_bytes, has_downsample) > budget:
        t_tile //= 2
    est = _vmem_bytes_estimate(t_tile, halo, Cin_p, Cout_p, K, out_bytes, has_downsample)
    vmem_limit = int(min(0.88 * cap, 100 * 2 ** 20, max(32 * 2 ** 20, 1.5 * est)))

    assert t_tile >= halo and Lpad % t_tile == 0, (t_tile, halo, Lpad)
    num_t = Lpad // t_tile

    # TODO(synk): single-buffer the constant-index weight/bias blocks
    # (pipeline_mode=pl.Buffered(1)) once verified on the target jax build.
    in_specs = [
        pl.BlockSpec((1, t_tile, Cin_p), lambda n, t: (n, t, 0)),
        pl.BlockSpec((K * Cin_p, Cout_p), lambda n, t: (0, 0)),
        pl.BlockSpec((1, Cout_p), lambda n, t: (0, 0)),
        pl.BlockSpec((K * Cout_p, Cout_p), lambda n, t: (0, 0)),
        pl.BlockSpec((1, Cout_p), lambda n, t: (0, 0)),
    ]
    args = [x, prep["w1"], prep["b1"], prep["w2"], prep["b2"]]
    if has_downsample:
        in_specs += [pl.BlockSpec((Cin_p, Cout_p), lambda n, t: (0, 0)),
                     pl.BlockSpec((1, Cout_p), lambda n, t: (0, 0))]
        args += [prep["wd"], prep["bd"]]

    kernel = functools.partial(
        _temporal_block_kernel, dilation=dilation, halo=halo, K=K,
        has_downsample=has_downsample, aligned=aligned)

    return pl.pallas_call(
        kernel,
        out_shape=jax.ShapeDtypeStruct((N, Lpad, Cout_p), out_dtype),
        grid=(N, num_t),
        in_specs=in_specs,
        out_specs=pl.BlockSpec((1, t_tile, Cout_p), lambda n, t: (n, t, 0)),
        scratch_shapes=[pltpu.VMEM((halo, Cin_p), jnp.bfloat16),    # x carry
                        pltpu.VMEM((halo, Cout_p), jnp.bfloat16)],  # h1 carry
        compiler_params=pltpu.CompilerParams(
            # batch "parallel" (megacore split on v7x); time must stay
            # sequential ("arbitrary") because of the VMEM carries.
            dimension_semantics=("parallel", "arbitrary"),
            vmem_limit_bytes=vmem_limit),
    )(*args)


# --------------------------------------------------------------------------- #
# one-time weight preparation (hoisted out of the forward pass)
# --------------------------------------------------------------------------- #
def prepare_temporal_conv_net(layer_params, kernel_size):
    """Fold weight_norm, transpose to (K*Cin_p, Cout_p), pad channels to 128, cast bf16."""
    prepared = []
    for params in layer_params:
        w1 = _weight_norm(params["v1"], params["g1"])        # (C_out, C_in, K) f32
        w2 = _weight_norm(params["v2"], params["g2"])        # (C_out, C_out, K) f32
        C_out, C_in, K = w1.shape
        assert K == kernel_size
        Cin_p = _round_up(C_in, 128)
        Cout_p = _round_up(C_out, 128)

        def flat(w, cin, cin_p):
            wk = jnp.pad(jnp.transpose(w, (2, 1, 0)),
                         ((0, 0), (0, cin_p - cin), (0, Cout_p - C_out)))
            return wk.reshape(K * cin_p, Cout_p).astype(jnp.bfloat16)

        prep = {
            "w1": flat(w1, C_in, Cin_p),
            "b1": jnp.pad(params["b1"], (0, Cout_p - C_out)).astype(jnp.float32)[None, :],
            "w2": flat(w2, C_out, Cout_p),
            "b2": jnp.pad(params["b2"], (0, Cout_p - C_out)).astype(jnp.float32)[None, :],
        }
        if C_in != C_out:
            assert "wd" in params
            prep["wd"] = jnp.pad(jnp.transpose(params["wd"][:, :, 0], (1, 0)),
                                 ((0, Cin_p - C_in), (0, Cout_p - C_out))).astype(jnp.bfloat16)
            prep["bd"] = jnp.pad(params["bd"], (0, Cout_p - C_out)).astype(jnp.float32)[None, :]
        prepared.append(prep)
    return prepared


# --------------------------------------------------------------------------- #
# full network wrapper (TemporalConvNet.forward)
# --------------------------------------------------------------------------- #
def temporal_conv_net_forward(x_lnc, prepared, *, kernel_size, out_channels,
                              t_tile_target=None):
    """TemporalConvNet forward.  x_lnc: (L, N, num_inputs) -> (L, N, num_channels[-1])."""
    L, N, C_in = x_lnc.shape
    num_levels = len(prepared)
    cap = _vmem_capacity_bytes()
    if t_tile_target is None:
        t_tile_target = 2048 if cap >= 96 * 2 ** 20 else 1024   # 128-MiB parts vs v7x

    dil = [2 ** i for i in range(num_levels)]
    pad_ = [(kernel_size - 1) * d for d in dil]
    # carry length: >= causal padding, a power-of-two multiple of 8, and >= 16 so
    # every bf16 concat/slice boundary in the kernel is native-tile (16-row) aligned
    halo = [max(16, _pow2_mult8(max(p, 1))) for p in pad_]
    tcap = max(16, min(_pow2_mult8(t_tile_target), _pow2_mult8(L)))
    t_tile = [max(h, tcap) for h in halo]
    Lpad = _round_up(L, max(t_tile))

    # single layout pass for the whole stack: (L, N, C) -> NTC, right time pad
    # (harmless: causal), lane-dense channel pad to a multiple of 128, bf16
    Cp = _round_up(C_in, 128)
    x = jnp.transpose(x_lnc, (1, 0, 2))
    x = jnp.pad(x, ((0, 0), (0, Lpad - L), (0, Cp - C_in))).astype(jnp.bfloat16)

    # TODO(synk): when profiling shows the stack is HBM-bound, fuse all blocks
    # into a single pallas_call over time tiles (weights resident in VMEM).
    for i, prep in enumerate(prepared):
        last = i == num_levels - 1
        x = _temporal_block(
            x, prep, kernel_size=kernel_size, dilation=dil[i], halo=halo[i],
            t_tile=t_tile[i], out_dtype=jnp.float32 if last else jnp.bfloat16)

    return jnp.transpose(x[:, :L, :out_channels], (1, 0, 2))      # (L, N, C_out) f32


# --------------------------------------------------------------------------- #
# pure-JAX reference (mirrors the PyTorch module, f32)
# --------------------------------------------------------------------------- #
def _reference_block(x, params, *, dilation, padding):
    L = x.shape[2]

    def conv1d(h, w, b):
        y = jax.lax.conv_general_dilated(
            h, w, window_strides=(1,), padding=[(padding, padding)],
            rhs_dilation=(dilation,), dimension_numbers=("NCH", "OIH", "NCH"))
        return y[:, :, :L] + b[None, :, None]                     # chomp + bias

    gelu = lambda t: jax.nn.gelu(t, approximate=False)
    w1 = _weight_norm(params["v1"], params["g1"])
    w2 = _weight_norm(params["v2"], params["g2"])
    h = gelu(conv1d(x, w1, params["b1"]))
    h = gelu(conv1d(h, w2, params["b2"]))
    if "wd" in params:
        res = jax.lax.conv_general_dilated(
            x, params["wd"], (1,), [(0, 0)],
            dimension_numbers=("NCH", "OIH", "NCH")) + params["bd"][None, :, None]
    else:
        res = x
    return gelu(h + res)


def _reference_tcn(x_lnc, layer_params, *, kernel_size):
    x = jnp.transpose(x_lnc, (1, 2, 0))                           # torch: x.permute(1, 2, 0)
    for i, params in enumerate(layer_params):
        d = 2 ** i
        x = _reference_block(x, params, dilation=d, padding=(kernel_size - 1) * d)
    return jnp.transpose(x, (2, 0, 1))                            # torch: x.permute(2, 0, 1)


# --------------------------------------------------------------------------- #
if __name__ == "__main__":
    # 5 levels -> dilations 1,2,4,8,16: exercises both the rolled and the
    # im2col (aligned) conv paths, downsample and identity residuals, and the
    # VMEM carry across multiple time tiles (t_tile_target=32, L=96 -> 3 tiles).
    num_inputs, num_channels, kernel_size = 4, [8, 8, 16, 16, 16], 3
    L, N = 96, 2

    key = jax.random.PRNGKey(0)
    keys = jax.random.split(key, 1 + len(num_channels))
    x = jax.random.normal(keys[0], (L, N, num_inputs), jnp.float32)

    def block_params(k, c_in, c_out):
        kk = jax.random.split(k, 8)
        v1 = 0.1 * jax.random.normal(kk[0], (c_out, c_in, kernel_size), jnp.float32)
        v2 = 0.1 * jax.random.normal(kk[1], (c_out, c_out, kernel_size), jnp.float32)
        n1 = jnp.sqrt(jnp.sum(v1 * v1, axis=(1, 2), keepdims=True))
        n2 = jnp.sqrt(jnp.sum(v2 * v2, axis=(1, 2), keepdims=True))
        p = {
            "v1": v1,
            "g1": n1 * jax.random.uniform(kk[2], n1.shape, minval=0.5, maxval=1.5),
            "b1": 0.1 * jax.random.normal(kk[3], (c_out,), jnp.float32),
            "v2": v2,
            "g2": n2 * jax.random.uniform(kk[4], n2.shape, minval=0.5, maxval=1.5),
            "b2": 0.1 * jax.random.normal(kk[5], (c_out,), jnp.float32),
        }
        if c_in != c_out:                                 # downsample 1x1 conv, as in the module
            p["wd"] = 0.1 * jax.random.normal(kk[6], (c_out, c_in, 1), jnp.float32)
            p["bd"] = 0.1 * jax.random.normal(kk[7], (c_out,), jnp.float32)
        return p

    layer_params = []
    c_prev = num_inputs
    for i, c in enumerate(num_channels):
        layer_params.append(block_params(keys[1 + i], c_prev, c))
        c_prev = c

    # one-time weight preparation (weight_norm fold + layout), then jit the forward
    prepared = prepare_temporal_conv_net(layer_params, kernel_size)
    fwd = jax.jit(functools.partial(
        temporal_conv_net_forward, kernel_size=kernel_size,
        out_channels=num_channels[-1], t_tile_target=32))
    out = jax.block_until_ready(fwd(x, prepared))

    ref = _reference_tcn(x, layer_params, kernel_size=kernel_size)
    assert out.shape == (L, N, num_channels[-1]), out.shape
    err = float(jnp.max(jnp.abs(out - ref)))
    # tolerance accounts for bf16 MXU inputs + bf16 inter-layer activations over
    # a 5-level stack vs. the f32 reference
    assert err < 4e-2, f"mismatch vs reference: max abs err {err}"
    print("KERNEL_OK")
</pallas_src>

<mosaic_0001>
module attributes {stable_mosaic.version = 11 : i64} {
  func.func @_temporal_block_kernel(%arg0: i32, %arg1: i32, %arg2: memref<1x32x128xbf16, #tpu.memory_space<vmem>>, %arg3: memref<384x128xbf16, #tpu.memory_space<vmem>>, %arg4: memref<1x128xf32, #tpu.memory_space<vmem>>, %arg5: memref<384x128xbf16, #tpu.memory_space<vmem>>, %arg6: memref<1x128xf32, #tpu.memory_space<vmem>>, %arg7: memref<128x128xbf16, #tpu.memory_space<vmem>>, %arg8: memref<1x128xf32, #tpu.memory_space<vmem>>, %arg9: memref<1x32x128xbf16, #tpu.memory_space<vmem>>, %arg10: memref<16x128xbf16, #tpu.memory_space<vmem>>, %arg11: memref<16x128xbf16, #tpu.memory_space<vmem>>) attributes {dimension_semantics = [#tpu.dimension_semantics<parallel>, #tpu.dimension_semantics<arbitrary>], iteration_bounds = array<i64: 2, 3>, scalar_prefetch = 0 : i64, scratch_operands = 2 : i64, tpu.core_type = #tpu.core_type<tc>, window_params = [{transform_indices = @transform_0, window_bounds = array<i64: 1, 32, 128>}, {pipeline_mode = #tpu.pipeline_mode<synchronous>, transform_indices = @transform_1, window_bounds = array<i64: 384, 128>}, {pipeline_mode = #tpu.pipeline_mode<synchronous>, transform_indices = @transform_2, window_bounds = array<i64: 1, 128>}, {pipeline_mode = #tpu.pipeline_mode<synchronous>, transform_indices = @transform_3, window_bounds = array<i64: 384, 128>}, {pipeline_mode = #tpu.pipeline_mode<synchronous>, transform_indices = @transform_4, window_bounds = array<i64: 1, 128>}, {pipeline_mode = #tpu.pipeline_mode<synchronous>, transform_indices = @transform_5, window_bounds = array<i64: 128, 128>}, {pipeline_mode = #tpu.pipeline_mode<synchronous>, transform_indices = @transform_6, window_bounds = array<i64: 1, 128>}, {transform_indices = @transform_7, window_bounds = array<i64: 1, 32, 128>}]} {
    %c0_i32 = arith.constant 0 : i32
    %0 = arith.cmpi eq, %arg1, %c0_i32 : i32
    %1 = arith.extui %0 : i1 to i32
    %c0_i32_0 = arith.constant 0 : i32
    %2 = arith.cmpi ne, %1, %c0_i32_0 : i32
    scf.if %2 {
      %cst_49 = arith.constant 0.000000e+00 : bf16
      %76 = vector.broadcast %cst_49 : bf16 to vector<16x128xbf16>
      %c0_50 = arith.constant 0 : index
      %c0_51 = arith.constant 0 : index
      %77 = vector.load %arg10[%c0_50, %c0_51] : memref<16x128xbf16, #tpu.memory_space<vmem>>, vector<16x128xbf16>
      tpu.vector_store %arg10[%c0_50, %c0_51], %76 {strides = array<i32>} : memref<16x128xbf16, #tpu.memory_space<vmem>>, vector<16x128xbf16>,
      %cst_52 = arith.constant 0.000000e+00 : bf16
      %78 = vector.broadcast %cst_52 : bf16 to vector<16x128xbf16>
      %c0_53 = arith.constant 0 : index
      %c0_54 = arith.constant 0 : index
      %79 = vector.load %arg11[%c0_53, %c0_54] : memref<16x128xbf16, #tpu.memory_space<vmem>>, vector<16x128xbf16>
      tpu.vector_store %arg11[%c0_53, %c0_54], %78 {strides = array<i32>} : memref<16x128xbf16, #tpu.memory_space<vmem>>, vector<16x128xbf16>,
    } else {
    }
    %c0 = arith.constant 0 : index
    %c0_1 = arith.constant 0 : index
    %c0_2 = arith.constant 0 : index
    %3 = vector.load %arg2[%c0, %c0_1, %c0_2] : memref<1x32x128xbf16, #tpu.memory_space<vmem>>, vector<1x32x128xbf16>
    %4 = vector.shape_cast %3 : vector<1x32x128xbf16> to vector<32x128xbf16>
    %c0_3 = arith.constant 0 : index
    %c0_4 = arith.constant 0 : index
    %5 = vector.load %arg10[%c0_3, %c0_4] : memref<16x128xbf16, #tpu.memory_space<vmem>>, vector<16x128xbf16>
    %6 = tpu.concatenate %5, %4 in 0 : vector<16x128xbf16>, vector<32x128xbf16> -> vector<48x128xbf16>
    %7 = vector.extract_strided_slice %4 {offsets = [16, 0], sizes = [16, 128], strides = [1, 1]} : vector<32x128xbf16> to vector<16x128xbf16>
    %c0_5 = arith.constant 0 : index
    %c0_6 = arith.constant 0 : index
    %8 = vector.load %arg10[%c0_5, %c0_6] : memref<16x128xbf16, #tpu.memory_space<vmem>>, vector<16x128xbf16>
    tpu.vector_store %arg10[%c0_5, %c0_6], %7 {strides = array<i32>} : memref<16x128xbf16, #tpu.memory_space<vmem>>, vector<16x128xbf16>,
    %c0_7 = arith.constant 0 : index
    %c0_8 = arith.constant 0 : index
    %9 = vector.load %arg3[%c0_7, %c0_8] : memref<384x128xbf16, #tpu.memory_space<vmem>>, vector<128x128xbf16>
    %cst = arith.constant dense<0.000000e+00> : vector<48x128xf32>
    %10 = tpu.matmul %6, %9, %cst {dimension_numbers = #tpu.dot_dimension_numbers<[1], [0], [0], [1], [0, 0, 1, 1], [], []>} : vector<48x128xbf16>, vector<128x128xbf16>, vector<48x128xf32> -> vector<48x128xf32>
    %c2_i32 = arith.constant 2 : i32
    %11 = tpu.dynamic_rotate %10 by %c2_i32 dim 0 : vector<48x128xf32>, i32 -> vector<48x128xf32>
    %c128 = arith.constant 128 : index
    %c0_9 = arith.constant 0 : index
    %12 = vector.load %arg3[%c128, %c0_9] : memref<384x128xbf16, #tpu.memory_space<vmem>>, vector<128x128xbf16>
    %cst_10 = arith.constant dense<0.000000e+00> : vector<48x128xf32>
    %13 = tpu.matmul %6, %12, %cst_10 {dimension_numbers = #tpu.dot_dimension_numbers<[1], [0], [0], [1], [0, 0, 1, 1], [], []>} : vector<48x128xbf16>, vector<128x128xbf16>, vector<48x128xf32> -> vector<48x128xf32>
    %c1_i32 = arith.constant 1 : i32
    %14 = tpu.dynamic_rotate %13 by %c1_i32 dim 0 : vector<48x128xf32>, i32 -> vector<48x128xf32>
    %15 = arith.addf %11, %14 : vector<48x128xf32>
    %c256 = arith.constant 256 : index
    %c0_11 = arith.constant 0 : index
    %16 = vector.load %arg3[%c256, %c0_11] : memref<384x128xbf16, #tpu.memory_space<vmem>>, vector<128x128xbf16>
    %cst_12 = arith.constant dense<0.000000e+00> : vector<48x128xf32>
    %17 = tpu.matmul %6, %16, %cst_12 {dimension_numbers = #tpu.dot_dimension_numbers<[1], [0], [0], [1], [0, 0, 1, 1], [], []>} : vector<48x128xbf16>, vector<128x128xbf16>, vector<48x128xf32> -> vector<48x128xf32>
    %18 = arith.addf %15, %17 : vector<48x128xf32>
    %19 = vector.extract_strided_slice %18 {offsets = [16, 0], sizes = [32, 128], strides = [1, 1]} : vector<48x128xf32> to vector<32x128xf32>
    %c0_13 = arith.constant 0 : index
    %c0_14 = arith.constant 0 : index
    %20 = vector.load %arg4[%c0_13, %c0_14] : memref<1x128xf32, #tpu.memory_space<vmem>>, vector<1x128xf32>
    %21 = vector.broadcast %20 : vector<1x128xf32> to vector<32x128xf32>
    %22 = arith.addf %19, %21 : vector<32x128xf32>
    %cst_15 = arith.constant 5.000000e-01 : f32
    %23 = vector.broadcast %cst_15 : f32 to vector<32x128xf32>
    %24 = arith.mulf %23, %22 : vector<32x128xf32>
    %cst_16 = arith.constant 0.707106769 : f32
    %25 = vector.broadcast %cst_16 : f32 to vector<32x128xf32>
    %26 = arith.mulf %22, %25 : vector<32x128xf32>
    %27 = math.erf %26 : vector<32x128xf32>
    %cst_17 = arith.constant 1.000000e+00 : f32
    %28 = vector.broadcast %cst_17 : f32 to vector<32x128xf32>
    %29 = arith.addf %28, %27 : vector<32x128xf32>
    %30 = arith.mulf %24, %29 : vector<32x128xf32>
    %31 = arith.truncf %30 : vector<32x128xf32> to vector<32x128xbf16>
    %c0_18 = arith.constant 0 : index
    %c0_19 = arith.constant 0 : index
    %32 = vector.load %arg11[%c0_18, %c0_19] : memref<16x128xbf16, #tpu.memory_space<vmem>>, vector<16x128xbf16>
    %33 = tpu.concatenate %32, %31 in 0 : vector<16x128xbf16>, vector<32x128xbf16> -> vector<48x128xbf16>
    %34 = vector.extract_strided_slice %31 {offsets = [16, 0], sizes = [16, 128], strides = [1, 1]} : vector<32x128xbf16> to vector<16x128xbf16>
    %c0_20 = arith.constant 0 : index
    %c0_21 = arith.constant 0 : index
    %35 = vector.load %arg11[%c0_20, %c0_21] : memref<16x128xbf16, #tpu.memory_space<vmem>>, vector<16x128xbf16>
    tpu.vector_store %arg11[%c0_20, %c0_21], %34 {strides = array<i32>} : memref<16x128xbf16, #tpu.memory_space<vmem>>, vector<16x128xbf16>,
    %c0_22 = arith.constant 0 : index
    %c0_23 = arith.constant 0 : index
    %36 = vector.load %arg5[%c0_22, %c0_23] : memref<384x128xbf16, #tpu.memory_space<vmem>>, vector<128x128xbf16>
    %cst_24 = arith.constant dense<0.000000e+00> : vector<48x128xf32>
    %37 = tpu.matmul %33, %36, %cst_24 {dimension_numbers = #tpu.dot_dimension_numbers<[1], [0], [0], [1], [0, 0, 1, 1], [], []>} : vector<48x128xbf16>, vector<128x128xbf16>, vector<48x128xf32> -> vector<48x128xf32>
    %c2_i32_25 = arith.constant 2 : i32
    %38 = tpu.dynamic_rotate %37 by %c2_i32_25 dim 0 : vector<48x128xf32>, i32 -> vector<48x128xf32>
    %c128_26 = arith.constant 128 : index
    %c0_27 = arith.constant 0 : index
    %39 = vector.load %arg5[%c128_26, %c0_27] : memref<384x128xbf16, #tpu.memory_space<vmem>>, vector<128x128xbf16>
    %cst_28 = arith.constant dense<0.000000e+00> : vector<48x128xf32>
    %40 = tpu.matmul %33, %39, %cst_28 {dimension_numbers = #tpu.dot_dimension_numbers<[1], [0], [0], [1], [0, 0, 1, 1], [], []>} : vector<48x128xbf16>, vector<128x128xbf16>, vector<48x128xf32> -> vector<48x128xf32>
    %c1_i32_29 = arith.constant 1 : i32
    %41 = tpu.dynamic_rotate %40 by %c1_i32_29 dim 0 : vector<48x128xf32>, i32 -> vector<48x128xf32>
    %42 = arith.addf %38, %41 : vector<48x128xf32>
    %c256_30 = arith.constant 256 : index
    %c0_31 = arith.constant 0 : index
    %43 = vector.load %arg5[%c256_30, %c0_31] : memref<384x128xbf16, #tpu.memory_space<vmem>>, vector<128x128xbf16>
    %cst_32 = arith.constant dense<0.000000e+00> : vector<48x128xf32>
    %44 = tpu.matmul %33, %43, %cst_32 {dimension_numbers = #tpu.dot_dimension_numbers<[1], [0], [0], [1], [0, 0, 1, 1], [], []>} : vector<48x128xbf16>, vector<128x128xbf16>, vector<48x128xf32> -> vector<48x128xf32>
    %45 = arith.addf %42, %44 : vector<48x128xf32>
    %46 = vector.extract_strided_slice %45 {offsets = [16, 0], sizes = [32, 128], strides = [1, 1]} : vector<48x128xf32> to vector<32x128xf32>
    %c0_33 = arith.constant 0 : index
    %c0_34 = arith.constant 0 : index
    %47 = vector.load %arg6[%c0_33, %c0_34] : memref<1x128xf32, #tpu.memory_space<vmem>>, vector<1x128xf32>
    %48 = vector.broadcast %47 : vector<1x128xf32> to vector<32x128xf32>
    %49 = arith.addf %46, %48 : vector<32x128xf32>
    %cst_35 = arith.constant 5.000000e-01 : f32
    %50 = vector.broadcast %cst_35 : f32 to vector<32x128xf32>
    %51 = arith.mulf %50, %49 : vector<32x128xf32>
    %cst_36 = arith.constant 0.707106769 : f32
    %52 = vector.broadcast %cst_36 : f32 to vector<32x128xf32>
    %53 = arith.mulf %49, %52 : vector<32x128xf32>
    %54 = math.erf %53 : vector<32x128xf32>
    %cst_37 = arith.constant 1.000000e+00 : f32
    %55 = vector.broadcast %cst_37 : f32 to vector<32x128xf32>
    %56 = arith.addf %55, %54 : vector<32x128xf32>
    %57 = arith.mulf %51, %56 : vector<32x128xf32>
    %c0_38 = arith.constant 0 : index
    %c0_39 = arith.constant 0 : index
    %58 = vector.load %arg7[%c0_38, %c0_39] : memref<128x128xbf16, #tpu.memory_space<vmem>>, vector<128x128xbf16>
    %cst_40 = arith.constant dense<0.000000e+00> : vector<32x128xf32>
    %59 = tpu.matmul %4, %58, %cst_40 {dimension_numbers = #tpu.dot_dimension_numbers<[1], [0], [0], [1], [0, 0, 1, 1], [], []>} : vector<32x128xbf16>, vector<128x128xbf16>, vector<32x128xf32> -> vector<32x128xf32>
    %c0_41 = arith.constant 0 : index
    %c0_42 = arith.constant 0 : index
    %60 = vector.load %arg8[%c0_41, %c0_42] : memref<1x128xf32, #tpu.memory_space<vmem>>, vector<1x128xf32>
    %61 = vector.broadcast %60 : vector<1x128xf32> to vector<32x128xf32>
    %62 = arith.addf %59, %61 : vector<32x128xf32>
    %63 = arith.addf %57, %62 : vector<32x128xf32>
    %cst_43 = arith.constant 5.000000e-01 : f32
    %64 = vector.broadcast %cst_43 : f32 to vector<32x128xf32>
    %65 = arith.mulf %64, %63 : vector<32x128xf32>
    %cst_44 = arith.constant 0.707106769 : f32
    %66 = vector.broadcast %cst_44 : f32 to vector<32x128xf32>
    %67 = arith.mulf %63, %66 : vector<32x128xf32>
    %68 = math.erf %67 : vector<32x128xf32>
    %cst_45 = arith.constant 1.000000e+00 : f32
    %69 = vector.broadcast %cst_45 : f32 to vector<32x128xf32>
    %70 = arith.addf %69, %68 : vector<32x128xf32>
    %71 = arith.mulf %65, %70 : vector<32x128xf32>
    %72 = arith.truncf %71 : vector<32x128xf32> to vector<32x128xbf16>
    %c0_46 = arith.constant 0 : index
    %c0_47 = arith.constant 0 : index
    %c0_48 = arith.constant 0 : index
    %73 = vector.load %arg9[%c0_46, %c0_47, %c0_48] : memref<1x32x128xbf16, #tpu.memory_space<vmem>>, vector<1x32x128xbf16>
    %74 = vector.shape_cast %73 : vector<1x32x128xbf16> to vector<32x128xbf16>
    %75 = vector.shape_cast %72 : vector<32x128xbf16> to vector<1x32x128xbf16>
    tpu.vector_store %arg9[%c0_46, %c0_47, %c0_48], %75 {strides = array<i32>} : memref<1x32x128xbf16, #tpu.memory_space<vmem>>, vector<1x32x128xbf16>,
    return
  }
  func.func @transform_0(%arg0: i32, %arg1: i32) -> (i32, i32, i32) {
    %c0_i32 = arith.constant 0 : i32
    %c0_i32_0 = arith.constant 0 : i32
    return %arg0, %arg1, %c0_i32 : i32, i32, i32
  }
  func.func @transform_1(%arg0: i32, %arg1: i32) -> (i32, i32) {
    %c0_i32 = arith.constant 0 : i32
    %c0_i32_0 = arith.constant 0 : i32
    %c0_i32_1 = arith.constant 0 : i32
    return %c0_i32, %c0_i32_0 : i32, i32
  }
  func.func @transform_2(%arg0: i32, %arg1: i32) -> (i32, i32) {
    %c0_i32 = arith.constant 0 : i32
    %c0_i32_0 = arith.constant 0 : i32
    %c0_i32_1 = arith.constant 0 : i32
    return %c0_i32, %c0_i32_0 : i32, i32
  }
  func.func @transform_3(%arg0: i32, %arg1: i32) -> (i32, i32) {
    %c0_i32 = arith.constant 0 : i32
    %c0_i32_0 = arith.constant 0 : i32
    %c0_i32_1 = arith.constant 0 : i32
    return %c0_i32, %c0_i32_0 : i32, i32
  }
  func.func @transform_4(%arg0: i32, %arg1: i32) -> (i32, i32) {
    %c0_i32 = arith.constant 0 : i32
    %c0_i32_0 = arith.constant 0 : i32
    %c0_i32_1 = arith.constant 0 : i32
    return %c0_i32, %c0_i32_0 : i32, i32
  }
  func.func @transform_5(%arg0: i32, %arg1: i32) -> (i32, i32) {
    %c0_i32 = arith.constant 0 : i32
    %c0_i32_0 = arith.constant 0 : i32
    %c0_i32_1 = arith.constant 0 : i32
    return %c0_i32, %c0_i32_0 : i32, i32
  }
  func.func @transform_6(%arg0: i32, %arg1: i32) -> (i32, i32) {
    %c0_i32 = arith.constant 0 : i32
    %c0_i32_0 = arith.constant 0 : i32
    %c0_i32_1 = arith.constant 0 : i32
    return %c0_i32, %c0_i32_0 : i32, i32
  }
  func.func @transform_7(%arg0: i32, %arg1: i32) -> (i32, i32, i32) {
    %c0_i32 = arith.constant 0 : i32
    %c0_i32_0 = arith.constant 0 : i32
    return %arg0, %arg1, %c0_i32 : i32, i32, i32
  }
}

module attributes {stable_mosaic.version = 11 : i64} {
  func.func @_temporal_block_kernel(%arg0: i32, %arg1: i32, %arg2: memref<1x32x128xbf16, #tpu.memory_space<vmem>>, %arg3: memref<384x128xbf16, #tpu.memory_space<vmem>>, %arg4: memref<1x128xf32, #tpu.memory_space<vmem>>, %arg5: memref<384x128xbf16, #tpu.memory_space<vmem>>, %arg6: memref<1x128xf32, #tpu.memory_space<vmem>>, %arg7: memref<1x32x128xbf16, #tpu.memory_space<vmem>>, %arg8: memref<16x128xbf16, #tpu.memory_space<vmem>>, %arg9: memref<16x128xbf16, #tpu.memory_space<vmem>>) attributes {dimension_semantics = [#tpu.dimension_semantics<parallel>, #tpu.dimension_semantics<arbitrary>], iteration_bounds = array<i64: 2, 3>, scalar_prefetch = 0 : i64, scratch_operands = 2 : i64, tpu.core_type = #tpu.core_type<tc>, window_params = [{transform_indices = @transform_0, window_bounds = array<i64: 1, 32, 128>}, {pipeline_mode = #tpu.pipeline_mode<synchronous>, transform_indices = @transform_1, window_bounds = array<i64: 384, 128>}, {pipeline_mode = #tpu.pipeline_mode<synchronous>, transform_indices = @transform_2, window_bounds = array<i64: 1, 128>}, {pipeline_mode = #tpu.pipeline_mode<synchronous>, transform_indices = @transform_3, window_bounds = array<i64: 384, 128>}, {pipeline_mode = #tpu.pipeline_mode<synchronous>, transform_indices = @transform_4, window_bounds = array<i64: 1, 128>}, {transform_indices = @transform_5, window_bounds = array<i64: 1, 32, 128>}]} {
    %c0_i32 = arith.constant 0 : i32
    %0 = arith.cmpi eq, %arg1, %c0_i32 : i32
    %1 = arith.extui %0 : i1 to i32
    %c0_i32_0 = arith.constant 0 : i32
    %2 = arith.cmpi ne, %1, %c0_i32_0 : i32
    scf.if %2 {
      %cst_44 = arith.constant 0.000000e+00 : bf16
      %72 = vector.broadcast %cst_44 : bf16 to vector<16x128xbf16>
      %c0_45 = arith.constant 0 : index
      %c0_46 = arith.constant 0 : index
      %73 = vector.load %arg8[%c0_45, %c0_46] : memref<16x128xbf16, #tpu.memory_space<vmem>>, vector<16x128xbf16>
      tpu.vector_store %arg8[%c0_45, %c0_46], %72 {strides = array<i32>} : memref<16x128xbf16, #tpu.memory_space<vmem>>, vector<16x128xbf16>,
      %cst_47 = arith.constant 0.000000e+00 : bf16
      %74 = vector.broadcast %cst_47 : bf16 to vector<16x128xbf16>
      %c0_48 = arith.constant 0 : index
      %c0_49 = arith.constant 0 : index
      %75 = vector.load %arg9[%c0_48, %c0_49] : memref<16x128xbf16, #tpu.memory_space<vmem>>, vector<16x128xbf16>
      tpu.vector_store %arg9[%c0_48, %c0_49], %74 {strides = array<i32>} : memref<16x128xbf16, #tpu.memory_space<vmem>>, vector<16x128xbf16>,
    } else {
    }
    %c0 = arith.constant 0 : index
    %c0_1 = arith.constant 0 : index
    %c0_2 = arith.constant 0 : index
    %3 = vector.load %arg2[%c0, %c0_1, %c0_2] : memref<1x32x128xbf16, #tpu.memory_space<vmem>>, vector<1x32x128xbf16>
    %4 = vector.shape_cast %3 : vector<1x32x128xbf16> to vector<32x128xbf16>
    %c0_3 = arith.constant 0 : index
    %c0_4 = arith.constant 0 : index
    %5 = vector.load %arg8[%c0_3, %c0_4] : memref<16x128xbf16, #tpu.memory_space<vmem>>, vector<16x128xbf16>
    %6 = tpu.concatenate %5, %4 in 0 : vector<16x128xbf16>, vector<32x128xbf16> -> vector<48x128xbf16>
    %7 = vector.extract_strided_slice %4 {offsets = [16, 0], sizes = [16, 128], strides = [1, 1]} : vector<32x128xbf16> to vector<16x128xbf16>
    %c0_5 = arith.constant 0 : index
    %c0_6 = arith.constant 0 : index
    %8 = vector.load %arg8[%c0_5, %c0_6] : memref<16x128xbf16, #tpu.memory_space<vmem>>, vector<16x128xbf16>
    tpu.vector_store %arg8[%c0_5, %c0_6], %7 {strides = array<i32>} : memref<16x128xbf16, #tpu.memory_space<vmem>>, vector<16x128xbf16>,
    %c0_7 = arith.constant 0 : index
    %c0_8 = arith.constant 0 : index
    %9 = vector.load %arg3[%c0_7, %c0_8] : memref<384x128xbf16, #tpu.memory_space<vmem>>, vector<128x128xbf16>
    %cst = arith.constant dense<0.000000e+00> : vector<48x128xf32>
    %10 = tpu.matmul %6, %9, %cst {dimension_numbers = #tpu.dot_dimension_numbers<[1], [0], [0], [1], [0, 0, 1, 1], [], []>} : vector<48x128xbf16>, vector<128x128xbf16>, vector<48x128xf32> -> vector<48x128xf32>
    %c4_i32 = arith.constant 4 : i32
    %11 = tpu.dynamic_rotate %10 by %c4_i32 dim 0 : vector<48x128xf32>, i32 -> vector<48x128xf32>
    %c128 = arith.constant 128 : index
    %c0_9 = arith.constant 0 : index
    %12 = vector.load %arg3[%c128, %c0_9] : memref<384x128xbf16, #tpu.memory_space<vmem>>, vector<128x128xbf16>
    %cst_10 = arith.constant dense<0.000000e+00> : vector<48x128xf32>
    %13 = tpu.matmul %6, %12, %cst_10 {dimension_numbers = #tpu.dot_dimension_numbers<[1], [0], [0], [1], [0, 0, 1, 1], [], []>} : vector<48x128xbf16>, vector<128x128xbf16>, vector<48x128xf32> -> vector<48x128xf32>
    %c2_i32 = arith.constant 2 : i32
    %14 = tpu.dynamic_rotate %13 by %c2_i32 dim 0 : vector<48x128xf32>, i32 -> vector<48x128xf32>
    %15 = arith.addf %11, %14 : vector<48x128xf32>
    %c256 = arith.constant 256 : index
    %c0_11 = arith.constant 0 : index
    %16 = vector.load %arg3[%c256, %c0_11] : memref<384x128xbf16, #tpu.memory_space<vmem>>, vector<128x128xbf16>
    %cst_12 = arith.constant dense<0.000000e+00> : vector<48x128xf32>
    %17 = tpu.matmul %6, %16, %cst_12 {dimension_numbers = #tpu.dot_dimension_numbers<[1], [0], [0], [1], [0, 0, 1, 1], [], []>} : vector<48x128xbf16>, vector<128x128xbf16>, vector<48x128xf32> -> vector<48x128xf32>
    %18 = arith.addf %15, %17 : vector<48x128xf32>
    %19 = vector.extract_strided_slice %18 {offsets = [16, 0], sizes = [32, 128], strides = [1, 1]} : vector<48x128xf32> to vector<32x128xf32>
    %c0_13 = arith.constant 0 : index
    %c0_14 = arith.constant 0 : index
    %20 = vector.load %arg4[%c0_13, %c0_14] : memref<1x128xf32, #tpu.memory_space<vmem>>, vector<1x128xf32>
    %21 = vector.broadcast %20 : vector<1x128xf32> to vector<32x128xf32>
    %22 = arith.addf %19, %21 : vector<32x128xf32>
    %cst_15 = arith.constant 5.000000e-01 : f32
    %23 = vector.broadcast %cst_15 : f32 to vector<32x128xf32>
    %24 = arith.mulf %23, %22 : vector<32x128xf32>
    %cst_16 = arith.constant 0.707106769 : f32
    %25 = vector.broadcast %cst_16 : f32 to vector<32x128xf32>
    %26 = arith.mulf %22, %25 : vector<32x128xf32>
    %27 = math.erf %26 : vector<32x128xf32>
    %cst_17 = arith.constant 1.000000e+00 : f32
    %28 = vector.broadcast %cst_17 : f32 to vector<32x128xf32>
    %29 = arith.addf %28, %27 : vector<32x128xf32>
    %30 = arith.mulf %24, %29 : vector<32x128xf32>
    %31 = arith.truncf %30 : vector<32x128xf32> to vector<32x128xbf16>
    %c0_18 = arith.constant 0 : index
    %c0_19 = arith.constant 0 : index
    %32 = vector.load %arg9[%c0_18, %c0_19] : memref<16x128xbf16, #tpu.memory_space<vmem>>, vector<16x128xbf16>
    %33 = tpu.concatenate %32, %31 in 0 : vector<16x128xbf16>, vector<32x128xbf16> -> vector<48x128xbf16>
    %34 = vector.extract_strided_slice %31 {offsets = [16, 0], sizes = [16, 128], strides = [1, 1]} : vector<32x128xbf16> to vector<16x128xbf16>
    %c0_20 = arith.constant 0 : index
    %c0_21 = arith.constant 0 : index
    %35 = vector.load %arg9[%c0_20, %c0_21] : memref<16x128xbf16, #tpu.memory_space<vmem>>, vector<16x128xbf16>
    tpu.vector_store %arg9[%c0_20, %c0_21], %34 {strides = array<i32>} : memref<16x128xbf16, #tpu.memory_space<vmem>>, vector<16x128xbf16>,
    %c0_22 = arith.constant 0 : index
    %c0_23 = arith.constant 0 : index
    %36 = vector.load %arg5[%c0_22, %c0_23] : memref<384x128xbf16, #tpu.memory_space<vmem>>, vector<128x128xbf16>
    %cst_24 = arith.constant dense<0.000000e+00> : vector<48x128xf32>
    %37 = tpu.matmul %33, %36, %cst_24 {dimension_numbers = #tpu.dot_dimension_numbers<[1], [0], [0], [1], [0, 0, 1, 1], [], []>} : vector<48x128xbf16>, vector<128x128xbf16>, vector<48x128xf32> -> vector<48x128xf32>
    %c4_i32_25 = arith.constant 4 : i32
    %38 = tpu.dynamic_rotate %37 by %c4_i32_25 dim 0 : vector<48x128xf32>, i32 -> vector<48x128xf32>
    %c128_26 = arith.constant 128 : index
    %c0_27 = arith.constant 0 : index
    %39 = vector.load %arg5[%c128_26, %c0_27] : memref<384x128xbf16, #tpu.memory_space<vmem>>, vector<128x128xbf16>
    %cst_28 = arith.constant dense<0.000000e+00> : vector<48x128xf32>
    %40 = tpu.matmul %33, %39, %cst_28 {dimension_numbers = #tpu.dot_dimension_numbers<[1], [0], [0], [1], [0, 0, 1, 1], [], []>} : vector<48x128xbf16>, vector<128x128xbf16>, vector<48x128xf32> -> vector<48x128xf32>
    %c2_i32_29 = arith.constant 2 : i32
    %41 = tpu.dynamic_rotate %40 by %c2_i32_29 dim 0 : vector<48x128xf32>, i32 -> vector<48x128xf32>
    %42 = arith.addf %38, %41 : vector<48x128xf32>
    %c256_30 = arith.constant 256 : index
    %c0_31 = arith.constant 0 : index
    %43 = vector.load %arg5[%c256_30, %c0_31] : memref<384x128xbf16, #tpu.memory_space<vmem>>, vector<128x128xbf16>
    %cst_32 = arith.constant dense<0.000000e+00> : vector<48x128xf32>
    %44 = tpu.matmul %33, %43, %cst_32 {dimension_numbers = #tpu.dot_dimension_numbers<[1], [0], [0], [1], [0, 0, 1, 1], [], []>} : vector<48x128xbf16>, vector<128x128xbf16>, vector<48x128xf32> -> vector<48x128xf32>
    %45 = arith.addf %42, %44 : vector<48x128xf32>
    %46 = vector.extract_strided_slice %45 {offsets = [16, 0], sizes = [32, 128], strides = [1, 1]} : vector<48x128xf32> to vector<32x128xf32>
    %c0_33 = arith.constant 0 : index
    %c0_34 = arith.constant 0 : index
    %47 = vector.load %arg6[%c0_33, %c0_34] : memref<1x128xf32, #tpu.memory_space<vmem>>, vector<1x128xf32>
    %48 = vector.broadcast %47 : vector<1x128xf32> to vector<32x128xf32>
    %49 = arith.addf %46, %48 : vector<32x128xf32>
    %cst_35 = arith.constant 5.000000e-01 : f32
    %50 = vector.broadcast %cst_35 : f32 to vector<32x128xf32>
    %51 = arith.mulf %50, %49 : vector<32x128xf32>
    %cst_36 = arith.constant 0.707106769 : f32
    %52 = vector.broadcast %cst_36 : f32 to vector<32x128xf32>
    %53 = arith.mulf %49, %52 : vector<32x128xf32>
    %54 = math.erf %53 : vector<32x128xf32>
    %cst_37 = arith.constant 1.000000e+00 : f32
    %55 = vector.broadcast %cst_37 : f32 to vector<32x128xf32>
    %56 = arith.addf %55, %54 : vector<32x128xf32>
    %57 = arith.mulf %51, %56 : vector<32x128xf32>
    %58 = arith.extf %4 : vector<32x128xbf16> to vector<32x128xf32>
    %59 = arith.addf %57, %58 : vector<32x128xf32>
    %cst_38 = arith.constant 5.000000e-01 : f32
    %60 = vector.broadcast %cst_38 : f32 to vector<32x128xf32>
    %61 = arith.mulf %60, %59 : vector<32x128xf32>
    %cst_39 = arith.constant 0.707106769 : f32
    %62 = vector.broadcast %cst_39 : f32 to vector<32x128xf32>
    %63 = arith.mulf %59, %62 : vector<32x128xf32>
    %64 = math.erf %63 : vector<32x128xf32>
    %cst_40 = arith.constant 1.000000e+00 : f32
    %65 = vector.broadcast %cst_40 : f32 to vector<32x128xf32>
    %66 = arith.addf %65, %64 : vector<32x128xf32>
    %67 = arith.mulf %61, %66 : vector<32x128xf32>
    %68 = arith.truncf %67 : vector<32x128xf32> to vector<32x128xbf16>
    %c0_41 = arith.constant 0 : index
    %c0_42 = arith.constant 0 : index
    %c0_43 = arith.constant 0 : index
    %69 = vector.load %arg7[%c0_41, %c0_42, %c0_43] : memref<1x32x128xbf16, #tpu.memory_space<vmem>>, vector<1x32x128xbf16>
    %70 = vector.shape_cast %69 : vector<1x32x128xbf16> to vector<32x128xbf16>
    %71 = vector.shape_cast %68 : vector<32x128xbf16> to vector<1x32x128xbf16>
    tpu.vector_store %arg7[%c0_41, %c0_42, %c0_43], %71 {strides = array<i32>} : memref<1x32x128xbf16, #tpu.memory_space<vmem>>, vector<1x32x128xbf16>,
    return
  }
  func.func @transform_0(%arg0: i32, %arg1: i32) -> (i32, i32, i32) {
    %c0_i32 = arith.constant 0 : i32
    %c0_i32_0 = arith.constant 0 : i32
    return %arg0, %arg1, %c0_i32 : i32, i32, i32
  }
  func.func @transform_1(%arg0: i32, %arg1: i32) -> (i32, i32) {
    %c0_i32 = arith.constant 0 : i32
    %c0_i32_0 = arith.constant 0 : i32
    %c0_i32_1 = arith.constant 0 : i32
    return %c0_i32, %c0_i32_0 : i32, i32
  }
  func.func @transform_2(%arg0: i32, %arg1: i32) -> (i32, i32) {
    %c0_i32 = arith.constant 0 : i32
    %c0_i32_0 = arith.constant 0 : i32
    %c0_i32_1 = arith.constant 0 : i32
    return %c0_i32, %c0_i32_0 : i32, i32
  }
  func.func @transform_3(%arg0: i32, %arg1: i32) -> (i32, i32) {
    %c0_i32 = arith.constant 0 : i32
    %c0_i32_0 = arith.constant 0 : i32
    %c0_i32_1 = arith.constant 0 : i32
    return %c0_i32, %c0_i32_0 : i32, i32
  }
  func.func @transform_4(%arg0: i32, %arg1: i32) -> (i32, i32) {
    %c0_i32 = arith.constant 0 : i32
    %c0_i32_0 = arith.constant 0 : i32
    %c0_i32_1 = arith.constant 0 : i32
    return %c0_i32, %c0_i32_0 : i32, i32
  }
  func.func @transform_5(%arg0: i32, %arg1: i32) -> (i32, i32, i32) {
    %c0_i32 = arith.constant 0 : i32
    %c0_i32_0 = arith.constant 0 : i32
    return %arg0, %arg1, %c0_i32 : i32, i32, i32
  }
}

module attributes {stable_mosaic.version = 11 : i64} {
  func.func @_temporal_block_kernel(%arg0: i32, %arg1: i32, %arg2: memref<1x32x128xbf16, #tpu.memory_space<vmem>>, %arg3: memref<384x128xbf16, #tpu.memory_space<vmem>>, %arg4: memref<1x128xf32, #tpu.memory_space<vmem>>, %arg5: memref<384x128xbf16, #tpu.memory_space<vmem>>, %arg6: memref<1x128xf32, #tpu.memory_space<vmem>>, %arg7: memref<1x32x128xbf16, #tpu.memory_space<vmem>>, %arg8: memref<16x128xbf16, #tpu.memory_space<vmem>>, %arg9: memref<16x128xbf16, #tpu.memory_space<vmem>>) attributes {dimension_semantics = [#tpu.dimension_semantics<parallel>, #tpu.dimension_semantics<arbitrary>], iteration_bounds = array<i64: 2, 3>, scalar_prefetch = 0 : i64, scratch_operands = 2 : i64, tpu.core_type = #tpu.core_type<tc>, window_params = [{transform_indices = @transform_0, window_bounds = array<i64: 1, 32, 128>}, {pipeline_mode = #tpu.pipeline_mode<synchronous>, transform_indices = @transform_1, window_bounds = array<i64: 384, 128>}, {pipeline_mode = #tpu.pipeline_mode<synchronous>, transform_indices = @transform_2, window_bounds = array<i64: 1, 128>}, {pipeline_mode = #tpu.pipeline_mode<synchronous>, transform_indices = @transform_3, window_bounds = array<i64: 384, 128>}, {pipeline_mode = #tpu.pipeline_mode<synchronous>, transform_indices = @transform_4, window_bounds = array<i64: 1, 128>}, {transform_indices = @transform_5, window_bounds = array<i64: 1, 32, 128>}]} {
    %c0_i32 = arith.constant 0 : i32
    %0 = arith.cmpi eq, %arg1, %c0_i32 : i32
    %1 = arith.extui %0 : i1 to i32
    %c0_i32_0 = arith.constant 0 : i32
    %2 = arith.cmpi ne, %1, %c0_i32_0 : i32
    scf.if %2 {
      %cst_44 = arith.constant 0.000000e+00 : bf16
      %72 = vector.broadcast %cst_44 : bf16 to vector<16x128xbf16>
      %c0_45 = arith.constant 0 : index
      %c0_46 = arith.constant 0 : index
      %73 = vector.load %arg8[%c0_45, %c0_46] : memref<16x128xbf16, #tpu.memory_space<vmem>>, vector<16x128xbf16>
      tpu.vector_store %arg8[%c0_45, %c0_46], %72 {strides = array<i32>} : memref<16x128xbf16, #tpu.memory_space<vmem>>, vector<16x128xbf16>,
      %cst_47 = arith.constant 0.000000e+00 : bf16
      %74 = vector.broadcast %cst_47 : bf16 to vector<16x128xbf16>
      %c0_48 = arith.constant 0 : index
      %c0_49 = arith.constant 0 : index
      %75 = vector.load %arg9[%c0_48, %c0_49] : memref<16x128xbf16, #tpu.memory_space<vmem>>, vector<16x128xbf16>
      tpu.vector_store %arg9[%c0_48, %c0_49], %74 {strides = array<i32>} : memref<16x128xbf16, #tpu.memory_space<vmem>>, vector<16x128xbf16>,
    } else {
    }
    %c0 = arith.constant 0 : index
    %c0_1 = arith.constant 0 : index
    %c0_2 = arith.constant 0 : index
    %3 = vector.load %arg2[%c0, %c0_1, %c0_2] : memref<1x32x128xbf16, #tpu.memory_space<vmem>>, vector<1x32x128xbf16>
    %4 = vector.shape_cast %3 : vector<1x32x128xbf16> to vector<32x128xbf16>
    %c0_3 = arith.constant 0 : index
    %c0_4 = arith.constant 0 : index
    %5 = vector.load %arg8[%c0_3, %c0_4] : memref<16x128xbf16, #tpu.memory_space<vmem>>, vector<16x128xbf16>
    %6 = tpu.concatenate %5, %4 in 0 : vector<16x128xbf16>, vector<32x128xbf16> -> vector<48x128xbf16>
    %7 = vector.extract_strided_slice %4 {offsets = [16, 0], sizes = [16, 128], strides = [1, 1]} : vector<32x128xbf16> to vector<16x128xbf16>
    %c0_5 = arith.constant 0 : index
    %c0_6 = arith.constant 0 : index
    %8 = vector.load %arg8[%c0_5, %c0_6] : memref<16x128xbf16, #tpu.memory_space<vmem>>, vector<16x128xbf16>
    tpu.vector_store %arg8[%c0_5, %c0_6], %7 {strides = array<i32>} : memref<16x128xbf16, #tpu.memory_space<vmem>>, vector<16x128xbf16>,
    %c0_7 = arith.constant 0 : index
    %c0_8 = arith.constant 0 : index
    %9 = vector.load %arg3[%c0_7, %c0_8] : memref<384x128xbf16, #tpu.memory_space<vmem>>, vector<128x128xbf16>
    %cst = arith.constant dense<0.000000e+00> : vector<48x128xf32>
    %10 = tpu.matmul %6, %9, %cst {dimension_numbers = #tpu.dot_dimension_numbers<[1], [0], [0], [1], [0, 0, 1, 1], [], []>} : vector<48x128xbf16>, vector<128x128xbf16>, vector<48x128xf32> -> vector<48x128xf32>
    %c16_i32 = arith.constant 16 : i32
    %11 = tpu.dynamic_rotate %10 by %c16_i32 dim 0 : vector<48x128xf32>, i32 -> vector<48x128xf32>
    %c128 = arith.constant 128 : index
    %c0_9 = arith.constant 0 : index
    %12 = vector.load %arg3[%c128, %c0_9] : memref<384x128xbf16, #tpu.memory_space<vmem>>, vector<128x128xbf16>
    %cst_10 = arith.constant dense<0.000000e+00> : vector<48x128xf32>
    %13 = tpu.matmul %6, %12, %cst_10 {dimension_numbers = #tpu.dot_dimension_numbers<[1], [0], [0], [1], [0, 0, 1, 1], [], []>} : vector<48x128xbf16>, vector<128x128xbf16>, vector<48x128xf32> -> vector<48x128xf32>
    %c8_i32 = arith.constant 8 : i32
    %14 = tpu.dynamic_rotate %13 by %c8_i32 dim 0 : vector<48x128xf32>, i32 -> vector<48x128xf32>
    %15 = arith.addf %11, %14 : vector<48x128xf32>
    %c256 = arith.constant 256 : index
    %c0_11 = arith.constant 0 : index
    %16 = vector.load %arg3[%c256, %c0_11] : memref<384x128xbf16, #tpu.memory_space<vmem>>, vector<128x128xbf16>
    %cst_12 = arith.constant dense<0.000000e+00> : vector<48x128xf32>
    %17 = tpu.matmul %6, %16, %cst_12 {dimension_numbers = #tpu.dot_dimension_numbers<[1], [0], [0], [1], [0, 0, 1, 1], [], []>} : vector<48x128xbf16>, vector<128x128xbf16>, vector<48x128xf32> -> vector<48x128xf32>
    %18 = arith.addf %15, %17 : vector<48x128xf32>
    %19 = vector.extract_strided_slice %18 {offsets = [16, 0], sizes = [32, 128], strides = [1, 1]} : vector<48x128xf32> to vector<32x128xf32>
    %c0_13 = arith.constant 0 : index
    %c0_14 = arith.constant 0 : index
    %20 = vector.load %arg4[%c0_13, %c0_14] : memref<1x128xf32, #tpu.memory_space<vmem>>, vector<1x128xf32>
    %21 = vector.broadcast %20 : vector<1x128xf32> to vector<32x128xf32>
    %22 = arith.addf %19, %21 : vector<32x128xf32>
    %cst_15 = arith.constant 5.000000e-01 : f32
    %23 = vector.broadcast %cst_15 : f32 to vector<32x128xf32>
    %24 = arith.mulf %23, %22 : vector<32x128xf32>
    %cst_16 = arith.constant 0.707106769 : f32
    %25 = vector.broadcast %cst_16 : f32 to vector<32x128xf32>
    %26 = arith.mulf %22, %25 : vector<32x128xf32>
    %27 = math.erf %26 : vector<32x128xf32>
    %cst_17 = arith.constant 1.000000e+00 : f32
    %28 = vector.broadcast %cst_17 : f32 to vector<32x128xf32>
    %29 = arith.addf %28, %27 : vector<32x128xf32>
    %30 = arith.mulf %24, %29 : vector<32x128xf32>
    %31 = arith.truncf %30 : vector<32x128xf32> to vector<32x128xbf16>
    %c0_18 = arith.constant 0 : index
    %c0_19 = arith.constant 0 : index
    %32 = vector.load %arg9[%c0_18, %c0_19] : memref<16x128xbf16, #tpu.memory_space<vmem>>, vector<16x128xbf16>
    %33 = tpu.concatenate %32, %31 in 0 : vector<16x128xbf16>, vector<32x128xbf16> -> vector<48x128xbf16>
    %34 = vector.extract_strided_slice %31 {offsets = [16, 0], sizes = [16, 128], strides = [1, 1]} : vector<32x128xbf16> to vector<16x128xbf16>
    %c0_20 = arith.constant 0 : index
    %c0_21 = arith.constant 0 : index
    %35 = vector.load %arg9[%c0_20, %c0_21] : memref<16x128xbf16, #tpu.memory_space<vmem>>, vector<16x128xbf16>
    tpu.vector_store %arg9[%c0_20, %c0_21], %34 {strides = array<i32>} : memref<16x128xbf16, #tpu.memory_space<vmem>>, vector<16x128xbf16>,
    %c0_22 = arith.constant 0 : index
    %c0_23 = arith.constant 0 : index
    %36 = vector.load %arg5[%c0_22, %c0_23] : memref<384x128xbf16, #tpu.memory_space<vmem>>, vector<128x128xbf16>
    %cst_24 = arith.constant dense<0.000000e+00> : vector<48x128xf32>
    %37 = tpu.matmul %33, %36, %cst_24 {dimension_numbers = #tpu.dot_dimension_numbers<[1], [0], [0], [1], [0, 0, 1, 1], [], []>} : vector<48x128xbf16>, vector<128x128xbf16>, vector<48x128xf32> -> vector<48x128xf32>
    %c16_i32_25 = arith.constant 16 : i32
    %38 = tpu.dynamic_rotate %37 by %c16_i32_25 dim 0 : vector<48x128xf32>, i32 -> vector<48x128xf32>
    %c128_26 = arith.constant 128 : index
    %c0_27 = arith.constant 0 : index
    %39 = vector.load %arg5[%c128_26, %c0_27] : memref<384x128xbf16, #tpu.memory_space<vmem>>, vector<128x128xbf16>
    %cst_28 = arith.constant dense<0.000000e+00> : vector<48x128xf32>
    %40 = tpu.matmul %33, %39, %cst_28 {dimension_numbers = #tpu.dot_dimension_numbers<[1], [0], [0], [1], [0, 0, 1, 1], [], []>} : vector<48x128xbf16>, vector<128x128xbf16>, vector<48x128xf32> -> vector<48x128xf32>
    %c8_i32_29 = arith.constant 8 : i32
    %41 = tpu.dynamic_rotate %40 by %c8_i32_29 dim 0 : vector<48x128xf32>, i32 -> vector<48x128xf32>
    %42 = arith.addf %38, %41 : vector<48x128xf32>
    %c256_30 = arith.constant 256 : index
    %c0_31 = arith.constant 0 : index
    %43 = vector.load %arg5[%c256_30, %c0_31] : memref<384x128xbf16, #tpu.memory_space<vmem>>, vector<128x128xbf16>
    %cst_32 = arith.constant dense<0.000000e+00> : vector<48x128xf32>
    %44 = tpu.matmul %33, %43, %cst_32 {dimension_numbers = #tpu.dot_dimension_numbers<[1], [0], [0], [1], [0, 0, 1, 1], [], []>} : vector<48x128xbf16>, vector<128x128xbf16>, vector<48x128xf32> -> vector<48x128xf32>
    %45 = arith.addf %42, %44 : vector<48x128xf32>
    %46 = vector.extract_strided_slice %45 {offsets = [16, 0], sizes = [32, 128], strides = [1, 1]} : vector<48x128xf32> to vector<32x128xf32>
    %c0_33 = arith.constant 0 : index
    %c0_34 = arith.constant 0 : index
    %47 = vector.load %arg6[%c0_33, %c0_34] : memref<1x128xf32, #tpu.memory_space<vmem>>, vector<1x128xf32>
    %48 = vector.broadcast %47 : vector<1x128xf32> to vector<32x128xf32>
    %49 = arith.addf %46, %48 : vector<32x128xf32>
    %cst_35 = arith.constant 5.000000e-01 : f32
    %50 = vector.broadcast %cst_35 : f32 to vector<32x128xf32>
    %51 = arith.mulf %50, %49 : vector<32x128xf32>
    %cst_36 = arith.constant 0.707106769 : f32
    %52 = vector.broadcast %cst_36 : f32 to vector<32x128xf32>
    %53 = arith.mulf %49, %52 : vector<32x128xf32>
    %54 = math.erf %53 : vector<32x128xf32>
    %cst_37 = arith.constant 1.000000e+00 : f32
    %55 = vector.broadcast %cst_37 : f32 to vector<32x128xf32>
    %56 = arith.addf %55, %54 : vector<32x128xf32>
    %57 = arith.mulf %51, %56 : vector<32x128xf32>
    %58 = arith.extf %4 : vector<32x128xbf16> to vector<32x128xf32>
    %59 = arith.addf %57, %58 : vector<32x128xf32>
    %cst_38 = arith.constant 5.000000e-01 : f32
    %60 = vector.broadcast %cst_38 : f32 to vector<32x128xf32>
    %61 = arith.mulf %60, %59 : vector<32x128xf32>
    %cst_39 = arith.constant 0.707106769 : f32
    %62 = vector.broadcast %cst_39 : f32 to vector<32x128xf32>
    %63 = arith.mulf %59, %62 : vector<32x128xf32>
    %64 = math.erf %63 : vector<32x128xf32>
    %cst_40 = arith.constant 1.000000e+00 : f32
    %65 = vector.broadcast %cst_40 : f32 to vector<32x128xf32>
    %66 = arith.addf %65, %64 : vector<32x128xf32>
    %67 = arith.mulf %61, %66 : vector<32x128xf32>
    %68 = arith.truncf %67 : vector<32x128xf32> to vector<32x128xbf16>
    %c0_41 = arith.constant 0 : index
    %c0_42 = arith.constant 0 : index
    %c0_43 = arith.constant 0 : index
    %69 = vector.load %arg7[%c0_41, %c0_42, %c0_43] : memref<1x32x128xbf16, #tpu.memory_space<vmem>>, vector<1x32x128xbf16>
    %70 = vector.shape_cast %69 : vector<1x32x128xbf16> to vector<32x128xbf16>
    %71 = vector.shape_cast %68 : vector<32x128xbf16> to vector<1x32x128xbf16>
    tpu.vector_store %arg7[%c0_41, %c0_42, %c0_43], %71 {strides = array<i32>} : memref<1x32x128xbf16, #tpu.memory_space<vmem>>, vector<1x32x128xbf16>,
    return
  }
  func.func @transform_0(%arg0: i32, %arg1: i32) -> (i32, i32, i32) {
    %c0_i32 = arith.constant 0 : i32
    %c0_i32_0 = arith.constant 0 : i32
    return %arg0, %arg1, %c0_i32 : i32, i32, i32
  }
  func.func @transform_1(%arg0: i32, %arg1: i32) -> (i32, i32) {
    %c0_i32 = arith.constant 0 : i32
    %c0_i32_0 = arith.constant 0 : i32
    %c0_i32_1 = arith.constant 0 : i32
    return %c0_i32, %c0_i32_0 : i32, i32
  }
  func.func @transform_2(%arg0: i32, %arg1: i32) -> (i32, i32) {
    %c0_i32 = arith.constant 0 : i32
    %c0_i32_0 = arith.constant 0 : i32
    %c0_i32_1 = arith.constant 0 : i32
    return %c0_i32, %c0_i32_0 : i32, i32
  }
  func.func @transform_3(%arg0: i32, %arg1: i32) -> (i32, i32) {
    %c0_i32 = arith.constant 0 : i32
    %c0_i32_0 = arith.constant 0 : i32
    %c0_i32_1 = arith.constant 0 : i32
    return %c0_i32, %c0_i32_0 : i32, i32
  }
  func.func @transform_4(%arg0: i32, %arg1: i32) -> (i32, i32) {
    %c0_i32 = arith.constant 0 : i32
    %c0_i32_0 = arith.constant 0 : i32
    %c0_i32_1 = arith.constant 0 : i32
    return %c0_i32, %c0_i32_0 : i32, i32
  }
  func.func @transform_5(%arg0: i32, %arg1: i32) -> (i32, i32, i32) {
    %c0_i32 = arith.constant 0 : i32
    %c0_i32_0 = arith.constant 0 : i32
    return %arg0, %arg1, %c0_i32 : i32, i32, i32
  }
}

module attributes {stable_mosaic.version = 11 : i64} {
  func.func @_temporal_block_kernel(%arg0: i32, %arg1: i32, %arg2: memref<1x32x128xbf16, #tpu.memory_space<vmem>>, %arg3: memref<384x128xbf16, #tpu.memory_space<vmem>>, %arg4: memref<1x128xf32, #tpu.memory_space<vmem>>, %arg5: memref<384x128xbf16, #tpu.memory_space<vmem>>, %arg6: memref<1x128xf32, #tpu.memory_space<vmem>>, %arg7: memref<128x128xbf16, #tpu.memory_space<vmem>>, %arg8: memref<1x128xf32, #tpu.memory_space<vmem>>, %arg9: memref<1x32x128xbf16, #tpu.memory_space<vmem>>, %arg10: memref<16x128xbf16, #tpu.memory_space<vmem>>, %arg11: memref<16x128xbf16, #tpu.memory_space<vmem>>) attributes {dimension_semantics = [#tpu.dimension_semantics<parallel>, #tpu.dimension_semantics<arbitrary>], iteration_bounds = array<i64: 2, 3>, scalar_prefetch = 0 : i64, scratch_operands = 2 : i64, tpu.core_type = #tpu.core_type<tc>, window_params = [{transform_indices = @transform_0, window_bounds = array<i64: 1, 32, 128>}, {pipeline_mode = #tpu.pipeline_mode<synchronous>, transform_indices = @transform_1, window_bounds = array<i64: 384, 128>}, {pipeline_mode = #tpu.pipeline_mode<synchronous>, transform_indices = @transform_2, window_bounds = array<i64: 1, 128>}, {pipeline_mode = #tpu.pipeline_mode<synchronous>, transform_indices = @transform_3, window_bounds = array<i64: 384, 128>}, {pipeline_mode = #tpu.pipeline_mode<synchronous>, transform_indices = @transform_4, window_bounds = array<i64: 1, 128>}, {pipeline_mode = #tpu.pipeline_mode<synchronous>, transform_indices = @transform_5, window_bounds = array<i64: 128, 128>}, {pipeline_mode = #tpu.pipeline_mode<synchronous>, transform_indices = @transform_6, window_bounds = array<i64: 1, 128>}, {transform_indices = @transform_7, window_bounds = array<i64: 1, 32, 128>}]} {
    %c0_i32 = arith.constant 0 : i32
    %0 = arith.cmpi eq, %arg1, %c0_i32 : i32
    %1 = arith.extui %0 : i1 to i32
    %c0_i32_0 = arith.constant 0 : i32
    %2 = arith.cmpi ne, %1, %c0_i32_0 : i32
    scf.if %2 {
      %cst_49 = arith.constant 0.000000e+00 : bf16
      %76 = vector.broadcast %cst_49 : bf16 to vector<16x128xbf16>
      %c0_50 = arith.constant 0 : index
      %c0_51 = arith.constant 0 : index
      %77 = vector.load %arg10[%c0_50, %c0_51] : memref<16x128xbf16, #tpu.memory_space<vmem>>, vector<16x128xbf16>
      tpu.vector_store %arg10[%c0_50, %c0_51], %76 {strides = array<i32>} : memref<16x128xbf16, #tpu.memory_space<vmem>>, vector<16x128xbf16>,
      %cst_52 = arith.constant 0.000000e+00 : bf16
      %78 = vector.broadcast %cst_52 : bf16 to vector<16x128xbf16>
      %c0_53 = arith.constant 0 : index
      %c0_54 = arith.constant 0 : index
      %79 = vector.load %arg11[%c0_53, %c0_54] : memref<16x128xbf16, #tpu.memory_space<vmem>>, vector<16x128xbf16>
      tpu.vector_store %arg11[%c0_53, %c0_54], %78 {strides = array<i32>} : memref<16x128xbf16, #tpu.memory_space<vmem>>, vector<16x128xbf16>,
    } else {
    }
    %c0 = arith.constant 0 : index
    %c0_1 = arith.constant 0 : index
    %c0_2 = arith.constant 0 : index
    %3 = vector.load %arg2[%c0, %c0_1, %c0_2] : memref<1x32x128xbf16, #tpu.memory_space<vmem>>, vector<1x32x128xbf16>
    %4 = vector.shape_cast %3 : vector<1x32x128xbf16> to vector<32x128xbf16>
    %c0_3 = arith.constant 0 : index
    %c0_4 = arith.constant 0 : index
    %5 = vector.load %arg10[%c0_3, %c0_4] : memref<16x128xbf16, #tpu.memory_space<vmem>>, vector<16x128xbf16>
    %6 = tpu.concatenate %5, %4 in 0 : vector<16x128xbf16>, vector<32x128xbf16> -> vector<48x128xbf16>
    %7 = vector.extract_strided_slice %4 {offsets = [16, 0], sizes = [16, 128], strides = [1, 1]} : vector<32x128xbf16> to vector<16x128xbf16>
    %c0_5 = arith.constant 0 : index
    %c0_6 = arith.constant 0 : index
    %8 = vector.load %arg10[%c0_5, %c0_6] : memref<16x128xbf16, #tpu.memory_space<vmem>>, vector<16x128xbf16>
    tpu.vector_store %arg10[%c0_5, %c0_6], %7 {strides = array<i32>} : memref<16x128xbf16, #tpu.memory_space<vmem>>, vector<16x128xbf16>,
    %c0_7 = arith.constant 0 : index
    %c0_8 = arith.constant 0 : index
    %9 = vector.load %arg3[%c0_7, %c0_8] : memref<384x128xbf16, #tpu.memory_space<vmem>>, vector<128x128xbf16>
    %cst = arith.constant dense<0.000000e+00> : vector<48x128xf32>
    %10 = tpu.matmul %6, %9, %cst {dimension_numbers = #tpu.dot_dimension_numbers<[1], [0], [0], [1], [0, 0, 1, 1], [], []>} : vector<48x128xbf16>, vector<128x128xbf16>, vector<48x128xf32> -> vector<48x128xf32>
    %c8_i32 = arith.constant 8 : i32
    %11 = tpu.dynamic_rotate %10 by %c8_i32 dim 0 : vector<48x128xf32>, i32 -> vector<48x128xf32>
    %c128 = arith.constant 128 : index
    %c0_9 = arith.constant 0 : index
    %12 = vector.load %arg3[%c128, %c0_9] : memref<384x128xbf16, #tpu.memory_space<vmem>>, vector<128x128xbf16>
    %cst_10 = arith.constant dense<0.000000e+00> : vector<48x128xf32>
    %13 = tpu.matmul %6, %12, %cst_10 {dimension_numbers = #tpu.dot_dimension_numbers<[1], [0], [0], [1], [0, 0, 1, 1], [], []>} : vector<48x128xbf16>, vector<128x128xbf16>, vector<48x128xf32> -> vector<48x128xf32>
    %c4_i32 = arith.constant 4 : i32
    %14 = tpu.dynamic_rotate %13 by %c4_i32 dim 0 : vector<48x128xf32>, i32 -> vector<48x128xf32>
    %15 = arith.addf %11, %14 : vector<48x128xf32>
    %c256 = arith.constant 256 : index
    %c0_11 = arith.constant 0 : index
    %16 = vector.load %arg3[%c256, %c0_11] : memref<384x128xbf16, #tpu.memory_space<vmem>>, vector<128x128xbf16>
    %cst_12 = arith.constant dense<0.000000e+00> : vector<48x128xf32>
    %17 = tpu.matmul %6, %16, %cst_12 {dimension_numbers = #tpu.dot_dimension_numbers<[1], [0], [0], [1], [0, 0, 1, 1], [], []>} : vector<48x128xbf16>, vector<128x128xbf16>, vector<48x128xf32> -> vector<48x128xf32>
    %18 = arith.addf %15, %17 : vector<48x128xf32>
    %19 = vector.extract_strided_slice %18 {offsets = [16, 0], sizes = [32, 128], strides = [1, 1]} : vector<48x128xf32> to vector<32x128xf32>
    %c0_13 = arith.constant 0 : index
    %c0_14 = arith.constant 0 : index
    %20 = vector.load %arg4[%c0_13, %c0_14] : memref<1x128xf32, #tpu.memory_space<vmem>>, vector<1x128xf32>
    %21 = vector.broadcast %20 : vector<1x128xf32> to vector<32x128xf32>
    %22 = arith.addf %19, %21 : vector<32x128xf32>
    %cst_15 = arith.constant 5.000000e-01 : f32
    %23 = vector.broadcast %cst_15 : f32 to vector<32x128xf32>
    %24 = arith.mulf %23, %22 : vector<32x128xf32>
    %cst_16 = arith.constant 0.707106769 : f32
    %25 = vector.broadcast %cst_16 : f32 to vector<32x128xf32>
    %26 = arith.mulf %22, %25 : vector<32x128xf32>
    %27 = math.erf %26 : vector<32x128xf32>
    %cst_17 = arith.constant 1.000000e+00 : f32
    %28 = vector.broadcast %cst_17 : f32 to vector<32x128xf32>
    %29 = arith.addf %28, %27 : vector<32x128xf32>
    %30 = arith.mulf %24, %29 : vector<32x128xf32>
    %31 = arith.truncf %30 : vector<32x128xf32> to vector<32x128xbf16>
    %c0_18 = arith.constant 0 : index
    %c0_19 = arith.constant 0 : index
    %32 = vector.load %arg11[%c0_18, %c0_19] : memref<16x128xbf16, #tpu.memory_space<vmem>>, vector<16x128xbf16>
    %33 = tpu.concatenate %32, %31 in 0 : vector<16x128xbf16>, vector<32x128xbf16> -> vector<48x128xbf16>
    %34 = vector.extract_strided_slice %31 {offsets = [16, 0], sizes = [16, 128], strides = [1, 1]} : vector<32x128xbf16> to vector<16x128xbf16>
    %c0_20 = arith.constant 0 : index
    %c0_21 = arith.constant 0 : index
    %35 = vector.load %arg11[%c0_20, %c0_21] : memref<16x128xbf16, #tpu.memory_space<vmem>>, vector<16x128xbf16>
    tpu.vector_store %arg11[%c0_20, %c0_21], %34 {strides = array<i32>} : memref<16x128xbf16, #tpu.memory_space<vmem>>, vector<16x128xbf16>,
    %c0_22 = arith.constant 0 : index
    %c0_23 = arith.constant 0 : index
    %36 = vector.load %arg5[%c0_22, %c0_23] : memref<384x128xbf16, #tpu.memory_space<vmem>>, vector<128x128xbf16>
    %cst_24 = arith.constant dense<0.000000e+00> : vector<48x128xf32>
    %37 = tpu.matmul %33, %36, %cst_24 {dimension_numbers = #tpu.dot_dimension_numbers<[1], [0], [0], [1], [0, 0, 1, 1], [], []>} : vector<48x128xbf16>, vector<128x128xbf16>, vector<48x128xf32> -> vector<48x128xf32>
    %c8_i32_25 = arith.constant 8 : i32
    %38 = tpu.dynamic_rotate %37 by %c8_i32_25 dim 0 : vector<48x128xf32>, i32 -> vector<48x128xf32>
    %c128_26 = arith.constant 128 : index
    %c0_27 = arith.constant 0 : index
    %39 = vector.load %arg5[%c128_26, %c0_27] : memref<384x128xbf16, #tpu.memory_space<vmem>>, vector<128x128xbf16>
    %cst_28 = arith.constant dense<0.000000e+00> : vector<48x128xf32>
    %40 = tpu.matmul %33, %39, %cst_28 {dimension_numbers = #tpu.dot_dimension_numbers<[1], [0], [0], [1], [0, 0, 1, 1], [], []>} : vector<48x128xbf16>, vector<128x128xbf16>, vector<48x128xf32> -> vector<48x128xf32>
    %c4_i32_29 = arith.constant 4 : i32
    %41 = tpu.dynamic_rotate %40 by %c4_i32_29 dim 0 : vector<48x128xf32>, i32 -> vector<48x128xf32>
    %42 = arith.addf %38, %41 : vector<48x128xf32>
    %c256_30 = arith.constant 256 : index
    %c0_31 = arith.constant 0 : index
    %43 = vector.load %arg5[%c256_30, %c0_31] : memref<384x128xbf16, #tpu.memory_space<vmem>>, vector<128x128xbf16>
    %cst_32 = arith.constant dense<0.000000e+00> : vector<48x128xf32>
    %44 = tpu.matmul %33, %43, %cst_32 {dimension_numbers = #tpu.dot_dimension_numbers<[1], [0], [0], [1], [0, 0, 1, 1], [], []>} : vector<48x128xbf16>, vector<128x128xbf16>, vector<48x128xf32> -> vector<48x128xf32>
    %45 = arith.addf %42, %44 : vector<48x128xf32>
    %46 = vector.extract_strided_slice %45 {offsets = [16, 0], sizes = [32, 128], strides = [1, 1]} : vector<48x128xf32> to vector<32x128xf32>
    %c0_33 = arith.constant 0 : index
    %c0_34 = arith.constant 0 : index
    %47 = vector.load %arg6[%c0_33, %c0_34] : memref<1x128xf32, #tpu.memory_space<vmem>>, vector<1x128xf32>
    %48 = vector.broadcast %47 : vector<1x128xf32> to vector<32x128xf32>
    %49 = arith.addf %46, %48 : vector<32x128xf32>
    %cst_35 = arith.constant 5.000000e-01 : f32
    %50 = vector.broadcast %cst_35 : f32 to vector<32x128xf32>
    %51 = arith.mulf %50, %49 : vector<32x128xf32>
    %cst_36 = arith.constant 0.707106769 : f32
    %52 = vector.broadcast %cst_36 : f32 to vector<32x128xf32>
    %53 = arith.mulf %49, %52 : vector<32x128xf32>
    %54 = math.erf %53 : vector<32x128xf32>
    %cst_37 = arith.constant 1.000000e+00 : f32
    %55 = vector.broadcast %cst_37 : f32 to vector<32x128xf32>
    %56 = arith.addf %55, %54 : vector<32x128xf32>
    %57 = arith.mulf %51, %56 : vector<32x128xf32>
    %c0_38 = arith.constant 0 : index
    %c0_39 = arith.constant 0 : index
    %58 = vector.load %arg7[%c0_38, %c0_39] : memref<128x128xbf16, #tpu.memory_space<vmem>>, vector<128x128xbf16>
    %cst_40 = arith.constant dense<0.000000e+00> : vector<32x128xf32>
    %59 = tpu.matmul %4, %58, %cst_40 {dimension_numbers = #tpu.dot_dimension_numbers<[1], [0], [0], [1], [0, 0, 1, 1], [], []>} : vector<32x128xbf16>, vector<128x128xbf16>, vector<32x128xf32> -> vector<32x128xf32>
    %c0_41 = arith.constant 0 : index
    %c0_42 = arith.constant 0 : index
    %60 = vector.load %arg8[%c0_41, %c0_42] : memref<1x128xf32, #tpu.memory_space<vmem>>, vector<1x128xf32>
    %61 = vector.broadcast %60 : vector<1x128xf32> to vector<32x128xf32>
    %62 = arith.addf %59, %61 : vector<32x128xf32>
    %63 = arith.addf %57, %62 : vector<32x128xf32>
    %cst_43 = arith.constant 5.000000e-01 : f32
    %64 = vector.broadcast %cst_43 : f32 to vector<32x128xf32>
    %65 = arith.mulf %64, %63 : vector<32x128xf32>
    %cst_44 = arith.constant 0.707106769 : f32
    %66 = vector.broadcast %cst_44 : f32 to vector<32x128xf32>
    %67 = arith.mulf %63, %66 : vector<32x128xf32>
    %68 = math.erf %67 : vector<32x128xf32>
    %cst_45 = arith.constant 1.000000e+00 : f32
    %69 = vector.broadcast %cst_45 : f32 to vector<32x128xf32>
    %70 = arith.addf %69, %68 : vector<32x128xf32>
    %71 = arith.mulf %65, %70 : vector<32x128xf32>
    %72 = arith.truncf %71 : vector<32x128xf32> to vector<32x128xbf16>
    %c0_46 = arith.constant 0 : index
    %c0_47 = arith.constant 0 : index
    %c0_48 = arith.constant 0 : index
    %73 = vector.load %arg9[%c0_46, %c0_47, %c0_48] : memref<1x32x128xbf16, #tpu.memory_space<vmem>>, vector<1x32x128xbf16>
    %74 = vector.shape_cast %73 : vector<1x32x128xbf16> to vector<32x128xbf16>
    %75 = vector.shape_cast %72 : vector<32x128xbf16> to vector<1x32x128xbf16>
    tpu.vector_store %arg9[%c0_46, %c0_47, %c0_48], %75 {strides = array<i32>} : memref<1x32x128xbf16, #tpu.memory_space<vmem>>, vector<1x32x128xbf16>,
    return
  }
  func.func @transform_0(%arg0: i32, %arg1: i32) -> (i32, i32, i32) {
    %c0_i32 = arith.constant 0 : i32
    %c0_i32_0 = arith.constant 0 : i32
    return %arg0, %arg1, %c0_i32 : i32, i32, i32
  }
  func.func @transform_1(%arg0: i32, %arg1: i32) -> (i32, i32) {
    %c0_i32 = arith.constant 0 : i32
    %c0_i32_0 = arith.constant 0 : i32
    %c0_i32_1 = arith.constant 0 : i32
    return %c0_i32, %c0_i32_0 : i32, i32
  }
  func.func @transform_2(%arg0: i32, %arg1: i32) -> (i32, i32) {
    %c0_i32 = arith.constant 0 : i32
    %c0_i32_0 = arith.constant 0 : i32
    %c0_i32_1 = arith.constant 0 : i32
    return %c0_i32, %c0_i32_0 : i32, i32
  }
  func.func @transform_3(%arg0: i32, %arg1: i32) -> (i32, i32) {
    %c0_i32 = arith.constant 0 : i32
    %c0_i32_0 = arith.constant 0 : i32
    %c0_i32_1 = arith.constant 0 : i32
    return %c0_i32, %c0_i32_0 : i32, i32
  }
  func.func @transform_4(%arg0: i32, %arg1: i32) -> (i32, i32) {
    %c0_i32 = arith.constant 0 : i32
    %c0_i32_0 = arith.constant 0 : i32
    %c0_i32_1 = arith.constant 0 : i32
    return %c0_i32, %c0_i32_0 : i32, i32
  }
  func.func @transform_5(%arg0: i32, %arg1: i32) -> (i32, i32) {
    %c0_i32 = arith.constant 0 : i32
    %c0_i32_0 = arith.constant 0 : i32
    %c0_i32_1 = arith.constant 0 : i32
    return %c0_i32, %c0_i32_0 : i32, i32
  }
  func.func @transform_6(%arg0: i32, %arg1: i32) -> (i32, i32) {
    %c0_i32 = arith.constant 0 : i32
    %c0_i32_0 = arith.constant 0 : i32
    %c0_i32_1 = arith.constant 0 : i32
    return %c0_i32, %c0_i32_0 : i32, i32
  }
  func.func @transform_7(%arg0: i32, %arg1: i32) -> (i32, i32, i32) {
    %c0_i32 = arith.constant 0 : i32
    %c0_i32_0 = arith.constant 0 : i32
    return %arg0, %arg1, %c0_i32 : i32, i32, i32
  }
}

module attributes {stable_mosaic.version = 11 : i64} {
  func.func @_temporal_block_kernel(%arg0: i32, %arg1: i32, %arg2: memref<1x32x128xbf16, #tpu.memory_space<vmem>>, %arg3: memref<384x128xbf16, #tpu.memory_space<vmem>>, %arg4: memref<1x128xf32, #tpu.memory_space<vmem>>, %arg5: memref<384x128xbf16, #tpu.memory_space<vmem>>, %arg6: memref<1x128xf32, #tpu.memory_space<vmem>>, %arg7: memref<1x32x128xf32, #tpu.memory_space<vmem>>, %arg8: memref<32x128xbf16, #tpu.memory_space<vmem>>, %arg9: memref<32x128xbf16, #tpu.memory_space<vmem>>) attributes {dimension_semantics = [#tpu.dimension_semantics<parallel>, #tpu.dimension_semantics<arbitrary>], iteration_bounds = array<i64: 2, 3>, scalar_prefetch = 0 : i64, scratch_operands = 2 : i64, tpu.core_type = #tpu.core_type<tc>, window_params = [{transform_indices = @transform_0, window_bounds = array<i64: 1, 32, 128>}, {pipeline_mode = #tpu.pipeline_mode<synchronous>, transform_indices = @transform_1, window_bounds = array<i64: 384, 128>}, {pipeline_mode = #tpu.pipeline_mode<synchronous>, transform_indices = @transform_2, window_bounds = array<i64: 1, 128>}, {pipeline_mode = #tpu.pipeline_mode<synchronous>, transform_indices = @transform_3, window_bounds = array<i64: 384, 128>}, {pipeline_mode = #tpu.pipeline_mode<synchronous>, transform_indices = @transform_4, window_bounds = array<i64: 1, 128>}, {transform_indices = @transform_5, window_bounds = array<i64: 1, 32, 128>}]} {
    %c0_i32 = arith.constant 0 : i32
    %0 = arith.cmpi eq, %arg1, %c0_i32 : i32
    %1 = arith.extui %0 : i1 to i32
    %c0_i32_0 = arith.constant 0 : i32
    %2 = arith.cmpi ne, %1, %c0_i32_0 : i32
    scf.if %2 {
      %cst_32 = arith.constant 0.000000e+00 : bf16
      %59 = vector.broadcast %cst_32 : bf16 to vector<32x128xbf16>
      %c0_33 = arith.constant 0 : index
      %c0_34 = arith.constant 0 : index
      %60 = vector.load %arg8[%c0_33, %c0_34] : memref<32x128xbf16, #tpu.memory_space<vmem>>, vector<32x128xbf16>
      tpu.vector_store %arg8[%c0_33, %c0_34], %59 {strides = array<i32>} : memref<32x128xbf16, #tpu.memory_space<vmem>>, vector<32x128xbf16>,
      %cst_35 = arith.constant 0.000000e+00 : bf16
      %61 = vector.broadcast %cst_35 : bf16 to vector<32x128xbf16>
      %c0_36 = arith.constant 0 : index
      %c0_37 = arith.constant 0 : index
      %62 = vector.load %arg9[%c0_36, %c0_37] : memref<32x128xbf16, #tpu.memory_space<vmem>>, vector<32x128xbf16>
      tpu.vector_store %arg9[%c0_36, %c0_37], %61 {strides = array<i32>} : memref<32x128xbf16, #tpu.memory_space<vmem>>, vector<32x128xbf16>,
    } else {
    }
    %c0 = arith.constant 0 : index
    %c0_1 = arith.constant 0 : index
    %c0_2 = arith.constant 0 : index
    %3 = vector.load %arg2[%c0, %c0_1, %c0_2] : memref<1x32x128xbf16, #tpu.memory_space<vmem>>, vector<1x32x128xbf16>
    %4 = vector.shape_cast %3 : vector<1x32x128xbf16> to vector<32x128xbf16>
    %c0_3 = arith.constant 0 : index
    %c0_4 = arith.constant 0 : index
    %5 = vector.load %arg8[%c0_3, %c0_4] : memref<32x128xbf16, #tpu.memory_space<vmem>>, vector<32x128xbf16>
    %6 = tpu.concatenate %5, %4 in 0 : vector<32x128xbf16>, vector<32x128xbf16> -> vector<64x128xbf16>
    %c0_5 = arith.constant 0 : index
    %c0_6 = arith.constant 0 : index
    %7 = vector.load %arg8[%c0_5, %c0_6] : memref<32x128xbf16, #tpu.memory_space<vmem>>, vector<32x128xbf16>
    tpu.vector_store %arg8[%c0_5, %c0_6], %4 {strides = array<i32>} : memref<32x128xbf16, #tpu.memory_space<vmem>>, vector<32x128xbf16>,
    %8 = vector.extract_strided_slice %6 {offsets = [0, 0], sizes = [32, 128], strides = [1, 1]} : vector<64x128xbf16> to vector<32x128xbf16>
    %9 = vector.extract_strided_slice %6 {offsets = [16, 0], sizes = [32, 128], strides = [1, 1]} : vector<64x128xbf16> to vector<32x128xbf16>
    %10 = vector.extract_strided_slice %6 {offsets = [32, 0], sizes = [32, 128], strides = [1, 1]} : vector<64x128xbf16> to vector<32x128xbf16>
    %11 = tpu.concatenate %8, %9, %10 in 1 : vector<32x128xbf16>, vector<32x128xbf16>, vector<32x128xbf16> -> vector<32x384xbf16>
    %c0_7 = arith.constant 0 : index
    %c0_8 = arith.constant 0 : index
    %12 = vector.load %arg3[%c0_7, %c0_8] : memref<384x128xbf16, #tpu.memory_space<vmem>>, vector<384x128xbf16>
    %cst = arith.constant dense<0.000000e+00> : vector<32x128xf32>
    %13 = tpu.matmul %11, %12, %cst {dimension_numbers = #tpu.dot_dimension_numbers<[1], [0], [0], [1], [0, 0, 1, 1], [], []>} : vector<32x384xbf16>, vector<384x128xbf16>, vector<32x128xf32> -> vector<32x128xf32>
    %c0_9 = arith.constant 0 : index
    %c0_10 = arith.constant 0 : index
    %14 = vector.load %arg4[%c0_9, %c0_10] : memref<1x128xf32, #tpu.memory_space<vmem>>, vector<1x128xf32>
    %15 = vector.broadcast %14 : vector<1x128xf32> to vector<32x128xf32>
    %16 = arith.addf %13, %15 : vector<32x128xf32>
    %cst_11 = arith.constant 5.000000e-01 : f32
    %17 = vector.broadcast %cst_11 : f32 to vector<32x128xf32>
    %18 = arith.mulf %17, %16 : vector<32x128xf32>
    %cst_12 = arith.constant 0.707106769 : f32
    %19 = vector.broadcast %cst_12 : f32 to vector<32x128xf32>
    %20 = arith.mulf %16, %19 : vector<32x128xf32>
    %21 = math.erf %20 : vector<32x128xf32>
    %cst_13 = arith.constant 1.000000e+00 : f32
    %22 = vector.broadcast %cst_13 : f32 to vector<32x128xf32>
    %23 = arith.addf %22, %21 : vector<32x128xf32>
    %24 = arith.mulf %18, %23 : vector<32x128xf32>
    %25 = arith.truncf %24 : vector<32x128xf32> to vector<32x128xbf16>
    %c0_14 = arith.constant 0 : index
    %c0_15 = arith.constant 0 : index
    %26 = vector.load %arg9[%c0_14, %c0_15] : memref<32x128xbf16, #tpu.memory_space<vmem>>, vector<32x128xbf16>
    %27 = tpu.concatenate %26, %25 in 0 : vector<32x128xbf16>, vector<32x128xbf16> -> vector<64x128xbf16>
    %c0_16 = arith.constant 0 : index
    %c0_17 = arith.constant 0 : index
    %28 = vector.load %arg9[%c0_16, %c0_17] : memref<32x128xbf16, #tpu.memory_space<vmem>>, vector<32x128xbf16>
    tpu.vector_store %arg9[%c0_16, %c0_17], %25 {strides = array<i32>} : memref<32x128xbf16, #tpu.memory_space<vmem>>, vector<32x128xbf16>,
    %29 = vector.extract_strided_slice %27 {offsets = [0, 0], sizes = [32, 128], strides = [1, 1]} : vector<64x128xbf16> to vector<32x128xbf16>
    %30 = vector.extract_strided_slice %27 {offsets = [16, 0], sizes = [32, 128], strides = [1, 1]} : vector<64x128xbf16> to vector<32x128xbf16>
    %31 = vector.extract_strided_slice %27 {offsets = [32, 0], sizes = [32, 128], strides = [1, 1]} : vector<64x128xbf16> to vector<32x128xbf16>
    %32 = tpu.concatenate %29, %30, %31 in 1 : vector<32x128xbf16>, vector<32x128xbf16>, vector<32x128xbf16> -> vector<32x384xbf16>
    %c0_18 = arith.constant 0 : index
    %c0_19 = arith.constant 0 : index
    %33 = vector.load %arg5[%c0_18, %c0_19] : memref<384x128xbf16, #tpu.memory_space<vmem>>, vector<384x128xbf16>
    %cst_20 = arith.constant dense<0.000000e+00> : vector<32x128xf32>
    %34 = tpu.matmul %32, %33, %cst_20 {dimension_numbers = #tpu.dot_dimension_numbers<[1], [0], [0], [1], [0, 0, 1, 1], [], []>} : vector<32x384xbf16>, vector<384x128xbf16>, vector<32x128xf32> -> vector<32x128xf32>
    %c0_21 = arith.constant 0 : index
    %c0_22 = arith.constant 0 : index
    %35 = vector.load %arg6[%c0_21, %c0_22] : memref<1x128xf32, #tpu.memory_space<vmem>>, vector<1x128xf32>
    %36 = vector.broadcast %35 : vector<1x128xf32> to vector<32x128xf32>
    %37 = arith.addf %34, %36 : vector<32x128xf32>
    %cst_23 = arith.constant 5.000000e-01 : f32
    %38 = vector.broadcast %cst_23 : f32 to vector<32x128xf32>
    %39 = arith.mulf %38, %37 : vector<32x128xf32>
    %cst_24 = arith.constant 0.707106769 : f32
    %40 = vector.broadcast %cst_24 : f32 to vector<32x128xf32>
    %41 = arith.mulf %37, %40 : vector<32x128xf32>
    %42 = math.erf %41 : vector<32x128xf32>
    %cst_25 = arith.constant 1.000000e+00 : f32
    %43 = vector.broadcast %cst_25 : f32 to vector<32x128xf32>
    %44 = arith.addf %43, %42 : vector<32x128xf32>
    %45 = arith.mulf %39, %44 : vector<32x128xf32>
    %46 = arith.extf %4 : vector<32x128xbf16> to vector<32x128xf32>
    %47 = arith.addf %45, %46 : vector<32x128xf32>
    %cst_26 = arith.constant 5.000000e-01 : f32
    %48 = vector.broadcast %cst_26 : f32 to vector<32x128xf32>
    %49 = arith.mulf %48, %47 : vector<32x128xf32>
    %cst_27 = arith.constant 0.707106769 : f32
    %50 = vector.broadcast %cst_27 : f32 to vector<32x128xf32>
    %51 = arith.mulf %47, %50 : vector<32x128xf32>
    %52 = math.erf %51 : vector<32x128xf32>
    %cst_28 = arith.constant 1.000000e+00 : f32
    %53 = vector.broadcast %cst_28 : f32 to vector<32x128xf32>
    %54 = arith.addf %53, %52 : vector<32x128xf32>
    %55 = arith.mulf %49, %54 : vector<32x128xf32>
    %c0_29 = arith.constant 0 : index
    %c0_30 = arith.constant 0 : index
    %c0_31 = arith.constant 0 : index
    %56 = vector.load %arg7[%c0_29, %c0_30, %c0_31] : memref<1x32x128xf32, #tpu.memory_space<vmem>>, vector<1x32x128xf32>
    %57 = vector.shape_cast %56 : vector<1x32x128xf32> to vector<32x128xf32>
    %58 = vector.shape_cast %55 : vector<32x128xf32> to vector<1x32x128xf32>
    tpu.vector_store %arg7[%c0_29, %c0_30, %c0_31], %58 {strides = array<i32>} : memref<1x32x128xf32, #tpu.memory_space<vmem>>, vector<1x32x128xf32>,
    return
  }
  func.func @transform_0(%arg0: i32, %arg1: i32) -> (i32, i32, i32) {
    %c0_i32 = arith.constant 0 : i32
    %c0_i32_0 = arith.constant 0 : i32
    return %arg0, %arg1, %c0_i32 : i32, i32, i32
  }
  func.func @transform_1(%arg0: i32, %arg1: i32) -> (i32, i32) {
    %c0_i32 = arith.constant 0 : i32
    %c0_i32_0 = arith.constant 0 : i32
    %c0_i32_1 = arith.constant 0 : i32
    return %c0_i32, %c0_i32_0 : i32, i32
  }
  func.func @transform_2(%arg0: i32, %arg1: i32) -> (i32, i32) {
    %c0_i32 = arith.constant 0 : i32
    %c0_i32_0 = arith.constant 0 : i32
    %c0_i32_1 = arith.constant 0 : i32
    return %c0_i32, %c0_i32_0 : i32, i32
  }
  func.func @transform_3(%arg0: i32, %arg1: i32) -> (i32, i32) {
    %c0_i32 = arith.constant 0 : i32
    %c0_i32_0 = arith.constant 0 : i32
    %c0_i32_1 = arith.constant 0 : i32
    return %c0_i32, %c0_i32_0 : i32, i32
  }
  func.func @transform_4(%arg0: i32, %arg1: i32) -> (i32, i32) {
    %c0_i32 = arith.constant 0 : i32
    %c0_i32_0 = arith.constant 0 : i32
    %c0_i32_1 = arith.constant 0 : i32
    return %c0_i32, %c0_i32_0 : i32, i32
  }
  func.func @transform_5(%arg0: i32, %arg1: i32) -> (i32, i32, i32) {
    %c0_i32 = arith.constant 0 : i32
    %c0_i32_0 = arith.constant 0 : i32
    return %arg0, %arg1, %c0_i32 : i32, i32, i32
  }
}

</mosaic_0001>

<bundles_post_ra>
// kernel: temporal_conv_net_forward.6
= control target key start
LH: loop header
LB: loop body
LE: loop exit
PB: predicated region body
PF: predicated region fallthrough
CT: control target
= control target key end

     0   :  { %s1777_s18 = smov 0   ;;  %s1779_s19 = smov 0   ;;  %s2126_s0 = inlined_call_operand.vmem [shape: bf16[2,96,128], index: 0, kind: input, shape index: {}]   ;;  %s2127_s1 = inlined_call_operand.vmem [shape: bf16[384,128], index: 1, kind: input, shape index: {}]   ;;  %s2128_s2 = inlined_call_operand.vmem [shape: f32[1,128], index: 2, kind: input, shape index: {}]   ;;  %s2129_s3 = inlined_call_operand.vmem [shape: bf16[384,128], index: 3, kind: input, shape index: {}]   ;;  %s2130_s4 = inlined_call_operand.vmem [shape: f32[1,128], index: 4, kind: input, shape index: {}]   ;;  %s2131_s5 = inlined_call_operand.vmem [shape: bf16[2,96,128], index: 5, kind: output, shape index: {}]  }
   0x1   :  { %s1781_s20 = smov 0   ;;  %s1783_s21 = smov 0  }
   0x2   :  { %s1785_s22 = smov 0  }
   0x3 LB: > { %s24_s23 = sadd.s32 1, %s1734_s20  ;;  %s27_s24 = sadd.s32 1, %s1738_s21  ;;  %s1742_s22 = sphi %s1785_s22, %s15_s22   ;;  %s1738_s21 = sphi %s1783_s21, %s2135_s21   ;;  %s1734_s20 = sphi %s1781_s20, %s2134_s20   ;;  %s1730_s19 = sphi %s1779_s19, %s2133_s19   ;;  %s1726_s18 = sphi %s1777_s18, %s2132_s18  }
   0x4   : > { %p25_p0 = scmp.ge.s32.totalorder %s24_s23, 3  ;;  %p1271_p1 = scmp.ge.s32.totalorder %s1742_s22, 1 }
   0x5   : > { %p208_p2 = scmp.lt.s32.totalorder %s1742_s22, 7 }
   0x6   : > { %s2137_s23 = smov (%p25_p0, %s24_s23), 0  ;;  %s2139_s24 = smov (!%p25_p0, %s27_s24), %s1738_s21 }
   0x7   : > { %p209_p3 = pnand %p1271_p1, %p208_p2  ;;  %p29_p4 = scmp.ge.s32.totalorder %s2139_s24, 2 }
   0x8   : > { %s1272_s25 = sshll.u32 (!%p209_p3), %s1726_s18, 2  ;;  %p245_p5 = scmp.lt.s32.totalorder (!%p209_p3), %s1730_s19, 1 }
   0x9   : > { %s2141_s24 = smov (%p29_p4, %s2139_s24), 0  ;;  %212 = sbr.rel (%p209_p3) target bundleno = 624 (0x270), region = 40 }
   0xa   : > { %p247_p6 = scmp.lt.s32.totalorder (!%p209_p3), %s1272_s25, 11  ;;  %p1276_p7 = scmp.ne.s32.totalorder (!%p209_p3), %s1726_s18, 0 }
  0x10   : > { %s2143_s19 = smov (!%p245_p5, %s1730_s19), 1  ;;  %s2145_s25 = smov (!%p247_p6, %s1272_s25), 11 }
  0x11   : > { %s1584_s26 = smul.u32 12, %s2143_s19  ;;  %v1744_v0 = vmov (!%p1276_p7), 0  }
  0x12   : > { %268 = sbr.rel (%p1276_p7) target bundleno = 25 (0x19), region = 44  ;;  %269 = vst [vmem:[#allocation2] sm:$0xff] (!%p1276_p7), %v1744_v0  ;;  %270 = vst [vmem:[#allocation3] sm:$0xff] (!%p1276_p7), %v1744_v0 }
  0x13   : > { %s250_s27 = sadd.s32 %s1584_s26, %s2145_s25 }
  0x14   : > { %s1273_s28 = sshll.u32 %s250_s27, 2 }
  0x15   : > { %s1810_s6 = scalar_lea.vmem %s2126_s0, %s1273_s28  ;;  %s1815_s9 = scalar_lea.vmem %s2131_s5, %s1273_s28 }
  0x19 PF: > { %v1628_v1 = vld [vmem:[%s2127_s1] sm:$0xff]   ;;  %v1745_v2 = vmov 0.0   ;;  %v1630_v4 = vld [vmem:[%s2127_s1 + $0x8] sm:$0xff]   ;;  %vm1746_vm0 = vmmov 0   ;;  %v1632_v6 = vld [vmem:[%s2127_s1 + $0x10] sm:$0xff]   ;;  %v414_v55 = vlaneseq }
  0x1a   : > { %1416 = vmatprep.subr.bf16.mxu0 %v1745_v2  ;;  %1444 = vmatprep.subr.bf16.mxu1 %v1745_v2  ;;  %v1629_v3 = vld [vmem:[%s2127_s1 + $0x40] sm:$0xff]   ;;  %v1631_v5 = vld [vmem:[%s2127_s1 + $0x48] sm:$0xff]   ;;  %v1633_v7 = vld [vmem:[%s2127_s1 + $0x50] sm:$0xff]  }
  0x1b   : > { %1417 = vmatpush3.bf16.msra.mxu0 %v1628_v1  ;;  %1432 = vmatprep.mubr.msk.bf16.mxu0 %vm1746_vm0, %v1745_v2  ;;  %v1634_v8 = vld [vmem:[%s2127_s1 + $0x18] sm:$0xff]   ;;  %v1636_v10 = vld [vmem:[%s2127_s1 + $0x20] sm:$0xff]   ;;  %v1862_v12 = vld [vmem:[%s1810_s6 + $0x8] sm:$0xff]   ;;  %v2052_v63 = vshrl.u32 %v414_v55, 7 }
  0x1c   : > { %1445 = vmatpush3.bf16.msra.mxu1 %v1629_v3  ;;  %1418 = vmatprep.subr.bf16.mxu0 %v1745_v2  ;;  %v1635_v9 = vld [vmem:[%s2127_s1 + $0x58] sm:$0xff]   ;;  %v1637_v11 = vld [vmem:[%s2127_s1 + $0x60] sm:$0xff]   ;;  %v1638_v13 = vld [vmem:[%s2127_s1 + $0x28] sm:$0xff]  }
  0x1d   : > { %1446 = vmatprep.subr.bf16.mxu1 %v1745_v2  ;;  %1460 = vmatprep.mubr.msk.bf16.mxu1 %vm1746_vm0, %v1745_v2  ;;  %v275_v14 = vld [vmem:[#allocation2] sm:$0xff]  ;;  %v1639_v15 = vld [vmem:[%s2127_s1 + $0x68] sm:$0xff]   ;;  %v1640_v16 = vld [vmem:[%s2127_s1 + $0x30] sm:$0xff]   ;;  %vm416_vm1 = vcmp.lt.s32.totalorder %v2052_v63, 4  ;;  %vm546_vm2 = vcmp.lt.s32.totalorder %v2052_v63, 2 }
  0x1e   : > { %288 = vst [vmem:[#allocation2] sm:$0xff] %v1862_v12  ;;  %v1641_v17 = vld [vmem:[%s2127_s1 + $0x70] sm:$0xff]   ;;  %v1642_v18 = vld [vmem:[%s2127_s1 + $0x38] sm:$0xff]   ;;  %v1645_v20 = vld [vmem:[%s2127_s1 + $0x80] sm:$0xff]  }
  0x1f   : > { %1419 = vmatpush3.bf16.msra.mxu0 %v1630_v4  ;;  %v1643_v19 = vld [vmem:[%s2127_s1 + $0x78] sm:$0xff]   ;;  %v1646_v21 = vld [vmem:[%s2127_s1 + $0x88] sm:$0xff]   ;;  %v1897_v22 = vld [vmem:[%s1810_s6] sm:$0xff]  }
  0x20   : > { %1447 = vmatpush3.bf16.msra.mxu1 %v1631_v5  ;;  %1420 = vmatprep.subr.bf16.mxu0 %v1745_v2  ;;  %v1648_v23 = vld [vmem:[%s2127_s1 + $0x90] sm:$0xff]   ;;  %v1649_v24 = vld [vmem:[%s2127_s1 + $0x98] sm:$0xff]   ;;  %v1650_v25 = vld [vmem:[%s2127_s1 + $0xa0] sm:$0xff]  }
  0x21   : > { %1448 = vmatprep.subr.bf16.mxu1 %v1745_v2  ;;  %v1651_v26 = vld [vmem:[%s2127_s1 + $0xa8] sm:$0xff]   ;;  %v1652_v27 = vld [vmem:[%s2127_s1 + $0xb0] sm:$0xff]   ;;  %v1653_v28 = vld [vmem:[%s2127_s1 + $0xb8] sm:$0xff]  }
  0x22   : > { %v1654_v29 = vld [vmem:[%s2129_s3] sm:$0xff]   ;;  %v1655_v30 = vld [vmem:[%s2129_s3 + $0x8] sm:$0xff]   ;;  %v1656_v32 = vld [vmem:[%s2129_s3 + $0x10] sm:$0xff]  }
  0x23   : > { %1421 = vmatpush3.bf16.msra.mxu0 %v1632_v6  ;;  %v1657_v31 = vld [vmem:[%s2129_s3 + $0x40] sm:$0xff]   ;;  %v1659_v33 = vld [vmem:[%s2129_s3 + $0x48] sm:$0xff]   ;;  %v1658_v34 = vld [vmem:[%s2129_s3 + $0x18] sm:$0xff]  }
  0x24   : > { %1449 = vmatpush3.bf16.msra.mxu1 %v1633_v7  ;;  %1422 = vmatprep.subr.bf16.mxu0 %v1745_v2  ;;  %v1660_v35 = vld [vmem:[%s2129_s3 + $0x20] sm:$0xff]   ;;  %v1661_v36 = vld [vmem:[%s2129_s3 + $0x50] sm:$0xff]   ;;  %v1662_v37 = vld [vmem:[%s2129_s3 + $0x28] sm:$0xff]  }
  0x25   : > { %1450 = vmatprep.subr.bf16.mxu1 %v1745_v2  ;;  %v1663_v38 = vld [vmem:[%s2129_s3 + $0x58] sm:$0xff]   ;;  %v1664_v39 = vld [vmem:[%s2129_s3 + $0x30] sm:$0xff]   ;;  %v1665_v40 = vld [vmem:[%s2129_s3 + $0x60] sm:$0xff]  }
  0x26   : > { %v1666_v41 = vld [vmem:[%s2129_s3 + $0x38] sm:$0xff]   ;;  %v1667_v42 = vld [vmem:[%s2129_s3 + $0x68] sm:$0xff]   ;;  %v1668_v44 = vld [vmem:[%s2129_s3 + $0x70] sm:$0xff]  }
  0x27   : > { %1423 = vmatpush3.bf16.msra.mxu0 %v1634_v8  ;;  %v2005_v43 = vld [vmem:[#allocation3] sm:$0xff]  ;;  %v1669_v45 = vld [vmem:[%s2129_s3 + $0x80] sm:$0xff]   ;;  %v1670_v46 = vld [vmem:[%s2129_s3 + $0x78] sm:$0xff]  }
  0x28   : > { %1451 = vmatpush3.bf16.msra.mxu1 %v1635_v9  ;;  %1424 = vmatprep.subr.bf16.mxu0 %v1745_v2  ;;  %v1671_v47 = vld [vmem:[%s2129_s3 + $0x88] sm:$0xff]   ;;  %v1672_v48 = vld [vmem:[%s2129_s3 + $0x90] sm:$0xff]   ;;  %v1673_v49 = vld [vmem:[%s2129_s3 + $0x98] sm:$0xff]  }
  0x29   : > { %1452 = vmatprep.subr.bf16.mxu1 %v1745_v2  ;;  %v1674_v50 = vld [vmem:[%s2129_s3 + $0xa0] sm:$0xff]   ;;  %v1675_v51 = vld [vmem:[%s2129_s3 + $0xa8] sm:$0xff]   ;;  %v1676_v52 = vld [vmem:[%s2129_s3 + $0xb0] sm:$0xff]  }
  0x2a   : > { %v1677_v53 = vld [vmem:[%s2129_s3 + $0xb8] sm:$0xff]  }
  0x2b   : > { %1425 = vmatpush3.bf16.msra.mxu0 %v1636_v10 }
  0x2c   : > { %1453 = vmatpush3.bf16.msra.mxu1 %v1637_v11  ;;  %1426 = vmatprep.subr.bf16.mxu0 %v1745_v2 }
  0x2d   : > { %1454 = vmatprep.subr.bf16.mxu1 %v1745_v2 }
  0x2f   : > { %1427 = vmatpush3.bf16.msra.mxu0 %v1638_v13 }
  0x30   : > { %1455 = vmatpush3.bf16.msra.mxu1 %v1639_v15  ;;  %1428 = vmatprep.subr.bf16.mxu0 %v1745_v2 }
  0x31   : > { %1456 = vmatprep.subr.bf16.mxu1 %v1745_v2 }
  0x33   : > { %1429 = vmatpush3.bf16.msra.mxu0 %v1640_v16 }
  0x34   : > { %1457 = vmatpush3.bf16.msra.mxu1 %v1641_v17  ;;  %1430 = vmatprep.subr.bf16.mxu0 %v1745_v2 }
  0x35   : > { %1458 = vmatprep.subr.bf16.mxu1 %v1745_v2 }
  0x37   : > { %1431 = vmatpush3.bf16.msra.mxu0 %v1642_v18 }
  0x38   : > { %1459 = vmatpush3.bf16.msra.mxu1 %v1643_v19  ;;  %1472 = vmatprep.subr.bf16.mxu0 %v1745_v2 }
  0x39   : > { %1500 = vmatprep.subr.bf16.mxu1 %v1745_v2 }
  0x3a   : > { %1433 = vmatmul.mubr.bf16.vlgmr.msra.gmra.mrb[0].mxu0 %v275_v14 }
  0x3b   : > { %1461 = vmatmul.mubr.bf16.vlgmr.msra.gmra.mrb[0].mxu1 %v275_v14  ;;  %1473 = vmatpush3.bf16.msra.mxu0 %v1645_v20 }
  0x3c   : > { %1474 = vmatprep.subr.bf16.mxu0 %v1745_v2  ;;  %1436 = vmatprep.mubr.msk.bf16.mxu0 %vm1746_vm0, %v1745_v2 }
  0x3d   : > { %1464 = vmatprep.mubr.msk.bf16.mxu1 %vm1746_vm0, %v1745_v2  ;;  %1501 = vmatpush3.bf16.msra.mxu1 %v1654_v29 }
  0x3e   : > { %1502 = vmatprep.subr.bf16.mxu1 %v1745_v2 }
  0x3f   : > { %1475 = vmatpush3.bf16.msra.mxu0 %v1646_v21 }
  0x40   : > { %1476 = vmatprep.subr.bf16.mxu0 %v1745_v2 }
  0x41   : > { %1503 = vmatpush3.bf16.msra.mxu1 %v1655_v30 }
  0x42   : > { %1437 = vmatmul.mubr.bf16.gmra.mrb[4].mxu0 %v1897_v22  ;;  %1504 = vmatprep.subr.bf16.mxu1 %v1745_v2 }
  0x43   : > { %1465 = vmatmul.mubr.bf16.gmra.mrb[4].mxu1 %v1897_v22  ;;  %1477 = vmatpush3.bf16.msra.mxu0 %v1648_v23 }
  0x44   : > { %1478 = vmatprep.subr.bf16.mxu0 %v1745_v2  ;;  %1440 = vmatprep.mubr.msk.bf16.mxu0 %vm1746_vm0, %v1745_v2 }
  0x45   : > { %1468 = vmatprep.mubr.msk.bf16.mxu1 %vm1746_vm0, %v1745_v2  ;;  %1505 = vmatpush3.bf16.msra.mxu1 %v1656_v32 }
  0x46   : > { %1506 = vmatprep.subr.bf16.mxu1 %v1745_v2 }
  0x47   : > { %1479 = vmatpush3.bf16.msra.mxu0 %v1649_v24 }
  0x48   : > { %1480 = vmatprep.subr.bf16.mxu0 %v1745_v2 }
  0x49   : > { %1507 = vmatpush3.bf16.msra.mxu1 %v1658_v34 }
  0x4a   : > { %1441 = vmatmul.mubr.bf16.gmra.mrb[8].mxu0 %v1862_v12  ;;  %1508 = vmatprep.subr.bf16.mxu1 %v1745_v2 }
  0x4b   : > { %1469 = vmatmul.mubr.bf16.gmra.mrb[8].mxu1 %v1862_v12  ;;  %1481 = vmatpush3.bf16.msra.mxu0 %v1650_v25 }
  0x4c   : > { %1482 = vmatprep.subr.bf16.mxu0 %v1745_v2  ;;  %1488 = vmatprep.mubr.msk.bf16.mxu0 %vm1746_vm0, %v1745_v2 }
  0x4d   : > { %1516 = vmatprep.mubr.msk.bf16.mxu1 %vm1746_vm0, %v1745_v2  ;;  %1509 = vmatpush3.bf16.msra.mxu1 %v1660_v35 }
  0x4e   : > { %1510 = vmatprep.subr.bf16.mxu1 %v1745_v2 }
  0x4f   : > { %1483 = vmatpush3.bf16.msra.mxu0 %v1651_v26 }
  0x50   : > { %1484 = vmatprep.subr.bf16.mxu0 %v1745_v2 }
  0x51   : > { %1511 = vmatpush3.bf16.msra.mxu1 %v1662_v37 }
  0x52   : > { %1512 = vmatprep.subr.bf16.mxu1 %v1745_v2 }
  0x53   : > { %1485 = vmatpush3.bf16.msra.mxu0 %v1652_v27 }
  0x54   : > { %1486 = vmatprep.subr.bf16.mxu0 %v1745_v2 }
  0x55   : > { %1513 = vmatpush3.bf16.msra.mxu1 %v1664_v39 }
  0x56   : > { %1514 = vmatprep.subr.bf16.mxu1 %v1745_v2 }
  0x57   : > { %1487 = vmatpush3.bf16.msra.mxu0 %v1653_v28 }
  0x58   : > { %1528 = vmatprep.subr.bf16.mxu0 %v1745_v2 }
  0x59   : > { %1515 = vmatpush3.bf16.msra.mxu1 %v1666_v41 }
  0x5a   : > { %1489 = vmatmul.mubr.bf16.vlgmr.msra.gmra.mrb[12].mxu0 %v275_v14  ;;  %1556 = vmatprep.subr.bf16.mxu1 %v1745_v2 }
  0x5b   : > { %1492 = vmatprep.mubr.msk.bf16.mxu0 %vm1746_vm0, %v1745_v2  ;;  %1529 = vmatpush3.bf16.msra.mxu0 %v1657_v31 }
  0x5c   : > { %1530 = vmatprep.subr.bf16.mxu0 %v1745_v2  ;;  %1517 = vmatmul.mubr.bf16.vlgmr.msra.gmra.mrb[12].mxu1 %v2005_v43 }
  0x5d   : > { %1520 = vmatprep.mubr.msk.bf16.mxu1 %vm1746_vm0, %v1745_v2  ;;  %1557 = vmatpush3.bf16.msra.mxu1 %v1669_v45 }
  0x5e   : > { %1558 = vmatprep.subr.bf16.mxu1 %v1745_v2 }
  0x5f   : > { %1531 = vmatpush3.bf16.msra.mxu0 %v1659_v33 }
  0x60   : > { %1532 = vmatprep.subr.bf16.mxu0 %v1745_v2 }
  0x61   : > { %1559 = vmatpush3.bf16.msra.mxu1 %v1671_v47  ;;  %v1303_v47 = vld [vmem:[%s2128_s2] ss:$0 sm:$0xff] }
  0x62   : > { %1493 = vmatmul.mubr.bf16.gmra.mrb[16].mxu0 %v1897_v22  ;;  %1560 = vmatprep.subr.bf16.mxu1 %v1745_v2 }
  0x63   : > { %1496 = vmatprep.mubr.msk.bf16.mxu0 %vm1746_vm0, %v1745_v2  ;;  %1533 = vmatpush3.bf16.msra.mxu0 %v1661_v36 }
  0x64   : > { %1534 = vmatprep.subr.bf16.mxu0 %v1745_v2 }
  0x65   : > { %1561 = vmatpush3.bf16.msra.mxu1 %v1672_v48 }
  0x66   : > { %1562 = vmatprep.subr.bf16.mxu1 %v1745_v2 }
  0x67   : > { %1535 = vmatpush3.bf16.msra.mxu0 %v1663_v38 }
  0x68   : > { %1536 = vmatprep.subr.bf16.mxu0 %v1745_v2 }
  0x69   : > { %1563 = vmatpush3.bf16.msra.mxu1 %v1673_v49 }
  0x6a   : > { %1497 = vmatmul.mubr.bf16.gmra.mrb[20].mxu0 %v1862_v12  ;;  %1564 = vmatprep.subr.bf16.mxu1 %v1745_v2 }
  0x6b   : > { %1544 = vmatprep.mubr.msk.bf16.mxu0 %vm1746_vm0, %v1745_v2  ;;  %1537 = vmatpush3.bf16.msra.mxu0 %v1665_v40 }
  0x6c   : > { %1538 = vmatprep.subr.bf16.mxu0 %v1745_v2 }
  0x6d   : > { %1565 = vmatpush3.bf16.msra.mxu1 %v1674_v50 }
  0x6e   : > { %1566 = vmatprep.subr.bf16.mxu1 %v1745_v2 }
  0x6f   : > { %1539 = vmatpush3.bf16.msra.mxu0 %v1667_v42 }
  0x70   : > { %1540 = vmatprep.subr.bf16.mxu0 %v1745_v2 }
  0x71   : > { %1567 = vmatpush3.bf16.msra.mxu1 %v1675_v51 }
  0x72   : > { %1568 = vmatprep.subr.bf16.mxu1 %v1745_v2 }
  0x73   : > { %1541 = vmatpush3.bf16.msra.mxu0 %v1668_v44 }
  0x74   : > { %1542 = vmatprep.subr.bf16.mxu0 %v1745_v2 }
  0x75   : > { %1569 = vmatpush3.bf16.msra.mxu1 %v1676_v52 }
  0x76   : > { %1570 = vmatprep.subr.bf16.mxu1 %v1745_v2 }
  0x77   : > { %1543 = vmatpush3.bf16.msra.mxu0 %v1670_v46 }
  0x79   : > { %1571 = vmatpush3.bf16.msra.mxu1 %v1677_v53 }
  0x7a   : > { %1545 = vmatmul.mubr.bf16.vlgmr.msra.gmra.mrb[24].mxu0 %v2005_v43 }
  0x7b   : > { %1548 = vmatprep.mubr.msk.bf16.mxu0 %vm1746_vm0, %v1745_v2 }
 0x10d   : > { %v387_v54 = vpop.f32.mrb[0].mxu0 }
 0x10e   : > { %v1434_v56 = vpop.f32.mrb[1].mxu0  ;;  %v519_v57 = vpop.f32.mrb[0].mxu1 }
 0x10f   : > { %v389_v58 = vpop.f32.mrb[2].mxu0  ;;  %v1462_v59 = vpop.f32.mrb[1].mxu1 }
 0x110   : > { %v1435_v60 = vpop.f32.mrb[3].mxu0  ;;  %v521_v61 = vpop.f32.mrb[2].mxu1  ;;  %v409_v3 = vrot.slane %v389_v58, 4 }
 0x111   : > { %v1463_v62 = vpop.f32.mrb[3].mxu1  ;;  %v541_v0 = vrot.slane %v521_v61, 6 }
 0x115   : > { %v394_v1 = vpop.f32.mrb[4].mxu0 }
 0x116   : > { %v410_v4 = vrot.slane %v394_v1, 4  ;;  %v526_v5 = vpop.f32.mrb[4].mxu1  ;;  %v1438_v6 = vpop.f32.mrb[5].mxu0 }
 0x117   : > { %v542_v7 = vrot.slane %v526_v5, 6  ;;  %v1466_v8 = vpop.f32.mrb[5].mxu1  ;;  %v397_v9 = vpop.f32.mrb[6].mxu0 }
 0x118   : > { %v411_v10 = vrot.slane %v397_v9, 4  ;;  %v529_v11 = vpop.f32.mrb[6].mxu1  ;;  %v1439_v13 = vpop.f32.mrb[7].mxu0  ;;  %v420_v14 = vsel %vm416_vm1, %v409_v3, %v410_v4 }
 0x119   : > { %v543_v15 = vrot.slane %v529_v11, 6  ;;  %v1467_v16 = vpop.f32.mrb[7].mxu1  ;;  %v550_v17 = vsel %vm546_vm2, %v541_v0, %v542_v7 }
 0x11a   : > { %v551_v18 = vadd.f32 %v550_v17, %v420_v14  ;;  %v419_v19 = vsel %vm416_vm1, %v410_v4, %v411_v10 }
 0x11b   : > { %v549_v20 = vsel %vm546_vm2, %v542_v7, %v543_v15 }
 0x11c   : > { %v552_v21 = vadd.f32 %v549_v20, %v419_v19 }
 0x11d   : > { %v402_v23 = vpop.f32.mrb[8].mxu0 }
 0x11e   : > { %v412_v24 = vrot.slane %v402_v23, 4  ;;  %v534_v25 = vpop.f32.mrb[8].mxu1  ;;  %v1442_v26 = vpop.f32.mrb[9].mxu0 }
 0x11f   : > { %v544_v27 = vrot.slane %v534_v25, 6  ;;  %v405_v28 = vpop.f32.mrb[10].mxu0  ;;  %v1470_v29 = vpop.f32.mrb[9].mxu1 }
 0x120   : > { %v413_v30 = vrot.slane %v405_v28, 4  ;;  %v1443_v31 = vpop.f32.mrb[11].mxu0  ;;  %v537_v32 = vpop.f32.mrb[10].mxu1  ;;  %v418_v33 = vsel %vm416_vm1, %v411_v10, %v412_v24 }
 0x121   : > { %v545_v34 = vrot.slane %v537_v32, 6  ;;  %v1471_v35 = vpop.f32.mrb[11].mxu1  ;;  %v548_v36 = vsel %vm546_vm2, %v543_v15, %v544_v27 }
 0x122   : > { %v553_v37 = vadd.f32 %v548_v36, %v418_v33  ;;  %v417_v38 = vsel %vm416_vm1, %v412_v24, %v413_v30 }
 0x123   : > { %v547_v39 = vsel %vm546_vm2, %v544_v27, %v545_v34 }
 0x124   : > { %v554_v40 = vadd.f32 %v547_v39, %v417_v38 }
 0x12d   : > { %v653_v41 = vpop.f32.mrb[12].mxu0 }
 0x12e   : > { %v1490_v42 = vpop.f32.mrb[13].mxu0 }
 0x12f   : > { %v655_v44 = vpop.f32.mrb[14].mxu0  ;;  %v811_v25 = vpop.f32.mrb[12].mxu1 }
 0x130   : > { %v1491_v45 = vpop.f32.mrb[15].mxu0  ;;  %v1518_v26 = vpop.f32.mrb[13].mxu1 }
 0x131   : > { %v813_v27 = vpop.f32.mrb[14].mxu1 }
 0x132   : > { %v1519_v28 = vpop.f32.mrb[15].mxu1 }
 0x135   : > { %v659_v46 = vpop.f32.mrb[16].mxu0 }
 0x136   : > { %v674_v48 = vadd.f32 %v659_v46, %v551_v18  ;;  %v1494_v49 = vpop.f32.mrb[17].mxu0 }
 0x137   : > { %v662_v50 = vpop.f32.mrb[18].mxu0 }
 0x138   : > { %v685_v51 = vadd.f32 %v1303_v47, %v674_v48  ;;  %v675_v52 = vadd.f32 %v662_v50, %v552_v21  ;;  %v1495_v53 = vpop.f32.mrb[19].mxu0 }
 0x13a   : > { %v693_v54 = vmul.f32 0.70710677, %v685_v51  ;;  %v686_v55 = vadd.f32 %v1303_v47, %v675_v52  ;;  %v689_v8 = vmul.f32 0.5, %v685_v51 }
 0x13c   : > { %1680 = verf.f32 %v693_v54  ;;  %v694_v56 = vmul.f32 0.70710677, %v686_v55  ;;  %v690_v9 = vmul.f32 0.5, %v686_v55 }
 0x13d   : > { %v667_v57 = vpop.f32.mrb[20].mxu0 }
 0x13e   : > { %1682 = verf.f32 %v694_v56  ;;  %v676_v58 = vadd.f32 %v667_v57, %v553_v37  ;;  %v1498_v59 = vpop.f32.mrb[21].mxu0 }
 0x13f   : > { %v670_v60 = vpop.f32.mrb[22].mxu0 }
 0x140   : > { %v687_v61 = vadd.f32 %v1303_v47, %v676_v58  ;;  %v677_v62 = vadd.f32 %v670_v60, %v554_v40  ;;  %v1499_v0 = vpop.f32.mrb[23].mxu0 }
 0x142   : > { %v695_v1 = vmul.f32 0.70710677, %v687_v61  ;;  %v688_v3 = vadd.f32 %v1303_v47, %v677_v62  ;;  %v691_v18 = vmul.f32 0.5, %v687_v61 }
 0x144   : > { %1684 = verf.f32 %v695_v1  ;;  %v696_v4 = vmul.f32 0.70710677, %v688_v3  ;;  %v692_v19 = vmul.f32 0.5, %v688_v3 }
 0x146   : > { %v1681_v5 = vpop.eup %1680  ;;  %1686 = verf.f32 %v696_v4 }
 0x147   : > { %v701_v6 = vadd.f32 1.0, %v1681_v5 }
 0x148   : > { %v1683_v7 = vpop.eup %1682 }
 0x149   : > { %v702_v10 = vadd.f32 1.0, %v1683_v7  ;;  %v705_v11 = vmul.f32 %v701_v6, %v689_v8 }
 0x14b   : > { %v706_v13 = vmul.f32 %v702_v10, %v690_v9 }
 0x14d   : > { %v709_v14 = vpack.c.bf16 %v706_v13, %v705_v11  ;;  %v940_v29 = vpop.f32.mrb[24].mxu0 }
 0x14e   : > { %v1685_v15 = vpop.eup %1684  ;;  %v1546_v30 = vpop.f32.mrb[25].mxu0 }
 0x14f   : > { %v703_v16 = vadd.f32 1.0, %v1685_v15  ;;  %1521 = vmatmul.mubr.bf16.gmra.mrb[16].mxu1 %v709_v14  ;;  %1549 = vmatmul.mubr.bf16.gmra.mrb[28].mxu0 %v709_v14  ;;  %v942_v31 = vpop.f32.mrb[26].mxu0 }
 0x150   : > { %v1687_v17 = vpop.eup %1686  ;;  %1524 = vmatprep.mubr.msk.bf16.mxu1 %vm1746_vm0, %v1745_v2  ;;  %1552 = vmatprep.mubr.msk.bf16.mxu0 %vm1746_vm0, %v1745_v2  ;;  %v1547_v32 = vpop.f32.mrb[27].mxu0  ;;  %v962_v33 = vrot.slane %v942_v31, 6 }
 0x151   : > { %v704_v20 = vadd.f32 1.0, %v1687_v17  ;;  %v707_v21 = vmul.f32 %v703_v16, %v691_v18 }
 0x153   : > { %v708_v23 = vmul.f32 %v704_v20, %v692_v19 }
 0x155   : > { %v710_v24 = vpack.c.bf16 %v708_v23, %v707_v21 }
 0x157   : > { %712 = vst [vmem:[#allocation3] sm:$0xff] %v710_v24  ;;  %1525 = vmatmul.mubr.bf16.gmra.mrb[20].mxu1 %v710_v24  ;;  %1553 = vmatmul.mubr.bf16.gmra.mrb[32].mxu0 %v710_v24 }
 0x158   : > { %1572 = vmatprep.mubr.msk.bf16.mxu1 %vm1746_vm0, %v1745_v2 }
 0x15f   : > { %1573 = vmatmul.mubr.bf16.vlgmr.msra.gmra.mrb[24].mxu1 %v2005_v43  ;;  %v833_v43 = vrot.slane %v813_v27, 4 }
 0x160   : > { %1576 = vmatprep.mubr.msk.bf16.mxu1 %vm1746_vm0, %v1745_v2 }
 0x167   : > { %1577 = vmatmul.mubr.bf16.gmra.mrb[28].mxu1 %v709_v14  ;;  %v1328_v14 = vld [vmem:[%s2130_s4] ss:$0 sm:$0xff] }
 0x168   : > { %1580 = vmatprep.mubr.msk.bf16.mxu1 %vm1746_vm0, %v1745_v2 }
 0x16f   : > { %1581 = vmatmul.mubr.bf16.gmra.mrb[32].mxu1 %v710_v24 }
 0x222   : > { %v818_v34 = vpop.f32.mrb[16].mxu1  ;;  %v947_v35 = vpop.f32.mrb[28].mxu0 }
 0x223   : > { %v834_v36 = vrot.slane %v818_v34, 4  ;;  %v963_v37 = vrot.slane %v947_v35, 6  ;;  %v1522_v38 = vpop.f32.mrb[17].mxu1  ;;  %v1550_v39 = vpop.f32.mrb[29].mxu0  ;;  %v1129_v35 = vunpack.c.l.bf16 %v1897_v22 }
 0x224   : > { %v821_v40 = vpop.f32.mrb[18].mxu1  ;;  %v950_v41 = vpop.f32.mrb[30].mxu0  ;;  %v1130_v38 = vunpack.c.h.bf16 %v1897_v22 }
 0x225   : > { %v835_v2 = vrot.slane %v821_v40, 4  ;;  %v964_v42 = vrot.slane %v950_v41, 6  ;;  %v1523_v44 = vpop.f32.mrb[19].mxu1  ;;  %v1551_v45 = vpop.f32.mrb[31].mxu0  ;;  %v841_v46 = vsel %vm416_vm1, %v833_v43, %v834_v36  ;;  %v970_v47 = vsel %vm546_vm2, %v962_v33, %v963_v37 }
 0x226   : > { %v971_v48 = vadd.f32 %v970_v47, %v841_v46  ;;  %v1131_v47 = vunpack.c.l.bf16 %v1862_v12 }
 0x227   : > { %v840_v49 = vsel %vm416_vm1, %v834_v36, %v835_v2  ;;  %v969_v50 = vsel %vm546_vm2, %v963_v37, %v964_v42 }
 0x228   : > { %v972_v51 = vadd.f32 %v969_v50, %v840_v49 }
 0x22a   : > { %v826_v52 = vpop.f32.mrb[20].mxu1  ;;  %v955_v53 = vpop.f32.mrb[32].mxu0 }
 0x22b   : > { %v836_v54 = vrot.slane %v826_v52, 4  ;;  %v965_v55 = vrot.slane %v955_v53, 6  ;;  %v1526_v56 = vpop.f32.mrb[21].mxu1  ;;  %v1554_v57 = vpop.f32.mrb[33].mxu0  ;;  %v1132_v52 = vunpack.c.h.bf16 %v1862_v12 }
 0x22c   : > { %v829_v58 = vpop.f32.mrb[22].mxu1  ;;  %v958_v59 = vpop.f32.mrb[34].mxu0 }
 0x22d   : > { %v837_v60 = vrot.slane %v829_v58, 4  ;;  %v966_v61 = vrot.slane %v958_v59, 6  ;;  %v1527_v62 = vpop.f32.mrb[23].mxu1  ;;  %v1555_v0 = vpop.f32.mrb[35].mxu0  ;;  %v839_v1 = vsel %vm416_vm1, %v835_v2, %v836_v54  ;;  %v968_v3 = vsel %vm546_vm2, %v964_v42, %v965_v55 }
 0x22e   : > { %v973_v4 = vadd.f32 %v968_v3, %v839_v1 }
 0x22f   : > { %v838_v5 = vsel %vm416_vm1, %v836_v54, %v837_v60  ;;  %v967_v6 = vsel %vm546_vm2, %v965_v55, %v966_v61 }
 0x230   : > { %v974_v7 = vadd.f32 %v967_v6, %v838_v5 }
 0x232   : > { %v1073_v8 = vpop.f32.mrb[24].mxu1 }
 0x233   : > { %v1574_v9 = vpop.f32.mrb[25].mxu1 }
 0x234   : > { %v1075_v10 = vpop.f32.mrb[26].mxu1 }
 0x235   : > { %v1575_v11 = vpop.f32.mrb[27].mxu1 }
 0x23a   : > { %v1079_v13 = vpop.f32.mrb[28].mxu1 }
 0x23b   : > { %v1094_v15 = vadd.f32 %v1079_v13, %v971_v48  ;;  %v1578_v16 = vpop.f32.mrb[29].mxu1 }
 0x23c   : > { %v1082_v17 = vpop.f32.mrb[30].mxu1 }
 0x23d   : > { %v1105_v18 = vadd.f32 %v1328_v14, %v1094_v15  ;;  %v1095_v19 = vadd.f32 %v1082_v17, %v972_v51  ;;  %v1579_v20 = vpop.f32.mrb[31].mxu1 }
 0x23f   : > { %v1113_v21 = vmul.f32 0.70710677, %v1105_v18  ;;  %v1106_v23 = vadd.f32 %v1328_v14, %v1095_v19  ;;  %v1109_v43 = vmul.f32 0.5, %v1105_v18 }
 0x241   : > { %1688 = verf.f32 %v1113_v21  ;;  %v1114_v63 = vmul.f32 0.70710677, %v1106_v23  ;;  %v1110_v40 = vmul.f32 0.5, %v1106_v23 }
 0x242   : > { %v1087_v24 = vpop.f32.mrb[32].mxu1 }
 0x243   : > { %1690 = verf.f32 %v1114_v63  ;;  %v1096_v25 = vadd.f32 %v1087_v24, %v973_v4  ;;  %v1582_v26 = vpop.f32.mrb[33].mxu1 }
 0x244   : > { %v1090_v27 = vpop.f32.mrb[34].mxu1 }
 0x245   : > { %v1107_v28 = vadd.f32 %v1328_v14, %v1096_v25  ;;  %v1097_v29 = vadd.f32 %v1090_v27, %v974_v7  ;;  %v1583_v30 = vpop.f32.mrb[35].mxu1 }
 0x247   : > { %v1115_v31 = vmul.f32 0.70710677, %v1107_v28  ;;  %v1108_v32 = vadd.f32 %v1328_v14, %v1097_v29  ;;  %v1111_v49 = vmul.f32 0.5, %v1107_v28 }
 0x249   : > { %1692 = verf.f32 %v1115_v31  ;;  %v1116_v33 = vmul.f32 0.70710677, %v1108_v32  ;;  %v1112_v22 = vmul.f32 0.5, %v1108_v32 }
 0x24b   : > { %v1689_v34 = vpop.eup %1688  ;;  %1694 = verf.f32 %v1116_v33 }
 0x24c   : > { %v1121_v36 = vadd.f32 1.0, %v1689_v34 }
 0x24d   : > { %v1691_v37 = vpop.eup %1690 }
 0x24e   : > { %v1125_v39 = vmul.f32 %v1121_v36, %v1109_v43  ;;  %v1122_v41 = vadd.f32 1.0, %v1691_v37 }
 0x250   : > { %v1133_v2 = vadd.f32 %v1129_v35, %v1125_v39  ;;  %v1126_v42 = vmul.f32 %v1122_v41, %v1110_v40 }
 0x252   : > { %v1141_v44 = vmul.f32 0.70710677, %v1133_v2  ;;  %v1134_v45 = vadd.f32 %v1130_v38, %v1126_v42  ;;  %v1137_v0 = vmul.f32 0.5, %v1133_v2 }
 0x253   : > { %v1693_v46 = vpop.eup %1692 }
 0x254   : > { %1696 = verf.f32 %v1141_v44  ;;  %v1142_v48 = vmul.f32 0.70710677, %v1134_v45  ;;  %v1123_v50 = vadd.f32 1.0, %v1693_v46  ;;  %v1138_v1 = vmul.f32 0.5, %v1134_v45 }
 0x255   : > { %v1695_v51 = vpop.eup %1694 }
 0x256   : > { %1698 = verf.f32 %v1142_v48  ;;  %v1127_v53 = vmul.f32 %v1123_v50, %v1111_v49  ;;  %v1124_v54 = vadd.f32 1.0, %v1695_v51 }
 0x258   : > { %v1135_v55 = vadd.f32 %v1131_v47, %v1127_v53  ;;  %v1128_v56 = vmul.f32 %v1124_v54, %v1112_v22 }
 0x25a   : > { %v1143_v57 = vmul.f32 0.70710677, %v1135_v55  ;;  %v1136_v58 = vadd.f32 %v1132_v52, %v1128_v56  ;;  %v1139_v9 = vmul.f32 0.5, %v1135_v55 }
 0x25c   : > { %1700 = verf.f32 %v1143_v57  ;;  %v1144_v59 = vmul.f32 0.70710677, %v1136_v58  ;;  %v1140_v10 = vmul.f32 0.5, %v1136_v58 }
 0x25e   : > { %v1697_v60 = vpop.eup %1696  ;;  %1702 = verf.f32 %v1144_v59 }
 0x25f   : > { %v1149_v61 = vadd.f32 1.0, %v1697_v60 }
 0x260   : > { %v1699_v62 = vpop.eup %1698 }
 0x261   : > { %v1150_v3 = vadd.f32 1.0, %v1699_v62  ;;  %v1153_v12 = vmul.f32 %v1149_v61, %v1137_v0 }
 0x263   : > { %v1154_v4 = vmul.f32 %v1150_v3, %v1138_v1 }
 0x265   : > { %v1342_v5 = vpack.c.bf16 %v1154_v4, %v1153_v12 }
 0x266   : > { %v1701_v6 = vpop.eup %1700 }
 0x267   : > { %1343 = vst [vmem:[%s1815_s9] sm:$0xff] %v1342_v5   ;;  %v1151_v7 = vadd.f32 1.0, %v1701_v6 }
 0x268   : > { %v1703_v8 = vpop.eup %1702 }
 0x269   : > { %v1152_v11 = vadd.f32 1.0, %v1703_v8  ;;  %v1155_v13 = vmul.f32 %v1151_v7, %v1139_v9 }
 0x26b   : > { %v1156_v14 = vmul.f32 %v1152_v11, %v1140_v10 }
 0x26d   : > { %v1347_v15 = vpack.c.bf16 %v1156_v14, %v1155_v13 }
 0x26f   : > { %1349 = vst [vmem:[%s1815_s9 + $0x8] sm:$0xff] %v1347_v15  }
 0x270 PF: > { %s15_s22 = sadd.s32 1, %s1742_s22   ;;  %s2132_s18 = smov %s1734_s20 }
 0x271   : > { %p12_p8 = scmp.ge.s32.totalorder %s15_s22, 8   ;;  %s2133_s19 = smov %s1738_s21 }
 0x272   : > { %s2134_s20 = smov %s2137_s23  ;;  %s2135_s21 = smov %s2141_s24 }
 0x273   :  { %14 = sbr.rel (!%p12_p8) target bundleno = 3 (0x3), region = 74 }

// kernel: temporal_conv_net_forward.8
= control target key start
LH: loop header
LB: loop body
LE: loop exit
PB: predicated region body
PF: predicated region fallthrough
CT: control target
= control target key end

     0   :  { %s1733_s18 = smov 0   ;;  %s1735_s19 = smov 0   ;;  %s2046_s0 = inlined_call_operand.vmem [shape: bf16[2,96,128], index: 0, kind: input, shape index: {}]   ;;  %s2047_s1 = inlined_call_operand.vmem [shape: bf16[384,128], index: 1, kind: input, shape index: {}]   ;;  %s2048_s2 = inlined_call_operand.vmem [shape: f32[1,128], index: 2, kind: input, shape index: {}]   ;;  %s2049_s3 = inlined_call_operand.vmem [shape: bf16[384,128], index: 3, kind: input, shape index: {}]   ;;  %s2050_s4 = inlined_call_operand.vmem [shape: f32[1,128], index: 4, kind: input, shape index: {}]   ;;  %s2051_s5 = inlined_call_operand.vmem [shape: bf16[2,96,128], index: 5, kind: output, shape index: {}]  }
   0x1   :  { %s1737_s20 = smov 0   ;;  %s1739_s21 = smov 0  }
   0x2   :  { %s1741_s22 = smov 0  }
   0x3 LB: > { %s24_s23 = sadd.s32 1, %s1690_s20  ;;  %s27_s24 = sadd.s32 1, %s1694_s21  ;;  %s1698_s22 = sphi %s1741_s22, %s15_s22   ;;  %s1694_s21 = sphi %s1739_s21, %s2055_s21   ;;  %s1690_s20 = sphi %s1737_s20, %s2054_s20   ;;  %s1686_s19 = sphi %s1735_s19, %s2053_s19   ;;  %s1682_s18 = sphi %s1733_s18, %s2052_s18  }
   0x4   : > { %p25_p0 = scmp.ge.s32.totalorder %s24_s23, 3  ;;  %p1227_p1 = scmp.ge.s32.totalorder %s1698_s22, 1 }
   0x5   : > { %p208_p2 = scmp.lt.s32.totalorder %s1698_s22, 7 }
   0x6   : > { %s2057_s23 = smov (%p25_p0, %s24_s23), 0  ;;  %s2059_s24 = smov (!%p25_p0, %s27_s24), %s1694_s21 }
   0x7   : > { %p209_p3 = pnand %p1227_p1, %p208_p2  ;;  %p29_p4 = scmp.ge.s32.totalorder %s2059_s24, 2 }
   0x8   : > { %s1228_s25 = sshll.u32 (!%p209_p3), %s1682_s18, 2  ;;  %p245_p5 = scmp.lt.s32.totalorder (!%p209_p3), %s1686_s19, 1 }
   0x9   : > { %s2061_s24 = smov (%p29_p4, %s2059_s24), 0  ;;  %212 = sbr.rel (%p209_p3) target bundleno = 624 (0x270), region = 40 }
   0xa   : > { %p247_p6 = scmp.lt.s32.totalorder (!%p209_p3), %s1228_s25, 11  ;;  %p1232_p7 = scmp.ne.s32.totalorder (!%p209_p3), %s1682_s18, 0 }
  0x10   : > { %s2063_s19 = smov (!%p245_p5, %s1686_s19), 1  ;;  %s2065_s25 = smov (!%p247_p6, %s1228_s25), 11 }
  0x11   : > { %s1540_s26 = smul.u32 12, %s2063_s19  ;;  %v1700_v0 = vmov (!%p1232_p7), 0  }
  0x12   : > { %268 = sbr.rel (%p1232_p7) target bundleno = 25 (0x19), region = 44  ;;  %269 = vst [vmem:[#allocation2] sm:$0xff] (!%p1232_p7), %v1700_v0  ;;  %270 = vst [vmem:[#allocation3] sm:$0xff] (!%p1232_p7), %v1700_v0 }
  0x13   : > { %s250_s27 = sadd.s32 %s1540_s26, %s2065_s25 }
  0x14   : > { %s1229_s28 = sshll.u32 %s250_s27, 2 }
  0x15   : > { %s1766_s6 = scalar_lea.vmem %s2046_s0, %s1229_s28  ;;  %s1771_s9 = scalar_lea.vmem %s2051_s5, %s1229_s28 }
  0x19 PF: > { %v1584_v1 = vld [vmem:[%s2047_s1] sm:$0xff]   ;;  %v1701_v2 = vmov 0.0   ;;  %v1586_v4 = vld [vmem:[%s2047_s1 + $0x8] sm:$0xff]   ;;  %vm1702_vm0 = vmmov 0   ;;  %v1588_v6 = vld [vmem:[%s2047_s1 + $0x10] sm:$0xff]  }
  0x1a   : > { %1372 = vmatprep.subr.bf16.mxu0 %v1701_v2  ;;  %1400 = vmatprep.subr.bf16.mxu1 %v1701_v2  ;;  %v1585_v3 = vld [vmem:[%s2047_s1 + $0x40] sm:$0xff]   ;;  %v1587_v5 = vld [vmem:[%s2047_s1 + $0x48] sm:$0xff]   ;;  %v1589_v7 = vld [vmem:[%s2047_s1 + $0x50] sm:$0xff]  }
  0x1b   : > { %1373 = vmatpush3.bf16.msra.mxu0 %v1584_v1  ;;  %1388 = vmatprep.mubr.msk.bf16.mxu0 %vm1702_vm0, %v1701_v2  ;;  %v1590_v8 = vld [vmem:[%s2047_s1 + $0x18] sm:$0xff]   ;;  %v1592_v10 = vld [vmem:[%s2047_s1 + $0x20] sm:$0xff]   ;;  %v1818_v12 = vld [vmem:[%s1766_s6 + $0x8] sm:$0xff]  }
  0x1c   : > { %1401 = vmatpush3.bf16.msra.mxu1 %v1585_v3  ;;  %1374 = vmatprep.subr.bf16.mxu0 %v1701_v2  ;;  %v1591_v9 = vld [vmem:[%s2047_s1 + $0x58] sm:$0xff]   ;;  %v1593_v11 = vld [vmem:[%s2047_s1 + $0x60] sm:$0xff]   ;;  %v1594_v13 = vld [vmem:[%s2047_s1 + $0x28] sm:$0xff]  }
  0x1d   : > { %1402 = vmatprep.subr.bf16.mxu1 %v1701_v2  ;;  %1416 = vmatprep.mubr.msk.bf16.mxu1 %vm1702_vm0, %v1701_v2  ;;  %v275_v14 = vld [vmem:[#allocation2] sm:$0xff]  ;;  %v1595_v15 = vld [vmem:[%s2047_s1 + $0x68] sm:$0xff]   ;;  %v1596_v16 = vld [vmem:[%s2047_s1 + $0x30] sm:$0xff]  }
  0x1e   : > { %288 = vst [vmem:[#allocation2] sm:$0xff] %v1818_v12  ;;  %v1597_v17 = vld [vmem:[%s2047_s1 + $0x70] sm:$0xff]   ;;  %v1598_v18 = vld [vmem:[%s2047_s1 + $0x38] sm:$0xff]   ;;  %v1601_v20 = vld [vmem:[%s2047_s1 + $0x80] sm:$0xff]  }
  0x1f   : > { %1375 = vmatpush3.bf16.msra.mxu0 %v1586_v4  ;;  %v1599_v19 = vld [vmem:[%s2047_s1 + $0x78] sm:$0xff]   ;;  %v1602_v21 = vld [vmem:[%s2047_s1 + $0x88] sm:$0xff]   ;;  %v1854_v22 = vld [vmem:[%s1766_s6] sm:$0xff]  }
  0x20   : > { %1403 = vmatpush3.bf16.msra.mxu1 %v1587_v5  ;;  %1376 = vmatprep.subr.bf16.mxu0 %v1701_v2  ;;  %v1604_v23 = vld [vmem:[%s2047_s1 + $0x90] sm:$0xff]   ;;  %v1605_v24 = vld [vmem:[%s2047_s1 + $0x98] sm:$0xff]   ;;  %v1606_v25 = vld [vmem:[%s2047_s1 + $0xa0] sm:$0xff]  }
  0x21   : > { %1404 = vmatprep.subr.bf16.mxu1 %v1701_v2  ;;  %v1607_v26 = vld [vmem:[%s2047_s1 + $0xa8] sm:$0xff]   ;;  %v1608_v27 = vld [vmem:[%s2047_s1 + $0xb0] sm:$0xff]   ;;  %v1609_v28 = vld [vmem:[%s2047_s1 + $0xb8] sm:$0xff]  }
  0x22   : > { %v1610_v29 = vld [vmem:[%s2049_s3] sm:$0xff]   ;;  %v1612_v31 = vld [vmem:[%s2049_s3 + $0x8] sm:$0xff]   ;;  %v1614_v33 = vld [vmem:[%s2049_s3 + $0x10] sm:$0xff]  }
  0x23   : > { %1377 = vmatpush3.bf16.msra.mxu0 %v1588_v6  ;;  %v1611_v30 = vld [vmem:[%s2049_s3 + $0x40] sm:$0xff]   ;;  %v1613_v32 = vld [vmem:[%s2049_s3 + $0x48] sm:$0xff]   ;;  %v1615_v34 = vld [vmem:[%s2049_s3 + $0x50] sm:$0xff]  }
  0x24   : > { %1405 = vmatpush3.bf16.msra.mxu1 %v1589_v7  ;;  %1378 = vmatprep.subr.bf16.mxu0 %v1701_v2  ;;  %v1616_v35 = vld [vmem:[%s2049_s3 + $0x18] sm:$0xff]   ;;  %v1618_v37 = vld [vmem:[%s2049_s3 + $0x20] sm:$0xff]   ;;  %v1620_v39 = vld [vmem:[%s2049_s3 + $0x28] sm:$0xff]  }
  0x25   : > { %1406 = vmatprep.subr.bf16.mxu1 %v1701_v2  ;;  %v1617_v36 = vld [vmem:[%s2049_s3 + $0x58] sm:$0xff]   ;;  %v1619_v38 = vld [vmem:[%s2049_s3 + $0x60] sm:$0xff]   ;;  %v1621_v40 = vld [vmem:[%s2049_s3 + $0x68] sm:$0xff]  }
  0x26   : > { %v1622_v41 = vld [vmem:[%s2049_s3 + $0x30] sm:$0xff]   ;;  %v1624_v43 = vld [vmem:[%s2049_s3 + $0x38] sm:$0xff]   ;;  %v1969_v45 = vld [vmem:[#allocation3] sm:$0xff] }
  0x27   : > { %1379 = vmatpush3.bf16.msra.mxu0 %v1590_v8  ;;  %v1623_v42 = vld [vmem:[%s2049_s3 + $0x70] sm:$0xff]   ;;  %v1625_v44 = vld [vmem:[%s2049_s3 + $0x78] sm:$0xff]   ;;  %v1626_v46 = vld [vmem:[%s2049_s3 + $0x80] sm:$0xff]  }
  0x28   : > { %1407 = vmatpush3.bf16.msra.mxu1 %v1591_v9  ;;  %1380 = vmatprep.subr.bf16.mxu0 %v1701_v2  ;;  %v1627_v47 = vld [vmem:[%s2049_s3 + $0x88] sm:$0xff]   ;;  %v1628_v48 = vld [vmem:[%s2049_s3 + $0x90] sm:$0xff]   ;;  %v1629_v49 = vld [vmem:[%s2049_s3 + $0x98] sm:$0xff]  }
  0x29   : > { %1408 = vmatprep.subr.bf16.mxu1 %v1701_v2  ;;  %v1630_v50 = vld [vmem:[%s2049_s3 + $0xa0] sm:$0xff]   ;;  %v1631_v51 = vld [vmem:[%s2049_s3 + $0xa8] sm:$0xff]   ;;  %v1632_v52 = vld [vmem:[%s2049_s3 + $0xb0] sm:$0xff]  }
  0x2a   : > { %v1633_v53 = vld [vmem:[%s2049_s3 + $0xb8] sm:$0xff]  }
  0x2b   : > { %1381 = vmatpush3.bf16.msra.mxu0 %v1592_v10 }
  0x2c   : > { %1409 = vmatpush3.bf16.msra.mxu1 %v1593_v11  ;;  %1382 = vmatprep.subr.bf16.mxu0 %v1701_v2 }
  0x2d   : > { %1410 = vmatprep.subr.bf16.mxu1 %v1701_v2 }
  0x2f   : > { %1383 = vmatpush3.bf16.msra.mxu0 %v1594_v13 }
  0x30   : > { %1411 = vmatpush3.bf16.msra.mxu1 %v1595_v15  ;;  %1384 = vmatprep.subr.bf16.mxu0 %v1701_v2 }
  0x31   : > { %1412 = vmatprep.subr.bf16.mxu1 %v1701_v2 }
  0x33   : > { %1385 = vmatpush3.bf16.msra.mxu0 %v1596_v16 }
  0x34   : > { %1413 = vmatpush3.bf16.msra.mxu1 %v1597_v17  ;;  %1386 = vmatprep.subr.bf16.mxu0 %v1701_v2 }
  0x35   : > { %1414 = vmatprep.subr.bf16.mxu1 %v1701_v2 }
  0x37   : > { %1387 = vmatpush3.bf16.msra.mxu0 %v1598_v18 }
  0x38   : > { %1415 = vmatpush3.bf16.msra.mxu1 %v1599_v19  ;;  %1428 = vmatprep.subr.bf16.mxu0 %v1701_v2 }
  0x39   : > { %1456 = vmatprep.subr.bf16.mxu1 %v1701_v2 }
  0x3a   : > { %1389 = vmatmul.mubr.bf16.vlgmr.msra.gmra.mrb[0].mxu0 %v275_v14 }
  0x3b   : > { %1417 = vmatmul.mubr.bf16.vlgmr.msra.gmra.mrb[0].mxu1 %v275_v14  ;;  %1429 = vmatpush3.bf16.msra.mxu0 %v1601_v20 }
  0x3c   : > { %1430 = vmatprep.subr.bf16.mxu0 %v1701_v2  ;;  %1420 = vmatprep.mubr.msk.bf16.mxu1 %vm1702_vm0, %v1701_v2 }
  0x3d   : > { %1392 = vmatprep.mubr.msk.bf16.mxu0 %vm1702_vm0, %v1701_v2  ;;  %1457 = vmatpush3.bf16.msra.mxu1 %v1610_v29 }
  0x3e   : > { %1458 = vmatprep.subr.bf16.mxu1 %v1701_v2 }
  0x3f   : > { %1431 = vmatpush3.bf16.msra.mxu0 %v1602_v21 }
  0x40   : > { %1432 = vmatprep.subr.bf16.mxu0 %v1701_v2 }
  0x41   : > { %1459 = vmatpush3.bf16.msra.mxu1 %v1612_v31 }
  0x42   : > { %1393 = vmatmul.mubr.bf16.gmra.mrb[4].mxu0 %v1854_v22  ;;  %1460 = vmatprep.subr.bf16.mxu1 %v1701_v2 }
  0x43   : > { %1421 = vmatmul.mubr.bf16.gmra.mrb[4].mxu1 %v1854_v22  ;;  %1433 = vmatpush3.bf16.msra.mxu0 %v1604_v23 }
  0x44   : > { %1434 = vmatprep.subr.bf16.mxu0 %v1701_v2  ;;  %1424 = vmatprep.mubr.msk.bf16.mxu1 %vm1702_vm0, %v1701_v2 }
  0x45   : > { %1396 = vmatprep.mubr.msk.bf16.mxu0 %vm1702_vm0, %v1701_v2  ;;  %1461 = vmatpush3.bf16.msra.mxu1 %v1614_v33 }
  0x46   : > { %1462 = vmatprep.subr.bf16.mxu1 %v1701_v2 }
  0x47   : > { %1435 = vmatpush3.bf16.msra.mxu0 %v1605_v24 }
  0x48   : > { %1436 = vmatprep.subr.bf16.mxu0 %v1701_v2 }
  0x49   : > { %1463 = vmatpush3.bf16.msra.mxu1 %v1616_v35 }
  0x4a   : > { %1397 = vmatmul.mubr.bf16.gmra.mrb[8].mxu0 %v1818_v12  ;;  %1464 = vmatprep.subr.bf16.mxu1 %v1701_v2 }
  0x4b   : > { %1425 = vmatmul.mubr.bf16.gmra.mrb[8].mxu1 %v1818_v12  ;;  %1437 = vmatpush3.bf16.msra.mxu0 %v1606_v25 }
  0x4c   : > { %1438 = vmatprep.subr.bf16.mxu0 %v1701_v2  ;;  %1444 = vmatprep.mubr.msk.bf16.mxu0 %vm1702_vm0, %v1701_v2 }
  0x4d   : > { %1472 = vmatprep.mubr.msk.bf16.mxu1 %vm1702_vm0, %v1701_v2  ;;  %1465 = vmatpush3.bf16.msra.mxu1 %v1618_v37 }
  0x4e   : > { %1466 = vmatprep.subr.bf16.mxu1 %v1701_v2 }
  0x4f   : > { %1439 = vmatpush3.bf16.msra.mxu0 %v1607_v26  ;;  %v1259_v26 = vld [vmem:[%s2048_s2] ss:$0 sm:$0xff] }
  0x50   : > { %1440 = vmatprep.subr.bf16.mxu0 %v1701_v2 }
  0x51   : > { %1467 = vmatpush3.bf16.msra.mxu1 %v1620_v39 }
  0x52   : > { %1468 = vmatprep.subr.bf16.mxu1 %v1701_v2 }
  0x53   : > { %1441 = vmatpush3.bf16.msra.mxu0 %v1608_v27 }
  0x54   : > { %1442 = vmatprep.subr.bf16.mxu0 %v1701_v2 }
  0x55   : > { %1469 = vmatpush3.bf16.msra.mxu1 %v1622_v41 }
  0x56   : > { %1470 = vmatprep.subr.bf16.mxu1 %v1701_v2 }
  0x57   : > { %1443 = vmatpush3.bf16.msra.mxu0 %v1609_v28 }
  0x58   : > { %1484 = vmatprep.subr.bf16.mxu0 %v1701_v2 }
  0x59   : > { %1471 = vmatpush3.bf16.msra.mxu1 %v1624_v43 }
  0x5a   : > { %1445 = vmatmul.mubr.bf16.vlgmr.msra.gmra.mrb[12].mxu0 %v275_v14  ;;  %1512 = vmatprep.subr.bf16.mxu1 %v1701_v2 }
  0x5b   : > { %1448 = vmatprep.mubr.msk.bf16.mxu0 %vm1702_vm0, %v1701_v2  ;;  %1485 = vmatpush3.bf16.msra.mxu0 %v1611_v30 }
  0x5c   : > { %1486 = vmatprep.subr.bf16.mxu0 %v1701_v2  ;;  %1473 = vmatmul.mubr.bf16.vlgmr.msra.gmra.mrb[12].mxu1 %v1969_v45 }
  0x5d   : > { %1476 = vmatprep.mubr.msk.bf16.mxu1 %vm1702_vm0, %v1701_v2  ;;  %1513 = vmatpush3.bf16.msra.mxu1 %v1626_v46 }
  0x5e   : > { %1514 = vmatprep.subr.bf16.mxu1 %v1701_v2 }
  0x5f   : > { %1487 = vmatpush3.bf16.msra.mxu0 %v1613_v32 }
  0x60   : > { %1488 = vmatprep.subr.bf16.mxu0 %v1701_v2 }
  0x61   : > { %1515 = vmatpush3.bf16.msra.mxu1 %v1627_v47 }
  0x62   : > { %1449 = vmatmul.mubr.bf16.gmra.mrb[16].mxu0 %v1854_v22  ;;  %1516 = vmatprep.subr.bf16.mxu1 %v1701_v2 }
  0x63   : > { %1452 = vmatprep.mubr.msk.bf16.mxu0 %vm1702_vm0, %v1701_v2  ;;  %1489 = vmatpush3.bf16.msra.mxu0 %v1615_v34 }
  0x64   : > { %1490 = vmatprep.subr.bf16.mxu0 %v1701_v2 }
  0x65   : > { %1517 = vmatpush3.bf16.msra.mxu1 %v1628_v48 }
  0x66   : > { %1518 = vmatprep.subr.bf16.mxu1 %v1701_v2 }
  0x67   : > { %1491 = vmatpush3.bf16.msra.mxu0 %v1617_v36 }
  0x68   : > { %1492 = vmatprep.subr.bf16.mxu0 %v1701_v2 }
  0x69   : > { %1519 = vmatpush3.bf16.msra.mxu1 %v1629_v49 }
  0x6a   : > { %1453 = vmatmul.mubr.bf16.gmra.mrb[20].mxu0 %v1818_v12  ;;  %1520 = vmatprep.subr.bf16.mxu1 %v1701_v2 }
  0x6b   : > { %1500 = vmatprep.mubr.msk.bf16.mxu0 %vm1702_vm0, %v1701_v2  ;;  %1493 = vmatpush3.bf16.msra.mxu0 %v1619_v38 }
  0x6c   : > { %1494 = vmatprep.subr.bf16.mxu0 %v1701_v2 }
  0x6d   : > { %1521 = vmatpush3.bf16.msra.mxu1 %v1630_v50 }
  0x6e   : > { %1522 = vmatprep.subr.bf16.mxu1 %v1701_v2 }
  0x6f   : > { %1495 = vmatpush3.bf16.msra.mxu0 %v1621_v40 }
  0x70   : > { %1496 = vmatprep.subr.bf16.mxu0 %v1701_v2 }
  0x71   : > { %1523 = vmatpush3.bf16.msra.mxu1 %v1631_v51 }
  0x72   : > { %1524 = vmatprep.subr.bf16.mxu1 %v1701_v2 }
  0x73   : > { %1497 = vmatpush3.bf16.msra.mxu0 %v1623_v42 }
  0x74   : > { %1498 = vmatprep.subr.bf16.mxu0 %v1701_v2 }
  0x75   : > { %1525 = vmatpush3.bf16.msra.mxu1 %v1632_v52 }
  0x76   : > { %1526 = vmatprep.subr.bf16.mxu1 %v1701_v2 }
  0x77   : > { %1499 = vmatpush3.bf16.msra.mxu0 %v1625_v44 }
  0x79   : > { %1527 = vmatpush3.bf16.msra.mxu1 %v1633_v53 }
  0x7a   : > { %1501 = vmatmul.mubr.bf16.vlgmr.msra.gmra.mrb[24].mxu0 %v1969_v45 }
  0x7b   : > { %1504 = vmatprep.mubr.msk.bf16.mxu0 %vm1702_vm0, %v1701_v2 }
 0x10d   : > { %v387_v54 = vpop.f32.mrb[0].mxu0 }
 0x10e   : > { %v506_v55 = vpop.f32.mrb[0].mxu1  ;;  %v1390_v56 = vpop.f32.mrb[1].mxu0 }
 0x10f   : > { %v1418_v57 = vpop.f32.mrb[1].mxu1  ;;  %v390_v58 = vpop.f32.mrb[2].mxu0 }
 0x110   : > { %v508_v59 = vpop.f32.mrb[2].mxu1  ;;  %v1391_v60 = vpop.f32.mrb[3].mxu0 }
 0x111   : > { %v527_v61 = vadd.f32 %v508_v59, %v387_v54  ;;  %v1419_v62 = vpop.f32.mrb[3].mxu1 }
 0x115   : > { %v395_v63 = vpop.f32.mrb[4].mxu0 }
 0x116   : > { %v513_v0 = vpop.f32.mrb[4].mxu1  ;;  %v1394_v1 = vpop.f32.mrb[5].mxu0 }
 0x117   : > { %v528_v3 = vadd.f32 %v513_v0, %v390_v58  ;;  %v1422_v4 = vpop.f32.mrb[5].mxu1  ;;  %v398_v5 = vpop.f32.mrb[6].mxu0 }
 0x118   : > { %v516_v6 = vpop.f32.mrb[6].mxu1  ;;  %v1395_v7 = vpop.f32.mrb[7].mxu0 }
 0x119   : > { %v529_v8 = vadd.f32 %v516_v6, %v395_v63  ;;  %v1423_v9 = vpop.f32.mrb[7].mxu1 }
 0x11d   : > { %v403_v10 = vpop.f32.mrb[8].mxu0 }
 0x11e   : > { %v521_v11 = vpop.f32.mrb[8].mxu1  ;;  %v1398_v13 = vpop.f32.mrb[9].mxu0 }
 0x11f   : > { %v530_v14 = vadd.f32 %v521_v11, %v398_v5  ;;  %v405_v15 = vpop.f32.mrb[10].mxu0  ;;  %v1426_v16 = vpop.f32.mrb[9].mxu1 }
 0x120   : > { %v1399_v17 = vpop.f32.mrb[11].mxu0  ;;  %v524_v18 = vpop.f32.mrb[10].mxu1 }
 0x121   : > { %v1427_v19 = vpop.f32.mrb[11].mxu1 }
 0x12d   : > { %v629_v20 = vpop.f32.mrb[12].mxu0 }
 0x12e   : > { %v1446_v21 = vpop.f32.mrb[13].mxu0 }
 0x12f   : > { %v631_v23 = vpop.f32.mrb[14].mxu0  ;;  %v787_v1 = vpop.f32.mrb[12].mxu1 }
 0x130   : > { %v1447_v24 = vpop.f32.mrb[15].mxu0 }
 0x135   : > { %v635_v25 = vpop.f32.mrb[16].mxu0 }
 0x136   : > { %v650_v27 = vadd.f32 %v635_v25, %v527_v61  ;;  %v1450_v28 = vpop.f32.mrb[17].mxu0 }
 0x137   : > { %v638_v29 = vpop.f32.mrb[18].mxu0 }
 0x138   : > { %v661_v30 = vadd.f32 %v1259_v26, %v650_v27  ;;  %v651_v31 = vadd.f32 %v638_v29, %v528_v3  ;;  %v1451_v32 = vpop.f32.mrb[19].mxu0  ;;  %v1474_v3 = vpop.f32.mrb[13].mxu1 }
 0x139   : > { %v790_v5 = vpop.f32.mrb[14].mxu1 }
 0x13a   : > { %v669_v33 = vmul.f32 0.70710677, %v661_v30  ;;  %v662_v34 = vadd.f32 %v1259_v26, %v651_v31  ;;  %v665_v50 = vmul.f32 0.5, %v661_v30  ;;  %v1475_v7 = vpop.f32.mrb[15].mxu1 }
 0x13b   : > { %v1087_v7 = vunpack.c.l.bf16 %v1818_v12 }
 0x13c   : > { %1636 = verf.f32 %v669_v33  ;;  %v670_v35 = vmul.f32 0.70710677, %v662_v34  ;;  %v666_v51 = vmul.f32 0.5, %v662_v34 }
 0x13d   : > { %v643_v36 = vpop.f32.mrb[20].mxu0 }
 0x13e   : > { %1638 = verf.f32 %v670_v35  ;;  %v652_v37 = vadd.f32 %v643_v36, %v529_v8  ;;  %v1454_v38 = vpop.f32.mrb[21].mxu0  ;;  %v1284_v35 = vld [vmem:[%s2050_s4] ss:$0 sm:$0xff] }
 0x13f   : > { %v646_v39 = vpop.f32.mrb[22].mxu0 }
 0x140   : > { %v663_v40 = vadd.f32 %v1259_v26, %v652_v37  ;;  %v653_v41 = vadd.f32 %v646_v39, %v530_v14  ;;  %v1455_v42 = vpop.f32.mrb[23].mxu0 }
 0x142   : > { %v671_v43 = vmul.f32 0.70710677, %v663_v40  ;;  %v664_v44 = vadd.f32 %v1259_v26, %v653_v41  ;;  %v667_v59 = vmul.f32 0.5, %v663_v40 }
 0x144   : > { %1640 = verf.f32 %v671_v43  ;;  %v672_v46 = vmul.f32 0.70710677, %v664_v44  ;;  %v668_v60 = vmul.f32 0.5, %v664_v44 }
 0x146   : > { %v1637_v47 = vpop.eup %1636  ;;  %1642 = verf.f32 %v672_v46 }
 0x147   : > { %v677_v48 = vadd.f32 1.0, %v1637_v47 }
 0x148   : > { %v1639_v49 = vpop.eup %1638 }
 0x149   : > { %v678_v52 = vadd.f32 1.0, %v1639_v49  ;;  %v681_v53 = vmul.f32 %v677_v48, %v665_v50 }
 0x14b   : > { %v682_v54 = vmul.f32 %v678_v52, %v666_v51 }
 0x14d   : > { %v685_v55 = vpack.c.bf16 %v682_v54, %v681_v53  ;;  %v906_v4 = vpop.f32.mrb[24].mxu0 }
 0x14e   : > { %v1641_v56 = vpop.eup %1640  ;;  %v1502_v6 = vpop.f32.mrb[25].mxu0 }
 0x14f   : > { %v679_v57 = vadd.f32 1.0, %v1641_v56  ;;  %1477 = vmatmul.mubr.bf16.gmra.mrb[16].mxu1 %v685_v55  ;;  %1505 = vmatmul.mubr.bf16.gmra.mrb[28].mxu0 %v685_v55  ;;  %v908_v8 = vpop.f32.mrb[26].mxu0 }
 0x150   : > { %v1643_v58 = vpop.eup %1642  ;;  %1480 = vmatprep.mubr.msk.bf16.mxu1 %vm1702_vm0, %v1701_v2  ;;  %1508 = vmatprep.mubr.msk.bf16.mxu0 %vm1702_vm0, %v1701_v2  ;;  %v927_v9 = vadd.f32 %v908_v8, %v787_v1  ;;  %v1503_v10 = vpop.f32.mrb[27].mxu0 }
 0x151   : > { %v680_v61 = vadd.f32 1.0, %v1643_v58  ;;  %v683_v62 = vmul.f32 %v679_v57, %v667_v59  ;;  %v1085_v57 = vunpack.c.l.bf16 %v1854_v22 }
 0x153   : > { %v684_v63 = vmul.f32 %v680_v61, %v668_v60  ;;  %v1086_v61 = vunpack.c.h.bf16 %v1854_v22 }
 0x155   : > { %v686_v0 = vpack.c.bf16 %v684_v63, %v683_v62 }
 0x157   : > { %688 = vst [vmem:[#allocation3] sm:$0xff] %v686_v0  ;;  %1481 = vmatmul.mubr.bf16.gmra.mrb[20].mxu1 %v686_v0  ;;  %1509 = vmatmul.mubr.bf16.gmra.mrb[32].mxu0 %v686_v0 }
 0x158   : > { %1528 = vmatprep.mubr.msk.bf16.mxu1 %vm1702_vm0, %v1701_v2 }
 0x15f   : > { %1529 = vmatmul.mubr.bf16.vlgmr.msra.gmra.mrb[24].mxu1 %v1969_v45 }
 0x160   : > { %1532 = vmatprep.mubr.msk.bf16.mxu1 %vm1702_vm0, %v1701_v2 }
 0x167   : > { %1533 = vmatmul.mubr.bf16.gmra.mrb[28].mxu1 %v685_v55 }
 0x168   : > { %1536 = vmatprep.mubr.msk.bf16.mxu1 %vm1702_vm0, %v1701_v2 }
 0x16f   : > { %1537 = vmatmul.mubr.bf16.gmra.mrb[32].mxu1 %v686_v0 }
 0x222   : > { %v795_v11 = vpop.f32.mrb[16].mxu1  ;;  %v913_v13 = vpop.f32.mrb[28].mxu0 }
 0x223   : > { %v928_v45 = vadd.f32 %v913_v13, %v790_v5  ;;  %v1478_v14 = vpop.f32.mrb[17].mxu1  ;;  %v1506_v15 = vpop.f32.mrb[29].mxu0  ;;  %v1088_v13 = vunpack.c.h.bf16 %v1818_v12 }
 0x224   : > { %v798_v16 = vpop.f32.mrb[18].mxu1  ;;  %v916_v17 = vpop.f32.mrb[30].mxu0 }
 0x225   : > { %v929_v18 = vadd.f32 %v916_v17, %v795_v11  ;;  %v1479_v19 = vpop.f32.mrb[19].mxu1  ;;  %v1507_v2 = vpop.f32.mrb[31].mxu0 }
 0x22a   : > { %v803_v20 = vpop.f32.mrb[20].mxu1  ;;  %v921_v21 = vpop.f32.mrb[32].mxu0 }
 0x22b   : > { %v930_v23 = vadd.f32 %v921_v21, %v798_v16  ;;  %v1482_v24 = vpop.f32.mrb[21].mxu1  ;;  %v1510_v25 = vpop.f32.mrb[33].mxu0 }
 0x22c   : > { %v805_v26 = vpop.f32.mrb[22].mxu1  ;;  %v924_v27 = vpop.f32.mrb[34].mxu0 }
 0x22d   : > { %v1483_v28 = vpop.f32.mrb[23].mxu1  ;;  %v1511_v29 = vpop.f32.mrb[35].mxu0 }
 0x232   : > { %v1029_v30 = vpop.f32.mrb[24].mxu1 }
 0x233   : > { %v1530_v31 = vpop.f32.mrb[25].mxu1 }
 0x234   : > { %v1031_v32 = vpop.f32.mrb[26].mxu1 }
 0x235   : > { %v1531_v33 = vpop.f32.mrb[27].mxu1 }
 0x23a   : > { %v1035_v34 = vpop.f32.mrb[28].mxu1 }
 0x23b   : > { %v1050_v36 = vadd.f32 %v1035_v34, %v927_v9  ;;  %v1534_v37 = vpop.f32.mrb[29].mxu1 }
 0x23c   : > { %v1038_v38 = vpop.f32.mrb[30].mxu1 }
 0x23d   : > { %v1061_v39 = vadd.f32 %v1284_v35, %v1050_v36  ;;  %v1051_v40 = vadd.f32 %v1038_v38, %v928_v45  ;;  %v1535_v41 = vpop.f32.mrb[31].mxu1 }
 0x23f   : > { %v1069_v42 = vmul.f32 0.70710677, %v1061_v39  ;;  %v1062_v43 = vadd.f32 %v1284_v35, %v1051_v40  ;;  %v1065_v58 = vmul.f32 0.5, %v1061_v39 }
 0x241   : > { %1644 = verf.f32 %v1069_v42  ;;  %v1070_v44 = vmul.f32 0.70710677, %v1062_v43  ;;  %v1066_v63 = vmul.f32 0.5, %v1062_v43 }
 0x242   : > { %v1043_v46 = vpop.f32.mrb[32].mxu1 }
 0x243   : > { %1646 = verf.f32 %v1070_v44  ;;  %v1052_v47 = vadd.f32 %v1043_v46, %v929_v18  ;;  %v1538_v48 = vpop.f32.mrb[33].mxu1 }
 0x244   : > { %v1046_v49 = vpop.f32.mrb[34].mxu1 }
 0x245   : > { %v1063_v50 = vadd.f32 %v1284_v35, %v1052_v47  ;;  %v1053_v51 = vadd.f32 %v1046_v49, %v930_v23  ;;  %v1539_v52 = vpop.f32.mrb[35].mxu1 }
 0x247   : > { %v1071_v53 = vmul.f32 0.70710677, %v1063_v50  ;;  %v1064_v54 = vadd.f32 %v1284_v35, %v1053_v51  ;;  %v1067_v9 = vmul.f32 0.5, %v1063_v50 }
 0x249   : > { %1648 = verf.f32 %v1071_v53  ;;  %v1072_v55 = vmul.f32 0.70710677, %v1064_v54  ;;  %v1068_v22 = vmul.f32 0.5, %v1064_v54 }
 0x24b   : > { %v1645_v56 = vpop.eup %1644  ;;  %1650 = verf.f32 %v1072_v55 }
 0x24c   : > { %v1077_v59 = vadd.f32 1.0, %v1645_v56 }
 0x24d   : > { %v1647_v60 = vpop.eup %1646 }
 0x24e   : > { %v1081_v62 = vmul.f32 %v1077_v59, %v1065_v58  ;;  %v1078_v0 = vadd.f32 1.0, %v1647_v60 }
 0x250   : > { %v1089_v1 = vadd.f32 %v1085_v57, %v1081_v62  ;;  %v1082_v3 = vmul.f32 %v1078_v0, %v1066_v63 }
 0x252   : > { %v1097_v4 = vmul.f32 0.70710677, %v1089_v1  ;;  %v1090_v5 = vadd.f32 %v1086_v61, %v1082_v3  ;;  %v1093_v23 = vmul.f32 0.5, %v1089_v1 }
 0x253   : > { %v1649_v6 = vpop.eup %1648 }
 0x254   : > { %1652 = verf.f32 %v1097_v4  ;;  %v1098_v8 = vmul.f32 0.70710677, %v1090_v5  ;;  %v1079_v10 = vadd.f32 1.0, %v1649_v6  ;;  %v1094_v24 = vmul.f32 0.5, %v1090_v5 }
 0x255   : > { %v1651_v11 = vpop.eup %1650 }
 0x256   : > { %1654 = verf.f32 %v1098_v8  ;;  %v1083_v45 = vmul.f32 %v1079_v10, %v1067_v9  ;;  %v1080_v14 = vadd.f32 1.0, %v1651_v11 }
 0x258   : > { %v1091_v15 = vadd.f32 %v1087_v7, %v1083_v45  ;;  %v1084_v16 = vmul.f32 %v1080_v14, %v1068_v22 }
 0x25a   : > { %v1099_v17 = vmul.f32 0.70710677, %v1091_v15  ;;  %v1092_v18 = vadd.f32 %v1088_v13, %v1084_v16  ;;  %v1095_v31 = vmul.f32 0.5, %v1091_v15 }
 0x25c   : > { %1656 = verf.f32 %v1099_v17  ;;  %v1100_v19 = vmul.f32 0.70710677, %v1092_v18  ;;  %v1096_v32 = vmul.f32 0.5, %v1092_v18 }
 0x25e   : > { %v1653_v2 = vpop.eup %1652  ;;  %1658 = verf.f32 %v1100_v19 }
 0x25f   : > { %v1105_v20 = vadd.f32 1.0, %v1653_v2 }
 0x260   : > { %v1655_v21 = vpop.eup %1654 }
 0x261   : > { %v1106_v25 = vadd.f32 1.0, %v1655_v21  ;;  %v1109_v12 = vmul.f32 %v1105_v20, %v1093_v23 }
 0x263   : > { %v1110_v26 = vmul.f32 %v1106_v25, %v1094_v24 }
 0x265   : > { %v1298_v27 = vpack.c.bf16 %v1110_v26, %v1109_v12 }
 0x266   : > { %v1657_v28 = vpop.eup %1656 }
 0x267   : > { %1299 = vst [vmem:[%s1771_s9] sm:$0xff] %v1298_v27   ;;  %v1107_v29 = vadd.f32 1.0, %v1657_v28 }
 0x268   : > { %v1659_v30 = vpop.eup %1658 }
 0x269   : > { %v1108_v33 = vadd.f32 1.0, %v1659_v30  ;;  %v1111_v34 = vmul.f32 %v1107_v29, %v1095_v31 }
 0x26b   : > { %v1112_v35 = vmul.f32 %v1108_v33, %v1096_v32 }
 0x26d   : > { %v1303_v36 = vpack.c.bf16 %v1112_v35, %v1111_v34 }
 0x26f   : > { %1305 = vst [vmem:[%s1771_s9 + $0x8] sm:$0xff] %v1303_v36  }
 0x270 PF: > { %s15_s22 = sadd.s32 1, %s1698_s22   ;;  %s2052_s18 = smov %s1690_s20 }
 0x271   : > { %p12_p8 = scmp.ge.s32.totalorder %s15_s22, 8   ;;  %s2053_s19 = smov %s1694_s21 }
 0x272   : > { %s2054_s20 = smov %s2057_s23  ;;  %s2055_s21 = smov %s2061_s24 }
 0x273   :  { %14 = sbr.rel (!%p12_p8) target bundleno = 3 (0x3), region = 74 }

// kernel: temporal_conv_net_forward.5
= control target key start
LH: loop header
LB: loop body
LE: loop exit
PB: predicated region body
PF: predicated region fallthrough
CT: control target
= control target key end

     0   :  { %12 = vsyncpa [#allocation5], 0  ;;  %s2079_s24 = smov 0   ;;  %s2081_s25 = smov 0   ;;  %s2428_s0 = inlined_call_operand.vmem [shape: bf16[2,96,128], index: 0, kind: input, shape index: {}]   ;;  %s2429_s1 = inlined_call_operand.vmem [shape: bf16[384,128], index: 1, kind: input, shape index: {}]   ;;  %s2430_s2 = inlined_call_operand.vmem [shape: f32[1,128], index: 2, kind: input, shape index: {}]   ;;  %s2431_s3 = inlined_call_operand.hbm [shape: bf16[384,128], index: 3, kind: input, shape index: {}]   ;;  %s2432_s4 = inlined_call_operand.vmem [shape: f32[1,128], index: 4, kind: input, shape index: {}]   ;;  %s2433_s5 = inlined_call_operand.vmem [shape: bf16[128,128], index: 5, kind: input, shape index: {}]   ;;  %s2434_s6 = inlined_call_operand.vmem [shape: f32[1,128], index: 6, kind: input, shape index: {}]   ;;  %s2435_s7 = inlined_call_operand.vmem [shape: bf16[2,96,128], index: 7, kind: output, shape index: {}]  }
   0x1   :  { %s2083_s26 = smov 0   ;;  %s2085_s27 = smov 0  }
   0x2   :  { %s2087_s28 = smov 0  }
   0x3 LB: > { %s1464_s29 = sadd.s32 4294967295, %s2031_s28   ;;  %s27_s30 = sadd.s32 1, %s2023_s26  ;;  %s2031_s28 = sphi %s2087_s28, %s18_s28   ;;  %s2027_s27 = sphi %s2085_s27, %s2447_s27   ;;  %s2023_s26 = sphi %s2083_s26, %s2446_s26   ;;  %s2019_s25 = sphi %s2081_s25, %s2445_s25   ;;  %s2015_s24 = sphi %s2079_s24, %s2444_s24  }
   0x4   : > { %p28_p0 = scmp.ge.s32.totalorder %s27_s30, 3  ;;  %s30_s8 = sadd.s32 1, %s2027_s27 }
   0x5   : > { %p1466_p1 = scmp.ge.s32.totalorder %s2031_s28, 1  ;;  %p217_p2 = scmp.lt.s32.totalorder %s2031_s28, 7 }
   0x6   : > { %s2449_s30 = smov (%p28_p0, %s27_s30), 0  ;;  %s2451_s8 = smov (!%p28_p0, %s30_s8), %s2027_s27 }
   0x7   : > { %p2112_p3 = pnand %p1466_p1, %p217_p2  ;;  %p32_p4 = scmp.ge.s32.totalorder %s2451_s8, 2 }
   0x8   : > { %p2116_p5 = scmp.eq.s32.totalorder %s1464_s29, 0  ;;  %s2033_s11 = smov [#allocation4]  }
   0x9   : > { %s2439_s9 = scalar_select %p2112_p3, 1, 0 }
   0xa   : > { %s2440_s10 = scalar_select %p2116_p5, 1, 0 }
   0xb   : > { %p1827_p6 = pneg %p2112_p3  ;;  %s2453_s8 = smov (%p32_p4, %s2451_s8), 0 }
   0xc   : > { %s235_s12 = sshll.u32 %s2033_s11, 4  ;;  %s1961_s16 = scalar_lea.hbm %s2431_s3, 3072  ;;  %s236_s12 = int_to_ptr.vmem [resolvable:$true] %s235_s12 }
   0xd   : > { %p2126_p7 = pnand %p2116_p5, %p1827_p6  ;;  %p1962_p8 = scmp.ne.s32.totalorder %s2431_s3, %s1961_s16 }
   0xe   : > { %p1968_p12 = scmp.lt.u32.totalorder %s1961_s16, %s2431_s3 }
   0xf   : > { %p1963_p9 = pneg %p2126_p7 }
  0x11   : > { %p1964_p10 = pnand %p1963_p9, %p1962_p8 }
  0x13   : > { %p1965_p11 = pneg %p1964_p10 }
  0x15   : > { %p1970_p13 = pnand %p1968_p12, %p1965_p11 }
  0x17   : > { %1973 = shalt.err (!%p1970_p13)
}
  0x18   : > { %s1974_s21 = scalar_lea.vmem %s236_s12, 3072  ;;  %p1982_p4 = scmp.lt.s32.totalorder %s236_s12, %s236_s12 }
  0x19   : > { %p1975_p0 = scmp.ne.s32.totalorder %s236_s12, %s1974_s21  ;;  %p1983_p6 = scmp.lt.s32.totalorder %s1974_s21, %s1974_s21 }
  0x1b   : > { %p1977_p1 = pnand %p1975_p0, %p1963_p9  ;;  %p1984_p5 = por %p1983_p6, %p1982_p4 }
  0x1d   : > { %p1978_p2 = pneg %p1977_p1 }
  0x1f   : > { %p1985_p3 = pnand %p1984_p5, %p1978_p2 }
  0x21   : > { %1988 = shalt.err (!%p1985_p3)
}
  0x22   : > { %s2034_s22 = smov 64   ;;  %s2035_s23 = smov 4  }
  0x23   : > { %1830 = dma.hbm_to_vmem [thread:$0]  (!%p2126_p7), %s2431_s3, 3072, %s236_s12, [#allocation5], %s2034_s22, %s2034_s22, %s2035_s23  }
  0x24   : > { %p2442_p8 = scmp.ne.s32.totalorder %s2439_s9, 0 }
  0x25   : > { %p2443_p10 = scmp.ne.s32.totalorder (!%p2442_p8), %s2440_s10, 0 }
  0x26   : > { %273 = sbr.rel (%p2442_p8) target bundleno = 656 (0x290), region = 48 }
  0x2d   : > { %2010 = dma.done.wait (%p2443_p10), [#allocation5], 3072  }
  0x2e   : > { %2012 = vsyncadd (%p2443_p10), [#allocation5], 4294964224  ;;  %s1471_s14 = sshll.u32 %s2015_s24, 2  ;;  %p314_p3 = scmp.lt.s32.totalorder %s2019_s25, 1 }
  0x2f   : > { %p316_p5 = scmp.lt.s32.totalorder %s1471_s14, 11  ;;  %p1475_p7 = scmp.ne.s32.totalorder %s2015_s24, 0 }
  0x30   : > { %s2455_s25 = smov (!%p314_p3, %s2019_s25), 1  ;;  %v2036_v0 = vmov (!%p1475_p7), 0  }
  0x31   : > { %s2457_s14 = smov (!%p316_p5, %s1471_s14), 11  ;;  %s1822_s13 = smul.u32 12, %s2455_s25  ;;  %338 = vst [vmem:[#allocation2] sm:$0xff] (!%p1475_p7), %v2036_v0  ;;  %339 = vst [vmem:[#allocation3] sm:$0xff] (!%p1475_p7), %v2036_v0 }
  0x32   : > { %337 = sbr.rel (%p1475_p7) target bundleno = 57 (0x39), region = 56 }
  0x33   : > { %s319_s15 = sadd.s32 %s1822_s13, %s2457_s14 }
  0x34   : > { %s1472_s12 = sshll.u32 %s319_s15, 2 }
  0x35   : > { %s2158_s17 = scalar_lea.vmem %s2428_s0, %s1472_s12  ;;  %s2163_s10 = scalar_lea.vmem %s2435_s7, %s1472_s12 }
  0x39 PF: > { %v1879_v1 = vld [vmem:[%s2429_s1] sm:$0xff]   ;;  %v2037_v2 = vmov 0.0   ;;  %v1881_v4 = vld [vmem:[%s2429_s1 + $0x8] sm:$0xff]   ;;  %vm2038_vm0 = vmmov 0   ;;  %v1883_v6 = vld [vmem:[%s2429_s1 + $0x10] sm:$0xff]   ;;  %v483_v63 = vlaneseq }
  0x3a   : > { %1634 = vmatprep.subr.bf16.mxu0 %v2037_v2  ;;  %1662 = vmatprep.subr.bf16.mxu1 %v2037_v2  ;;  %v1880_v3 = vld [vmem:[%s2429_s1 + $0x40] sm:$0xff]   ;;  %v1882_v5 = vld [vmem:[%s2429_s1 + $0x48] sm:$0xff]   ;;  %v1884_v7 = vld [vmem:[%s2429_s1 + $0x50] sm:$0xff]  }
  0x3b   : > { %1635 = vmatpush3.bf16.msra.mxu0 %v1879_v1  ;;  %1650 = vmatprep.mubr.msk.bf16.mxu0 %vm2038_vm0, %v2037_v2  ;;  %v1885_v8 = vld [vmem:[%s2429_s1 + $0x18] sm:$0xff]   ;;  %v1887_v10 = vld [vmem:[%s2429_s1 + $0x20] sm:$0xff]   ;;  %v1889_v12 = vld [vmem:[%s2429_s1 + $0x28] sm:$0xff]  }
  0x3c   : > { %1663 = vmatpush3.bf16.msra.mxu1 %v1880_v3  ;;  %1636 = vmatprep.subr.bf16.mxu0 %v2037_v2  ;;  %v1886_v9 = vld [vmem:[%s2429_s1 + $0x58] sm:$0xff]   ;;  %v1888_v11 = vld [vmem:[%s2429_s1 + $0x60] sm:$0xff]   ;;  %v2214_v13 = vld [vmem:[%s2158_s17 + $0x8] sm:$0xff]  }
  0x3d   : > { %1664 = vmatprep.subr.bf16.mxu1 %v2037_v2  ;;  %1678 = vmatprep.mubr.msk.bf16.mxu1 %vm2038_vm0, %v2037_v2  ;;  %v344_v14 = vld [vmem:[#allocation2] sm:$0xff]  ;;  %v1890_v15 = vld [vmem:[%s2429_s1 + $0x68] sm:$0xff]   ;;  %v1891_v16 = vld [vmem:[%s2429_s1 + $0x30] sm:$0xff]  }
  0x3e   : > { %357 = vst [vmem:[#allocation2] sm:$0xff] %v2214_v13  ;;  %v1892_v17 = vld [vmem:[%s2429_s1 + $0x70] sm:$0xff]   ;;  %v1893_v18 = vld [vmem:[%s2429_s1 + $0x38] sm:$0xff]   ;;  %v1896_v20 = vld [vmem:[%s2429_s1 + $0x80] sm:$0xff]  }
  0x3f   : > { %1637 = vmatpush3.bf16.msra.mxu0 %v1881_v4  ;;  %v1894_v19 = vld [vmem:[%s2429_s1 + $0x78] sm:$0xff]   ;;  %v1897_v21 = vld [vmem:[%s2429_s1 + $0x88] sm:$0xff]   ;;  %v2250_v22 = vld [vmem:[%s2158_s17] sm:$0xff]  }
  0x40   : > { %1665 = vmatpush3.bf16.msra.mxu1 %v1882_v5  ;;  %1638 = vmatprep.subr.bf16.mxu0 %v2037_v2  ;;  %v1899_v23 = vld [vmem:[%s2429_s1 + $0x90] sm:$0xff]   ;;  %v1900_v24 = vld [vmem:[%s2429_s1 + $0x98] sm:$0xff]   ;;  %v1901_v25 = vld [vmem:[%s2429_s1 + $0xa0] sm:$0xff]  }
  0x41   : > { %1666 = vmatprep.subr.bf16.mxu1 %v2037_v2  ;;  %v1902_v26 = vld [vmem:[%s2429_s1 + $0xa8] sm:$0xff]   ;;  %v1903_v27 = vld [vmem:[%s2429_s1 + $0xb0] sm:$0xff]   ;;  %v1904_v28 = vld [vmem:[%s2429_s1 + $0xb8] sm:$0xff]  }
  0x42   : > { %v1905_v29 = vld [vmem:[#allocation4] sm:$0xff]   ;;  %v1906_v30 = vld [vmem:[#allocation4 + $0x8] sm:$0xff]   ;;  %v1907_v32 = vld [vmem:[#allocation4 + $0x10] sm:$0xff]  }
  0x43   : > { %1639 = vmatpush3.bf16.msra.mxu0 %v1883_v6  ;;  %v1908_v31 = vld [vmem:[#allocation4 + $0x40] sm:$0xff]   ;;  %v1910_v33 = vld [vmem:[#allocation4 + $0x48] sm:$0xff]   ;;  %v1909_v34 = vld [vmem:[#allocation4 + $0x18] sm:$0xff]  }
  0x44   : > { %1667 = vmatpush3.bf16.msra.mxu1 %v1884_v7  ;;  %1640 = vmatprep.subr.bf16.mxu0 %v2037_v2  ;;  %v1911_v35 = vld [vmem:[#allocation4 + $0x20] sm:$0xff]   ;;  %v1912_v36 = vld [vmem:[#allocation4 + $0x50] sm:$0xff]   ;;  %v1913_v37 = vld [vmem:[#allocation4 + $0x28] sm:$0xff]  }
  0x45   : > { %1668 = vmatprep.subr.bf16.mxu1 %v2037_v2  ;;  %v1914_v38 = vld [vmem:[#allocation4 + $0x58] sm:$0xff]   ;;  %v1915_v39 = vld [vmem:[#allocation4 + $0x30] sm:$0xff]   ;;  %v1916_v40 = vld [vmem:[#allocation4 + $0x60] sm:$0xff]  }
  0x46   : > { %v1917_v41 = vld [vmem:[#allocation4 + $0x38] sm:$0xff]   ;;  %v1918_v42 = vld [vmem:[#allocation4 + $0x68] sm:$0xff]   ;;  %v1919_v44 = vld [vmem:[#allocation4 + $0x70] sm:$0xff]  }
  0x47   : > { %1641 = vmatpush3.bf16.msra.mxu0 %v1885_v8  ;;  %v2312_v43 = vld [vmem:[#allocation3] sm:$0xff]  ;;  %v1920_v45 = vld [vmem:[#allocation4 + $0x80] sm:$0xff]   ;;  %v1922_v47 = vld [vmem:[#allocation4 + $0x88] sm:$0xff]   ;;  %v2353_v8 = vshrl.u32 %v483_v63, 7 }
  0x48   : > { %1669 = vmatpush3.bf16.msra.mxu1 %v1886_v9  ;;  %1642 = vmatprep.subr.bf16.mxu0 %v2037_v2  ;;  %v1921_v46 = vld [vmem:[#allocation4 + $0x78] sm:$0xff]   ;;  %v1923_v48 = vld [vmem:[#allocation4 + $0x90] sm:$0xff]   ;;  %v1925_v50 = vld [vmem:[#allocation4 + $0xa0] sm:$0xff]  }
  0x49   : > { %1670 = vmatprep.subr.bf16.mxu1 %v2037_v2  ;;  %v1924_v49 = vld [vmem:[#allocation4 + $0x98] sm:$0xff]   ;;  %v1926_v51 = vld [vmem:[#allocation4 + $0xa8] sm:$0xff]   ;;  %v1927_v52 = vld [vmem:[#allocation4 + $0xb0] sm:$0xff]   ;;  %vm485_vm1 = vcmp.lt.s32.totalorder %v2353_v8, 2  ;;  %vm615_vm2 = vcmp.lt.s32.totalorder %v2353_v8, 1 }
  0x4a   : > { %v1928_v53 = vld [vmem:[%s2433_s5] sm:$0xff]   ;;  %v1930_v54 = vld [vmem:[%s2433_s5 + $0x8] sm:$0xff]   ;;  %v1931_v56 = vld [vmem:[%s2433_s5 + $0x10] sm:$0xff]  }
  0x4b   : > { %1643 = vmatpush3.bf16.msra.mxu0 %v1887_v10  ;;  %v1929_v55 = vld [vmem:[#allocation4 + $0xb8] sm:$0xff]   ;;  %v1932_v57 = vld [vmem:[%s2433_s5 + $0x18] sm:$0xff]   ;;  %v1933_v58 = vld [vmem:[%s2433_s5 + $0x20] sm:$0xff]  }
  0x4c   : > { %1671 = vmatpush3.bf16.msra.mxu1 %v1888_v11  ;;  %1644 = vmatprep.subr.bf16.mxu0 %v2037_v2  ;;  %v1934_v59 = vld [vmem:[%s2433_s5 + $0x28] sm:$0xff]   ;;  %v1935_v60 = vld [vmem:[%s2433_s5 + $0x30] sm:$0xff]   ;;  %v1936_v61 = vld [vmem:[%s2433_s5 + $0x38] sm:$0xff]  }
  0x4d   : > { %1672 = vmatprep.subr.bf16.mxu1 %v2037_v2 }
  0x4f   : > { %1645 = vmatpush3.bf16.msra.mxu0 %v1889_v12 }
  0x50   : > { %1673 = vmatpush3.bf16.msra.mxu1 %v1890_v15  ;;  %1646 = vmatprep.subr.bf16.mxu0 %v2037_v2 }
  0x51   : > { %1674 = vmatprep.subr.bf16.mxu1 %v2037_v2 }
  0x53   : > { %1647 = vmatpush3.bf16.msra.mxu0 %v1891_v16 }
  0x54   : > { %1675 = vmatpush3.bf16.msra.mxu1 %v1892_v17  ;;  %1648 = vmatprep.subr.bf16.mxu0 %v2037_v2 }
  0x55   : > { %1676 = vmatprep.subr.bf16.mxu1 %v2037_v2 }
  0x57   : > { %1649 = vmatpush3.bf16.msra.mxu0 %v1893_v18 }
  0x58   : > { %1677 = vmatpush3.bf16.msra.mxu1 %v1894_v19  ;;  %1690 = vmatprep.subr.bf16.mxu0 %v2037_v2 }
  0x59   : > { %1718 = vmatprep.subr.bf16.mxu1 %v2037_v2 }
  0x5a   : > { %1651 = vmatmul.mubr.bf16.vlgmr.msra.gmra.mrb[0].mxu0 %v344_v14 }
  0x5b   : > { %1679 = vmatmul.mubr.bf16.vlgmr.msra.gmra.mrb[0].mxu1 %v344_v14  ;;  %1691 = vmatpush3.bf16.msra.mxu0 %v1896_v20 }
  0x5c   : > { %1692 = vmatprep.subr.bf16.mxu0 %v2037_v2  ;;  %1654 = vmatprep.mubr.msk.bf16.mxu0 %vm2038_vm0, %v2037_v2 }
  0x5d   : > { %1682 = vmatprep.mubr.msk.bf16.mxu1 %vm2038_vm0, %v2037_v2  ;;  %1719 = vmatpush3.bf16.msra.mxu1 %v1905_v29 }
  0x5e   : > { %1720 = vmatprep.subr.bf16.mxu1 %v2037_v2 }
  0x5f   : > { %1693 = vmatpush3.bf16.msra.mxu0 %v1897_v21 }
  0x60   : > { %1694 = vmatprep.subr.bf16.mxu0 %v2037_v2 }
  0x61   : > { %1721 = vmatpush3.bf16.msra.mxu1 %v1906_v30 }
  0x62   : > { %1655 = vmatmul.mubr.bf16.gmra.mrb[4].mxu0 %v2250_v22  ;;  %1722 = vmatprep.subr.bf16.mxu1 %v2037_v2 }
  0x63   : > { %1683 = vmatmul.mubr.bf16.gmra.mrb[4].mxu1 %v2250_v22  ;;  %1695 = vmatpush3.bf16.msra.mxu0 %v1899_v23 }
  0x64   : > { %1696 = vmatprep.subr.bf16.mxu0 %v2037_v2  ;;  %1658 = vmatprep.mubr.msk.bf16.mxu0 %vm2038_vm0, %v2037_v2 }
  0x65   : > { %1686 = vmatprep.mubr.msk.bf16.mxu1 %vm2038_vm0, %v2037_v2  ;;  %1723 = vmatpush3.bf16.msra.mxu1 %v1907_v32 }
  0x66   : > { %1724 = vmatprep.subr.bf16.mxu1 %v2037_v2 }
  0x67   : > { %1697 = vmatpush3.bf16.msra.mxu0 %v1900_v24 }
  0x68   : > { %1698 = vmatprep.subr.bf16.mxu0 %v2037_v2 }
  0x69   : > { %1725 = vmatpush3.bf16.msra.mxu1 %v1909_v34 }
  0x6a   : > { %1659 = vmatmul.mubr.bf16.gmra.mrb[8].mxu0 %v2214_v13  ;;  %1726 = vmatprep.subr.bf16.mxu1 %v2037_v2 }
  0x6b   : > { %1687 = vmatmul.mubr.bf16.gmra.mrb[8].mxu1 %v2214_v13  ;;  %1699 = vmatpush3.bf16.msra.mxu0 %v1901_v25 }
  0x6c   : > { %1700 = vmatprep.subr.bf16.mxu0 %v2037_v2  ;;  %1706 = vmatprep.mubr.msk.bf16.mxu0 %vm2038_vm0, %v2037_v2 }
  0x6d   : > { %1734 = vmatprep.mubr.msk.bf16.mxu1 %vm2038_vm0, %v2037_v2  ;;  %1727 = vmatpush3.bf16.msra.mxu1 %v1911_v35 }
  0x6e   : > { %1728 = vmatprep.subr.bf16.mxu1 %v2037_v2 }
  0x6f   : > { %1701 = vmatpush3.bf16.msra.mxu0 %v1902_v26 }
  0x70   : > { %1702 = vmatprep.subr.bf16.mxu0 %v2037_v2 }
  0x71   : > { %1729 = vmatpush3.bf16.msra.mxu1 %v1913_v37 }
  0x72   : > { %1730 = vmatprep.subr.bf16.mxu1 %v2037_v2 }
  0x73   : > { %1703 = vmatpush3.bf16.msra.mxu0 %v1903_v27 }
  0x74   : > { %1704 = vmatprep.subr.bf16.mxu0 %v2037_v2 }
  0x75   : > { %1731 = vmatpush3.bf16.msra.mxu1 %v1915_v39 }
  0x76   : > { %1732 = vmatprep.subr.bf16.mxu1 %v2037_v2 }
  0x77   : > { %1705 = vmatpush3.bf16.msra.mxu0 %v1904_v28 }
  0x78   : > { %1746 = vmatprep.subr.bf16.mxu0 %v2037_v2 }
  0x79   : > { %1733 = vmatpush3.bf16.msra.mxu1 %v1917_v41 }
  0x7a   : > { %1707 = vmatmul.mubr.bf16.vlgmr.msra.gmra.mrb[12].mxu0 %v344_v14  ;;  %1774 = vmatprep.subr.bf16.mxu1 %v2037_v2 }
  0x7b   : > { %1710 = vmatprep.mubr.msk.bf16.mxu0 %vm2038_vm0, %v2037_v2  ;;  %1747 = vmatpush3.bf16.msra.mxu0 %v1908_v31 }
  0x7c   : > { %1748 = vmatprep.subr.bf16.mxu0 %v2037_v2  ;;  %1735 = vmatmul.mubr.bf16.vlgmr.msra.gmra.mrb[12].mxu1 %v2312_v43 }
  0x7d   : > { %1738 = vmatprep.mubr.msk.bf16.mxu1 %vm2038_vm0, %v2037_v2  ;;  %1775 = vmatpush3.bf16.msra.mxu1 %v1920_v45 }
  0x7e   : > { %1776 = vmatprep.subr.bf16.mxu1 %v2037_v2 }
  0x7f   : > { %1749 = vmatpush3.bf16.msra.mxu0 %v1910_v33 }
  0x80   : > { %1750 = vmatprep.subr.bf16.mxu0 %v2037_v2 }
  0x81   : > { %1777 = vmatpush3.bf16.msra.mxu1 %v1922_v47 }
  0x82   : > { %1711 = vmatmul.mubr.bf16.gmra.mrb[16].mxu0 %v2250_v22  ;;  %1778 = vmatprep.subr.bf16.mxu1 %v2037_v2 }
  0x83   : > { %1714 = vmatprep.mubr.msk.bf16.mxu0 %vm2038_vm0, %v2037_v2  ;;  %1751 = vmatpush3.bf16.msra.mxu0 %v1912_v36 }
  0x84   : > { %1752 = vmatprep.subr.bf16.mxu0 %v2037_v2 }
  0x85   : > { %1779 = vmatpush3.bf16.msra.mxu1 %v1923_v48 }
  0x86   : > { %1780 = vmatprep.subr.bf16.mxu1 %v2037_v2 }
  0x87   : > { %1753 = vmatpush3.bf16.msra.mxu0 %v1914_v38 }
  0x88   : > { %1754 = vmatprep.subr.bf16.mxu0 %v2037_v2 }
  0x89   : > { %1781 = vmatpush3.bf16.msra.mxu1 %v1924_v49 }
  0x8a   : > { %1715 = vmatmul.mubr.bf16.gmra.mrb[20].mxu0 %v2214_v13  ;;  %1782 = vmatprep.subr.bf16.mxu1 %v2037_v2 }
  0x8b   : > { %1762 = vmatprep.mubr.msk.bf16.mxu0 %vm2038_vm0, %v2037_v2  ;;  %1755 = vmatpush3.bf16.msra.mxu0 %v1916_v40 }
  0x8c   : > { %1756 = vmatprep.subr.bf16.mxu0 %v2037_v2 }
  0x8d   : > { %1783 = vmatpush3.bf16.msra.mxu1 %v1925_v50 }
  0x8e   : > { %1784 = vmatprep.subr.bf16.mxu1 %v2037_v2 }
  0x8f   : > { %1757 = vmatpush3.bf16.msra.mxu0 %v1918_v42 }
  0x90   : > { %1758 = vmatprep.subr.bf16.mxu0 %v2037_v2 }
  0x91   : > { %1785 = vmatpush3.bf16.msra.mxu1 %v1926_v51 }
  0x92   : > { %1786 = vmatprep.subr.bf16.mxu1 %v2037_v2 }
  0x93   : > { %1759 = vmatpush3.bf16.msra.mxu0 %v1919_v44 }
  0x94   : > { %1760 = vmatprep.subr.bf16.mxu0 %v2037_v2 }
  0x95   : > { %1787 = vmatpush3.bf16.msra.mxu1 %v1927_v52 }
  0x96   : > { %1788 = vmatprep.subr.bf16.mxu1 %v2037_v2 }
  0x97   : > { %1761 = vmatpush3.bf16.msra.mxu0 %v1921_v46 }
  0x98   : > { %1802 = vmatprep.subr.bf16.mxu0 %v1928_v53 }
  0x99   : > { %1789 = vmatpush3.bf16.msra.mxu1 %v1929_v55  ;;  %v1502_v55 = vld [vmem:[%s2430_s2] ss:$0 sm:$0xff] }
  0x9a   : > { %1763 = vmatmul.mubr.bf16.vlgmr.msra.gmra.mrb[24].mxu0 %v2312_v43 }
  0x9b   : > { %1766 = vmatprep.mubr.msk.bf16.mxu0 %vm2038_vm0, %v2037_v2  ;;  %1803 = vmatpush3.bf16.msra.mxu0 %v1928_v53 }
  0x9c   : > { %1804 = vmatprep.subr.bf16.mxu0 %v1930_v54 }
  0x9f   : > { %1805 = vmatpush3.bf16.msra.mxu0 %v1930_v54 }
  0xa0   : > { %1806 = vmatprep.subr.bf16.mxu0 %v1931_v56 }
  0xa3   : > { %1807 = vmatpush3.bf16.msra.mxu0 %v1931_v56 }
  0xa4   : > { %1808 = vmatprep.subr.bf16.mxu0 %v1932_v57 }
  0xa7   : > { %1809 = vmatpush3.bf16.msra.mxu0 %v1932_v57 }
  0xa8   : > { %1810 = vmatprep.subr.bf16.mxu0 %v1933_v58 }
  0xab   : > { %1811 = vmatpush3.bf16.msra.mxu0 %v1933_v58 }
  0xac   : > { %1812 = vmatprep.subr.bf16.mxu0 %v1934_v59 }
  0xaf   : > { %1813 = vmatpush3.bf16.msra.mxu0 %v1934_v59 }
  0xb0   : > { %1814 = vmatprep.subr.bf16.mxu0 %v1935_v60 }
  0xb3   : > { %1815 = vmatpush3.bf16.msra.mxu0 %v1935_v60 }
  0xb4   : > { %1816 = vmatprep.subr.bf16.mxu0 %v1936_v61 }
  0xb7   : > { %1817 = vmatpush3.bf16.msra.mxu0 %v1936_v61 }
 0x12d   : > { %v456_v62 = vpop.f32.mrb[0].mxu0 }
 0x12e   : > { %v1652_v0 = vpop.f32.mrb[1].mxu0  ;;  %v588_v1 = vpop.f32.mrb[0].mxu1 }
 0x12f   : > { %v458_v3 = vpop.f32.mrb[2].mxu0  ;;  %v1680_v4 = vpop.f32.mrb[1].mxu1 }
 0x130   : > { %v1653_v5 = vpop.f32.mrb[3].mxu0  ;;  %v590_v6 = vpop.f32.mrb[2].mxu1  ;;  %v478_v11 = vrot.slane %v458_v3, 6 }
 0x131   : > { %v1681_v7 = vpop.f32.mrb[3].mxu1  ;;  %v610_v9 = vrot.slane %v590_v6, 7 }
 0x135   : > { %v463_v10 = vpop.f32.mrb[4].mxu0 }
 0x136   : > { %v479_v12 = vrot.slane %v463_v10, 6  ;;  %v595_v14 = vpop.f32.mrb[4].mxu1  ;;  %v1656_v15 = vpop.f32.mrb[5].mxu0 }
 0x137   : > { %v611_v16 = vrot.slane %v595_v14, 7  ;;  %v1684_v17 = vpop.f32.mrb[5].mxu1  ;;  %v466_v18 = vpop.f32.mrb[6].mxu0 }
 0x138   : > { %v480_v19 = vrot.slane %v466_v18, 6  ;;  %v598_v20 = vpop.f32.mrb[6].mxu1  ;;  %v1657_v21 = vpop.f32.mrb[7].mxu0  ;;  %v489_v23 = vsel %vm485_vm1, %v478_v11, %v479_v12 }
 0x139   : > { %v612_v24 = vrot.slane %v598_v20, 7  ;;  %v1685_v25 = vpop.f32.mrb[7].mxu1  ;;  %v619_v26 = vsel %vm615_vm2, %v610_v9, %v611_v16 }
 0x13a   : > { %v620_v27 = vadd.f32 %v619_v26, %v489_v23  ;;  %v488_v28 = vsel %vm485_vm1, %v479_v12, %v480_v19 }
 0x13b   : > { %v618_v29 = vsel %vm615_vm2, %v611_v16, %v612_v24 }
 0x13c   : > { %v621_v30 = vadd.f32 %v618_v29, %v488_v28 }
 0x13d   : > { %v471_v31 = vpop.f32.mrb[8].mxu0 }
 0x13e   : > { %v481_v32 = vrot.slane %v471_v31, 6  ;;  %v603_v33 = vpop.f32.mrb[8].mxu1  ;;  %v1660_v34 = vpop.f32.mrb[9].mxu0 }
 0x13f   : > { %v613_v35 = vrot.slane %v603_v33, 7  ;;  %v474_v36 = vpop.f32.mrb[10].mxu0  ;;  %v1688_v37 = vpop.f32.mrb[9].mxu1 }
 0x140   : > { %v482_v38 = vrot.slane %v474_v36, 6  ;;  %v1661_v39 = vpop.f32.mrb[11].mxu0  ;;  %v606_v40 = vpop.f32.mrb[10].mxu1  ;;  %v487_v41 = vsel %vm485_vm1, %v480_v19, %v481_v32 }
 0x141   : > { %v614_v42 = vrot.slane %v606_v40, 7  ;;  %v1689_v44 = vpop.f32.mrb[11].mxu1  ;;  %v617_v45 = vsel %vm615_vm2, %v612_v24, %v613_v35 }
 0x142   : > { %v622_v46 = vadd.f32 %v617_v45, %v487_v41  ;;  %v486_v47 = vsel %vm485_vm1, %v481_v32, %v482_v38 }
 0x143   : > { %v616_v48 = vsel %vm615_vm2, %v613_v35, %v614_v42 }
 0x144   : > { %v623_v49 = vadd.f32 %v616_v48, %v486_v47 }
 0x14d   : > { %v722_v50 = vpop.f32.mrb[12].mxu0 }
 0x14e   : > { %v1708_v51 = vpop.f32.mrb[13].mxu0 }
 0x14f   : > { %v724_v52 = vpop.f32.mrb[14].mxu0  ;;  %v880_v33 = vpop.f32.mrb[12].mxu1 }
 0x150   : > { %v1709_v53 = vpop.f32.mrb[15].mxu0  ;;  %v1736_v34 = vpop.f32.mrb[13].mxu1 }
 0x151   : > { %v882_v35 = vpop.f32.mrb[14].mxu1 }
 0x152   : > { %v1737_v36 = vpop.f32.mrb[15].mxu1 }
 0x155   : > { %v728_v54 = vpop.f32.mrb[16].mxu0 }
 0x156   : > { %v743_v56 = vadd.f32 %v728_v54, %v620_v27  ;;  %v1712_v57 = vpop.f32.mrb[17].mxu0 }
 0x157   : > { %v731_v58 = vpop.f32.mrb[18].mxu0 }
 0x158   : > { %v754_v59 = vadd.f32 %v1502_v55, %v743_v56  ;;  %v744_v60 = vadd.f32 %v731_v58, %v621_v30  ;;  %v1713_v61 = vpop.f32.mrb[19].mxu0 }
 0x15a   : > { %v762_v62 = vmul.f32 0.70710677, %v754_v59  ;;  %v755_v63 = vadd.f32 %v1502_v55, %v744_v60  ;;  %v758_v17 = vmul.f32 0.5, %v754_v59 }
 0x15c   : > { %1937 = verf.f32 %v762_v62  ;;  %v763_v0 = vmul.f32 0.70710677, %v755_v63  ;;  %v759_v18 = vmul.f32 0.5, %v755_v63 }
 0x15d   : > { %v736_v1 = vpop.f32.mrb[20].mxu0 }
 0x15e   : > { %1939 = verf.f32 %v763_v0  ;;  %v745_v3 = vadd.f32 %v736_v1, %v622_v46  ;;  %v1716_v4 = vpop.f32.mrb[21].mxu0 }
 0x15f   : > { %v739_v5 = vpop.f32.mrb[22].mxu0 }
 0x160   : > { %v756_v6 = vadd.f32 %v1502_v55, %v745_v3  ;;  %v746_v7 = vadd.f32 %v739_v5, %v623_v49  ;;  %v1717_v9 = vpop.f32.mrb[23].mxu0 }
 0x162   : > { %v764_v10 = vmul.f32 0.70710677, %v756_v6  ;;  %v757_v11 = vadd.f32 %v1502_v55, %v746_v7  ;;  %v760_v27 = vmul.f32 0.5, %v756_v6 }
 0x164   : > { %1941 = verf.f32 %v764_v10  ;;  %v765_v12 = vmul.f32 0.70710677, %v757_v11  ;;  %v761_v28 = vmul.f32 0.5, %v757_v11 }
 0x166   : > { %v1938_v14 = vpop.eup %1937  ;;  %1943 = verf.f32 %v765_v12 }
 0x167   : > { %v770_v15 = vadd.f32 1.0, %v1938_v14 }
 0x168   : > { %v1940_v16 = vpop.eup %1939 }
 0x169   : > { %v771_v19 = vadd.f32 1.0, %v1940_v16  ;;  %v774_v20 = vmul.f32 %v770_v15, %v758_v17 }
 0x16b   : > { %v775_v21 = vmul.f32 %v771_v19, %v759_v18 }
 0x16d   : > { %v778_v23 = vpack.c.bf16 %v775_v21, %v774_v20  ;;  %v1009_v37 = vpop.f32.mrb[24].mxu0 }
 0x16e   : > { %v1942_v24 = vpop.eup %1941  ;;  %v1764_v38 = vpop.f32.mrb[25].mxu0 }
 0x16f   : > { %v772_v25 = vadd.f32 1.0, %v1942_v24  ;;  %1739 = vmatmul.mubr.bf16.gmra.mrb[16].mxu1 %v778_v23  ;;  %1767 = vmatmul.mubr.bf16.gmra.mrb[28].mxu0 %v778_v23  ;;  %v1011_v39 = vpop.f32.mrb[26].mxu0 }
 0x170   : > { %v1944_v26 = vpop.eup %1943  ;;  %1742 = vmatprep.mubr.msk.bf16.mxu1 %vm2038_vm0, %v2037_v2  ;;  %1770 = vmatprep.mubr.msk.bf16.mxu0 %vm2038_vm0, %v2037_v2  ;;  %v1031_v40 = vrot.slane %v1011_v39, 7 }
 0x171   : > { %v773_v29 = vadd.f32 1.0, %v1944_v26  ;;  %v776_v30 = vmul.f32 %v772_v25, %v760_v27  ;;  %v1527_v25 = vld [vmem:[%s2432_s4] ss:$0 sm:$0xff] }
 0x173   : > { %v777_v31 = vmul.f32 %v773_v29, %v761_v28 }
 0x175   : > { %v779_v32 = vpack.c.bf16 %v777_v31, %v776_v30 }
 0x177   : > { %781 = vst [vmem:[#allocation3] sm:$0xff] %v779_v32  ;;  %1743 = vmatmul.mubr.bf16.gmra.mrb[20].mxu1 %v779_v32  ;;  %1771 = vmatmul.mubr.bf16.gmra.mrb[32].mxu0 %v779_v32 }
 0x178   : > { %1790 = vmatprep.mubr.msk.bf16.mxu1 %vm2038_vm0, %v2037_v2  ;;  %1818 = vmatprep.mubr.bf16.mxu0 %v2250_v22  ;;  %v1765_v22 = vpop.f32.mrb[27].mxu0 }
 0x17f   : > { %1791 = vmatmul.mubr.bf16.vlgmr.msra.gmra.mrb[24].mxu1 %v2312_v43  ;;  %1819 = vmatmul.mubr.bf16.vlgmr.msra.gmra.mrb[36].mxu0 %v2214_v13  ;;  %v902_v13 = vrot.slane %v882_v35, 6 }
 0x180   : > { %1794 = vmatprep.mubr.msk.bf16.mxu1 %vm2038_vm0, %v2037_v2 }
 0x187   : > { %1795 = vmatmul.mubr.bf16.gmra.mrb[28].mxu1 %v778_v23 }
 0x188   : > { %1798 = vmatprep.mubr.msk.bf16.mxu1 %vm2038_vm0, %v2037_v2 }
 0x18f   : > { %1799 = vmatmul.mubr.bf16.gmra.mrb[32].mxu1 %v779_v32 }
 0x242   : > { %v887_v43 = vpop.f32.mrb[16].mxu1  ;;  %v1016_v41 = vpop.f32.mrb[28].mxu0 }
 0x243   : > { %v903_v42 = vrot.slane %v887_v43, 6  ;;  %v1032_v44 = vrot.slane %v1016_v41, 7  ;;  %v1740_v45 = vpop.f32.mrb[17].mxu1  ;;  %v1768_v46 = vpop.f32.mrb[29].mxu0 }
 0x244   : > { %v890_v47 = vpop.f32.mrb[18].mxu1  ;;  %v1019_v48 = vpop.f32.mrb[30].mxu0 }
 0x245   : > { %v904_v2 = vrot.slane %v890_v47, 6  ;;  %v1033_v49 = vrot.slane %v1019_v48, 7  ;;  %v1741_v50 = vpop.f32.mrb[19].mxu1  ;;  %v1769_v51 = vpop.f32.mrb[31].mxu0  ;;  %v910_v52 = vsel %vm485_vm1, %v902_v13, %v903_v42  ;;  %v1039_v53 = vsel %vm615_vm2, %v1031_v40, %v1032_v44  ;;  %v1528_v13 = vld [vmem:[%s2434_s6] ss:$0 sm:$0xff] }
 0x246   : > { %v1040_v54 = vadd.f32 %v1039_v53, %v910_v52 }
 0x247   : > { %v909_v55 = vsel %vm485_vm1, %v903_v42, %v904_v2  ;;  %v1038_v56 = vsel %vm615_vm2, %v1032_v44, %v1033_v49 }
 0x248   : > { %v1041_v57 = vadd.f32 %v1038_v56, %v909_v55 }
 0x24a   : > { %v895_v58 = vpop.f32.mrb[20].mxu1  ;;  %v1024_v59 = vpop.f32.mrb[32].mxu0 }
 0x24b   : > { %v905_v60 = vrot.slane %v895_v58, 6  ;;  %v1034_v61 = vrot.slane %v1024_v59, 7  ;;  %v1744_v62 = vpop.f32.mrb[21].mxu1  ;;  %v1772_v63 = vpop.f32.mrb[33].mxu0 }
 0x24c   : > { %v898_v0 = vpop.f32.mrb[22].mxu1  ;;  %v1027_v1 = vpop.f32.mrb[34].mxu0 }
 0x24d   : > { %v906_v3 = vrot.slane %v898_v0, 6  ;;  %v1035_v4 = vrot.slane %v1027_v1, 7  ;;  %v1745_v5 = vpop.f32.mrb[23].mxu1  ;;  %v1773_v6 = vpop.f32.mrb[35].mxu0  ;;  %v908_v7 = vsel %vm485_vm1, %v904_v2, %v905_v60  ;;  %v1037_v9 = vsel %vm615_vm2, %v1033_v49, %v1034_v61 }
 0x24e   : > { %v1042_v10 = vadd.f32 %v1037_v9, %v908_v7 }
 0x24f   : > { %v907_v11 = vsel %vm485_vm1, %v905_v60, %v906_v3  ;;  %v1036_v12 = vsel %vm615_vm2, %v1034_v61, %v1035_v4 }
 0x250   : > { %v1043_v14 = vadd.f32 %v1036_v12, %v907_v11 }
 0x252   : > { %v1142_v15 = vpop.f32.mrb[24].mxu1  ;;  %v1820_v16 = vpop.f32.mrb[36].mxu0 }
 0x253   : > { %v1792_v17 = vpop.f32.mrb[25].mxu1  ;;  %v1303_v18 = vpop.f32.mrb[37].mxu0  ;;  %v1312_v56 = vadd.f32 %v1820_v16, %v1528_v13 }
 0x254   : > { %v1144_v19 = vpop.f32.mrb[26].mxu1  ;;  %v1821_v20 = vpop.f32.mrb[38].mxu0  ;;  %v1304_v46 = vadd.f32 %v1528_v13, %v1303_v18 }
 0x255   : > { %v1793_v21 = vpop.f32.mrb[27].mxu1  ;;  %v1306_v23 = vpop.f32.mrb[39].mxu0  ;;  %v1315_v3 = vadd.f32 %v1821_v20, %v1528_v13 }
 0x256   : > { %v1307_v50 = vadd.f32 %v1528_v13, %v1306_v23 }
 0x25a   : > { %v1148_v24 = vpop.f32.mrb[28].mxu1 }
 0x25b   : > { %v1163_v26 = vadd.f32 %v1148_v24, %v1040_v54  ;;  %v1796_v27 = vpop.f32.mrb[29].mxu1 }
 0x25c   : > { %v1151_v28 = vpop.f32.mrb[30].mxu1 }
 0x25d   : > { %v1174_v29 = vadd.f32 %v1527_v25, %v1163_v26  ;;  %v1164_v8 = vadd.f32 %v1151_v28, %v1041_v57  ;;  %v1797_v30 = vpop.f32.mrb[31].mxu1 }
 0x25f   : > { %v1182_v31 = vmul.f32 0.70710677, %v1174_v29  ;;  %v1175_v32 = vadd.f32 %v1527_v25, %v1164_v8  ;;  %v1178_v44 = vmul.f32 0.5, %v1174_v29 }
 0x261   : > { %1945 = verf.f32 %v1182_v31  ;;  %v1183_v33 = vmul.f32 0.70710677, %v1175_v32  ;;  %v1179_v48 = vmul.f32 0.5, %v1175_v32 }
 0x262   : > { %v1156_v34 = vpop.f32.mrb[32].mxu1 }
 0x263   : > { %1947 = verf.f32 %v1183_v33  ;;  %v1165_v35 = vadd.f32 %v1156_v34, %v1042_v10  ;;  %v1800_v36 = vpop.f32.mrb[33].mxu1 }
 0x264   : > { %v1159_v37 = vpop.f32.mrb[34].mxu1 }
 0x265   : > { %v1176_v38 = vadd.f32 %v1527_v25, %v1165_v35  ;;  %v1166_v39 = vadd.f32 %v1159_v37, %v1043_v14  ;;  %v1801_v22 = vpop.f32.mrb[35].mxu1 }
 0x267   : > { %v1184_v40 = vmul.f32 0.70710677, %v1176_v38  ;;  %v1177_v43 = vadd.f32 %v1527_v25, %v1166_v39  ;;  %v1180_v57 = vmul.f32 0.5, %v1176_v38 }
 0x269   : > { %1949 = verf.f32 %v1184_v40  ;;  %v1185_v41 = vmul.f32 0.70710677, %v1177_v43  ;;  %v1181_v61 = vmul.f32 0.5, %v1177_v43 }
 0x26b   : > { %v1946_v42 = vpop.eup %1945  ;;  %1951 = verf.f32 %v1185_v41 }
 0x26c   : > { %v1190_v45 = vadd.f32 1.0, %v1946_v42 }
 0x26d   : > { %v1948_v47 = vpop.eup %1947 }
 0x26e   : > { %v1194_v2 = vmul.f32 %v1190_v45, %v1178_v44  ;;  %v1191_v49 = vadd.f32 1.0, %v1948_v47 }
 0x270   : > { %v1318_v51 = vadd.f32 %v1304_v46, %v1194_v2  ;;  %v1195_v52 = vmul.f32 %v1191_v49, %v1179_v48 }
 0x272   : > { %v1326_v53 = vmul.f32 0.70710677, %v1318_v51  ;;  %v1319_v54 = vadd.f32 %v1307_v50, %v1195_v52  ;;  %v1322_v11 = vmul.f32 0.5, %v1318_v51 }
 0x273   : > { %v1950_v55 = vpop.eup %1949 }
 0x274   : > { %v1192_v58 = vadd.f32 1.0, %v1950_v55  ;;  %1953 = verf.f32 %v1326_v53  ;;  %v1327_v59 = vmul.f32 0.70710677, %v1319_v54  ;;  %v1323_v12 = vmul.f32 0.5, %v1319_v54 }
 0x275   : > { %v1952_v60 = vpop.eup %1951 }
 0x276   : > { %v1196_v62 = vmul.f32 %v1192_v58, %v1180_v57  ;;  %v1193_v63 = vadd.f32 1.0, %v1952_v60  ;;  %1955 = verf.f32 %v1327_v59 }
 0x278   : > { %v1320_v0 = vadd.f32 %v1312_v56, %v1196_v62  ;;  %v1197_v1 = vmul.f32 %v1193_v63, %v1181_v61 }
 0x27a   : > { %v1328_v4 = vmul.f32 0.70710677, %v1320_v0  ;;  %v1321_v5 = vadd.f32 %v1315_v3, %v1197_v1  ;;  %v1324_v21 = vmul.f32 0.5, %v1320_v0 }
 0x27c   : > { %1957 = verf.f32 %v1328_v4  ;;  %v1329_v6 = vmul.f32 0.70710677, %v1321_v5  ;;  %v1325_v23 = vmul.f32 0.5, %v1321_v5 }
 0x27e   : > { %v1954_v7 = vpop.eup %1953  ;;  %1959 = verf.f32 %v1329_v6 }
 0x27f   : > { %v1334_v9 = vadd.f32 1.0, %v1954_v7 }
 0x280   : > { %v1956_v10 = vpop.eup %1955 }
 0x281   : > { %v1335_v14 = vadd.f32 1.0, %v1956_v10  ;;  %v1338_v15 = vmul.f32 %v1334_v9, %v1322_v11 }
 0x283   : > { %v1339_v16 = vmul.f32 %v1335_v14, %v1323_v12 }
 0x285   : > { %v1550_v17 = vpack.c.bf16 %v1339_v16, %v1338_v15 }
 0x286   : > { %v1958_v18 = vpop.eup %1957 }
 0x287   : > { %v1336_v19 = vadd.f32 1.0, %v1958_v18  ;;  %1551 = vst [vmem:[%s2163_s10] sm:$0xff] %v1550_v17  }
 0x288   : > { %v1960_v20 = vpop.eup %1959 }
 0x289   : > { %v1337_v24 = vadd.f32 1.0, %v1960_v20  ;;  %v1340_v25 = vmul.f32 %v1336_v19, %v1324_v21 }
 0x28b   : > { %v1341_v26 = vmul.f32 %v1337_v24, %v1325_v23 }
 0x28d   : > { %v1555_v27 = vpack.c.bf16 %v1341_v26, %v1340_v25 }
 0x28f   : > { %1557 = vst [vmem:[%s2163_s10 + $0x8] sm:$0xff] %v1555_v27  }
 0x290 PF: > { %s18_s28 = sadd.s32 1, %s2031_s28   ;;  %s2444_s24 = smov %s2023_s26 }
 0x291   : > { %p15_p9 = scmp.ge.s32.totalorder %s18_s28, 8   ;;  %s2445_s25 = smov %s2027_s27 }
 0x292   : > { %s2446_s26 = smov %s2449_s30  ;;  %s2447_s27 = smov %s2453_s8 }
 0x293   :  { %17 = sbr.rel (!%p15_p9) target bundleno = 3 (0x3), region = 87 }
 0x29a   :  { %1392 = vsyncpa [#allocation5], 1 }
 0x29b   :  { %1394 = vsyncpa [#allocation5 + $0x1], 1 }

// kernel: temporal_conv_net_forward.7
= control target key start
LH: loop header
LB: loop body
LE: loop exit
PB: predicated region body
PF: predicated region fallthrough
CT: control target
= control target key end

     0   :  { %s1981_s24 = smov 0   ;;  %s1983_s25 = smov 0   ;;  %s2338_s0 = inlined_call_operand.vmem [shape: bf16[2,96,128], index: 0, kind: input, shape index: {}]   ;;  %s2339_s1 = inlined_call_operand.vmem [shape: bf16[384,128], index: 1, kind: input, shape index: {}]   ;;  %s2340_s2 = inlined_call_operand.vmem [shape: f32[1,128], index: 2, kind: input, shape index: {}]   ;;  %s2341_s3 = inlined_call_operand.vmem [shape: bf16[384,128], index: 3, kind: input, shape index: {}]   ;;  %s2342_s4 = inlined_call_operand.vmem [shape: f32[1,128], index: 4, kind: input, shape index: {}]   ;;  %s2343_s5 = inlined_call_operand.vmem [shape: bf16[128,128], index: 5, kind: input, shape index: {}]   ;;  %s2344_s6 = inlined_call_operand.vmem [shape: f32[1,128], index: 6, kind: input, shape index: {}]   ;;  %s2345_s7 = inlined_call_operand.vmem [shape: bf16[2,96,128], index: 7, kind: output, shape index: {}]  }
   0x1   :  { %s1985_s26 = smov 0   ;;  %s1987_s27 = smov 0  }
   0x2   :  { %s1989_s28 = smov 0  }
   0x3 LB: > { %s26_s29 = sadd.s32 1, %s1928_s26  ;;  %s29_s30 = sadd.s32 1, %s1932_s27  ;;  %s1936_s28 = sphi %s1989_s28, %s17_s28   ;;  %s1932_s27 = sphi %s1987_s27, %s2349_s27   ;;  %s1928_s26 = sphi %s1985_s26, %s2348_s26   ;;  %s1924_s25 = sphi %s1983_s25, %s2347_s25   ;;  %s1920_s24 = sphi %s1981_s24, %s2346_s24  }
   0x4   : > { %p27_p0 = scmp.ge.s32.totalorder %s26_s29, 3  ;;  %p1420_p1 = scmp.ge.s32.totalorder %s1936_s28, 1 }
   0x5   : > { %p258_p2 = scmp.lt.s32.totalorder %s1936_s28, 7 }
   0x6   : > { %s2351_s29 = smov (%p27_p0, %s26_s29), 0  ;;  %s2353_s30 = smov (!%p27_p0, %s29_s30), %s1932_s27 }
   0x7   : > { %p259_p3 = pnand %p1420_p1, %p258_p2  ;;  %p31_p4 = scmp.ge.s32.totalorder %s2353_s30, 2 }
   0x8   : > { %s1421_s8 = sshll.u32 (!%p259_p3), %s1920_s24, 2  ;;  %p299_p5 = scmp.lt.s32.totalorder (!%p259_p3), %s1924_s25, 1 }
   0x9   : > { %s2355_s30 = smov (%p31_p4, %s2353_s30), 0  ;;  %262 = sbr.rel (%p259_p3) target bundleno = 624 (0x270), region = 48 }
   0xa   : > { %p301_p6 = scmp.lt.s32.totalorder (!%p259_p3), %s1421_s8, 11  ;;  %p1425_p7 = scmp.ne.s32.totalorder (!%p259_p3), %s1920_s24, 0 }
  0x10   : > { %s2357_s25 = smov (!%p299_p5, %s1924_s25), 1  ;;  %s2359_s8 = smov (!%p301_p6, %s1421_s8), 11 }
  0x11   : > { %s1772_s9 = smul.u32 12, %s2357_s25  ;;  %v1938_v0 = vmov (!%p1425_p7), 0  }
  0x12   : > { %322 = sbr.rel (%p1425_p7) target bundleno = 25 (0x19), region = 52  ;;  %323 = vst [vmem:[#allocation2] sm:$0xff] (!%p1425_p7), %v1938_v0  ;;  %324 = vst [vmem:[#allocation3] sm:$0xff] (!%p1425_p7), %v1938_v0 }
  0x13   : > { %s304_s10 = sadd.s32 %s1772_s9, %s2359_s8 }
  0x14   : > { %s1422_s11 = sshll.u32 %s304_s10, 2 }
  0x15   : > { %s2014_s14 = scalar_lea.vmem %s2338_s0, %s1422_s11  ;;  %s2019_s17 = scalar_lea.vmem %s2345_s7, %s1422_s11 }
  0x19 PF: > { %v1816_v1 = vld [vmem:[%s2339_s1] sm:$0xff]   ;;  %v1939_v2 = vmov 0.0   ;;  %v1818_v4 = vld [vmem:[%s2339_s1 + $0x8] sm:$0xff]   ;;  %vm1940_vm0 = vmmov 0   ;;  %v1820_v6 = vld [vmem:[%s2339_s1 + $0x10] sm:$0xff]  }
  0x1a   : > { %1584 = vmatprep.subr.bf16.mxu0 %v1939_v2  ;;  %1612 = vmatprep.subr.bf16.mxu1 %v1939_v2  ;;  %v1817_v3 = vld [vmem:[%s2339_s1 + $0x40] sm:$0xff]   ;;  %v1819_v5 = vld [vmem:[%s2339_s1 + $0x48] sm:$0xff]   ;;  %v1821_v7 = vld [vmem:[%s2339_s1 + $0x50] sm:$0xff]  }
  0x1b   : > { %1585 = vmatpush3.bf16.msra.mxu0 %v1816_v1  ;;  %1600 = vmatprep.mubr.msk.bf16.mxu0 %vm1940_vm0, %v1939_v2  ;;  %v1822_v8 = vld [vmem:[%s2339_s1 + $0x18] sm:$0xff]   ;;  %v1824_v10 = vld [vmem:[%s2339_s1 + $0x20] sm:$0xff]   ;;  %v1826_v12 = vld [vmem:[%s2339_s1 + $0x28] sm:$0xff]   ;;  %v587_v1 = vlaneseq }
  0x1c   : > { %1613 = vmatpush3.bf16.msra.mxu1 %v1817_v3  ;;  %1586 = vmatprep.subr.bf16.mxu0 %v1939_v2  ;;  %v1823_v9 = vld [vmem:[%s2339_s1 + $0x58] sm:$0xff]   ;;  %v1825_v11 = vld [vmem:[%s2339_s1 + $0x60] sm:$0xff]   ;;  %v2069_v13 = vld [vmem:[%s2014_s14 + $0x8] sm:$0xff]  }
  0x1d   : > { %1614 = vmatprep.subr.bf16.mxu1 %v1939_v2  ;;  %1628 = vmatprep.mubr.msk.bf16.mxu1 %vm1940_vm0, %v1939_v2  ;;  %v329_v14 = vld [vmem:[#allocation2] sm:$0xff]  ;;  %v1827_v15 = vld [vmem:[%s2339_s1 + $0x68] sm:$0xff]   ;;  %v1828_v16 = vld [vmem:[%s2339_s1 + $0x30] sm:$0xff]  }
  0x1e   : > { %342 = vst [vmem:[#allocation2] sm:$0xff] %v2069_v13  ;;  %v1829_v17 = vld [vmem:[%s2339_s1 + $0x70] sm:$0xff]   ;;  %v1830_v18 = vld [vmem:[%s2339_s1 + $0x38] sm:$0xff]   ;;  %v1833_v20 = vld [vmem:[%s2339_s1 + $0x80] sm:$0xff]  }
  0x1f   : > { %1587 = vmatpush3.bf16.msra.mxu0 %v1818_v4  ;;  %v1831_v19 = vld [vmem:[%s2339_s1 + $0x78] sm:$0xff]   ;;  %v1834_v21 = vld [vmem:[%s2339_s1 + $0x88] sm:$0xff]   ;;  %v2105_v22 = vld [vmem:[%s2014_s14] sm:$0xff]  }
  0x20   : > { %1615 = vmatpush3.bf16.msra.mxu1 %v1819_v5  ;;  %1588 = vmatprep.subr.bf16.mxu0 %v1939_v2  ;;  %v1836_v23 = vld [vmem:[%s2339_s1 + $0x90] sm:$0xff]   ;;  %v1837_v24 = vld [vmem:[%s2339_s1 + $0x98] sm:$0xff]   ;;  %v1838_v25 = vld [vmem:[%s2339_s1 + $0xa0] sm:$0xff]  }
  0x21   : > { %1616 = vmatprep.subr.bf16.mxu1 %v1939_v2  ;;  %v1839_v26 = vld [vmem:[%s2339_s1 + $0xa8] sm:$0xff]   ;;  %v1840_v27 = vld [vmem:[%s2339_s1 + $0xb0] sm:$0xff]   ;;  %v1841_v28 = vld [vmem:[%s2339_s1 + $0xb8] sm:$0xff]  }
  0x22   : > { %v1842_v29 = vld [vmem:[%s2341_s3] sm:$0xff]   ;;  %v1843_v30 = vld [vmem:[%s2341_s3 + $0x8] sm:$0xff]   ;;  %v1844_v32 = vld [vmem:[%s2341_s3 + $0x10] sm:$0xff]  }
  0x23   : > { %1589 = vmatpush3.bf16.msra.mxu0 %v1820_v6  ;;  %v1845_v31 = vld [vmem:[%s2341_s3 + $0x40] sm:$0xff]   ;;  %v1847_v33 = vld [vmem:[%s2341_s3 + $0x48] sm:$0xff]   ;;  %v1846_v34 = vld [vmem:[%s2341_s3 + $0x18] sm:$0xff]  }
  0x24   : > { %1617 = vmatpush3.bf16.msra.mxu1 %v1821_v7  ;;  %1590 = vmatprep.subr.bf16.mxu0 %v1939_v2  ;;  %v1848_v35 = vld [vmem:[%s2341_s3 + $0x20] sm:$0xff]   ;;  %v1849_v36 = vld [vmem:[%s2341_s3 + $0x50] sm:$0xff]   ;;  %v1850_v37 = vld [vmem:[%s2341_s3 + $0x28] sm:$0xff]  }
  0x25   : > { %1618 = vmatprep.subr.bf16.mxu1 %v1939_v2  ;;  %v1851_v38 = vld [vmem:[%s2341_s3 + $0x58] sm:$0xff]   ;;  %v1852_v39 = vld [vmem:[%s2341_s3 + $0x30] sm:$0xff]   ;;  %v1853_v40 = vld [vmem:[%s2341_s3 + $0x60] sm:$0xff]  }
  0x26   : > { %v1854_v41 = vld [vmem:[%s2341_s3 + $0x38] sm:$0xff]   ;;  %v1855_v42 = vld [vmem:[%s2341_s3 + $0x68] sm:$0xff]   ;;  %v1856_v44 = vld [vmem:[%s2341_s3 + $0x70] sm:$0xff]  }
  0x27   : > { %1591 = vmatpush3.bf16.msra.mxu0 %v1822_v8  ;;  %v2209_v43 = vld [vmem:[#allocation3] sm:$0xff]  ;;  %v1857_v45 = vld [vmem:[%s2341_s3 + $0x80] sm:$0xff]   ;;  %v1858_v46 = vld [vmem:[%s2341_s3 + $0x78] sm:$0xff]   ;;  %v2280_v8 = vshrl.u32 %v587_v1, 7 }
  0x28   : > { %1619 = vmatpush3.bf16.msra.mxu1 %v1823_v9  ;;  %1592 = vmatprep.subr.bf16.mxu0 %v1939_v2  ;;  %v1859_v47 = vld [vmem:[%s2341_s3 + $0x88] sm:$0xff]   ;;  %v1860_v48 = vld [vmem:[%s2341_s3 + $0x90] sm:$0xff]   ;;  %v1861_v49 = vld [vmem:[%s2341_s3 + $0x98] sm:$0xff]  }
  0x29   : > { %1620 = vmatprep.subr.bf16.mxu1 %v1939_v2  ;;  %v1862_v50 = vld [vmem:[%s2341_s3 + $0xa0] sm:$0xff]   ;;  %v1863_v51 = vld [vmem:[%s2341_s3 + $0xa8] sm:$0xff]   ;;  %v1864_v52 = vld [vmem:[%s2341_s3 + $0xb0] sm:$0xff]   ;;  %vm589_vm1 = vcmp.lt.s32.totalorder %v2280_v8, 4 }
  0x2a   : > { %v1865_v53 = vld [vmem:[%s2343_s5] sm:$0xff]   ;;  %v1867_v54 = vld [vmem:[%s2343_s5 + $0x8] sm:$0xff]   ;;  %v1866_v55 = vld [vmem:[%s2341_s3 + $0xb8] sm:$0xff]  }
  0x2b   : > { %1593 = vmatpush3.bf16.msra.mxu0 %v1824_v10  ;;  %v1868_v56 = vld [vmem:[%s2343_s5 + $0x10] sm:$0xff]   ;;  %v1869_v57 = vld [vmem:[%s2343_s5 + $0x18] sm:$0xff]   ;;  %v1870_v58 = vld [vmem:[%s2343_s5 + $0x20] sm:$0xff]  }
  0x2c   : > { %1621 = vmatpush3.bf16.msra.mxu1 %v1825_v11  ;;  %1594 = vmatprep.subr.bf16.mxu0 %v1939_v2  ;;  %v1871_v59 = vld [vmem:[%s2343_s5 + $0x28] sm:$0xff]   ;;  %v1872_v60 = vld [vmem:[%s2343_s5 + $0x30] sm:$0xff]   ;;  %v1873_v61 = vld [vmem:[%s2343_s5 + $0x38] sm:$0xff]  }
  0x2d   : > { %1622 = vmatprep.subr.bf16.mxu1 %v1939_v2 }
  0x2f   : > { %1595 = vmatpush3.bf16.msra.mxu0 %v1826_v12 }
  0x30   : > { %1623 = vmatpush3.bf16.msra.mxu1 %v1827_v15  ;;  %1596 = vmatprep.subr.bf16.mxu0 %v1939_v2 }
  0x31   : > { %1624 = vmatprep.subr.bf16.mxu1 %v1939_v2 }
  0x33   : > { %1597 = vmatpush3.bf16.msra.mxu0 %v1828_v16 }
  0x34   : > { %1625 = vmatpush3.bf16.msra.mxu1 %v1829_v17  ;;  %1598 = vmatprep.subr.bf16.mxu0 %v1939_v2 }
  0x35   : > { %1626 = vmatprep.subr.bf16.mxu1 %v1939_v2 }
  0x37   : > { %1599 = vmatpush3.bf16.msra.mxu0 %v1830_v18 }
  0x38   : > { %1627 = vmatpush3.bf16.msra.mxu1 %v1831_v19  ;;  %1640 = vmatprep.subr.bf16.mxu0 %v1939_v2 }
  0x39   : > { %1668 = vmatprep.subr.bf16.mxu1 %v1939_v2 }
  0x3a   : > { %1601 = vmatmul.mubr.bf16.vlgmr.msra.gmra.mrb[0].mxu0 %v329_v14 }
  0x3b   : > { %1629 = vmatmul.mubr.bf16.vlgmr.msra.gmra.mrb[0].mxu1 %v329_v14  ;;  %1641 = vmatpush3.bf16.msra.mxu0 %v1833_v20 }
  0x3c   : > { %1642 = vmatprep.subr.bf16.mxu0 %v1939_v2  ;;  %1632 = vmatprep.mubr.msk.bf16.mxu1 %vm1940_vm0, %v1939_v2 }
  0x3d   : > { %1604 = vmatprep.mubr.msk.bf16.mxu0 %vm1940_vm0, %v1939_v2  ;;  %1669 = vmatpush3.bf16.msra.mxu1 %v1842_v29 }
  0x3e   : > { %1670 = vmatprep.subr.bf16.mxu1 %v1939_v2 }
  0x3f   : > { %1643 = vmatpush3.bf16.msra.mxu0 %v1834_v21 }
  0x40   : > { %1644 = vmatprep.subr.bf16.mxu0 %v1939_v2 }
  0x41   : > { %1671 = vmatpush3.bf16.msra.mxu1 %v1843_v30 }
  0x42   : > { %1605 = vmatmul.mubr.bf16.gmra.mrb[4].mxu0 %v2105_v22  ;;  %1672 = vmatprep.subr.bf16.mxu1 %v1939_v2 }
  0x43   : > { %1633 = vmatmul.mubr.bf16.gmra.mrb[4].mxu1 %v2105_v22  ;;  %1645 = vmatpush3.bf16.msra.mxu0 %v1836_v23 }
  0x44   : > { %1646 = vmatprep.subr.bf16.mxu0 %v1939_v2  ;;  %1636 = vmatprep.mubr.msk.bf16.mxu1 %vm1940_vm0, %v1939_v2 }
  0x45   : > { %1608 = vmatprep.mubr.msk.bf16.mxu0 %vm1940_vm0, %v1939_v2  ;;  %1673 = vmatpush3.bf16.msra.mxu1 %v1844_v32 }
  0x46   : > { %1674 = vmatprep.subr.bf16.mxu1 %v1939_v2 }
  0x47   : > { %1647 = vmatpush3.bf16.msra.mxu0 %v1837_v24 }
  0x48   : > { %1648 = vmatprep.subr.bf16.mxu0 %v1939_v2 }
  0x49   : > { %1675 = vmatpush3.bf16.msra.mxu1 %v1846_v34 }
  0x4a   : > { %1609 = vmatmul.mubr.bf16.gmra.mrb[8].mxu0 %v2069_v13  ;;  %1676 = vmatprep.subr.bf16.mxu1 %v1939_v2 }
  0x4b   : > { %1637 = vmatmul.mubr.bf16.gmra.mrb[8].mxu1 %v2069_v13  ;;  %1649 = vmatpush3.bf16.msra.mxu0 %v1838_v25 }
  0x4c   : > { %1650 = vmatprep.subr.bf16.mxu0 %v1939_v2  ;;  %1656 = vmatprep.mubr.msk.bf16.mxu0 %vm1940_vm0, %v1939_v2 }
  0x4d   : > { %1684 = vmatprep.mubr.msk.bf16.mxu1 %vm1940_vm0, %v1939_v2  ;;  %1677 = vmatpush3.bf16.msra.mxu1 %v1848_v35 }
  0x4e   : > { %1678 = vmatprep.subr.bf16.mxu1 %v1939_v2 }
  0x4f   : > { %1651 = vmatpush3.bf16.msra.mxu0 %v1839_v26 }
  0x50   : > { %1652 = vmatprep.subr.bf16.mxu0 %v1939_v2 }
  0x51   : > { %1679 = vmatpush3.bf16.msra.mxu1 %v1850_v37 }
  0x52   : > { %1680 = vmatprep.subr.bf16.mxu1 %v1939_v2 }
  0x53   : > { %1653 = vmatpush3.bf16.msra.mxu0 %v1840_v27 }
  0x54   : > { %1654 = vmatprep.subr.bf16.mxu0 %v1939_v2 }
  0x55   : > { %1681 = vmatpush3.bf16.msra.mxu1 %v1852_v39 }
  0x56   : > { %1682 = vmatprep.subr.bf16.mxu1 %v1939_v2 }
  0x57   : > { %1655 = vmatpush3.bf16.msra.mxu0 %v1841_v28 }
  0x58   : > { %1696 = vmatprep.subr.bf16.mxu0 %v1939_v2 }
  0x59   : > { %1683 = vmatpush3.bf16.msra.mxu1 %v1854_v41 }
  0x5a   : > { %1657 = vmatmul.mubr.bf16.vlgmr.msra.gmra.mrb[12].mxu0 %v329_v14  ;;  %1724 = vmatprep.subr.bf16.mxu1 %v1939_v2 }
  0x5b   : > { %1660 = vmatprep.mubr.msk.bf16.mxu0 %vm1940_vm0, %v1939_v2  ;;  %1697 = vmatpush3.bf16.msra.mxu0 %v1845_v31 }
  0x5c   : > { %1698 = vmatprep.subr.bf16.mxu0 %v1939_v2  ;;  %1685 = vmatmul.mubr.bf16.vlgmr.msra.gmra.mrb[12].mxu1 %v2209_v43 }
  0x5d   : > { %1688 = vmatprep.mubr.msk.bf16.mxu1 %vm1940_vm0, %v1939_v2  ;;  %1725 = vmatpush3.bf16.msra.mxu1 %v1857_v45 }
  0x5e   : > { %1726 = vmatprep.subr.bf16.mxu1 %v1939_v2 }
  0x5f   : > { %1699 = vmatpush3.bf16.msra.mxu0 %v1847_v33 }
  0x60   : > { %1700 = vmatprep.subr.bf16.mxu0 %v1939_v2 }
  0x61   : > { %1727 = vmatpush3.bf16.msra.mxu1 %v1859_v47 }
  0x62   : > { %1661 = vmatmul.mubr.bf16.gmra.mrb[16].mxu0 %v2105_v22  ;;  %1728 = vmatprep.subr.bf16.mxu1 %v1939_v2 }
  0x63   : > { %1664 = vmatprep.mubr.msk.bf16.mxu0 %vm1940_vm0, %v1939_v2  ;;  %1701 = vmatpush3.bf16.msra.mxu0 %v1849_v36 }
  0x64   : > { %1702 = vmatprep.subr.bf16.mxu0 %v1939_v2 }
  0x65   : > { %1729 = vmatpush3.bf16.msra.mxu1 %v1860_v48 }
  0x66   : > { %1730 = vmatprep.subr.bf16.mxu1 %v1939_v2 }
  0x67   : > { %1703 = vmatpush3.bf16.msra.mxu0 %v1851_v38 }
  0x68   : > { %1704 = vmatprep.subr.bf16.mxu0 %v1939_v2 }
  0x69   : > { %1731 = vmatpush3.bf16.msra.mxu1 %v1861_v49 }
  0x6a   : > { %1665 = vmatmul.mubr.bf16.gmra.mrb[20].mxu0 %v2069_v13  ;;  %1732 = vmatprep.subr.bf16.mxu1 %v1939_v2 }
  0x6b   : > { %1712 = vmatprep.mubr.msk.bf16.mxu0 %vm1940_vm0, %v1939_v2  ;;  %1705 = vmatpush3.bf16.msra.mxu0 %v1853_v40 }
  0x6c   : > { %1706 = vmatprep.subr.bf16.mxu0 %v1939_v2 }
  0x6d   : > { %1733 = vmatpush3.bf16.msra.mxu1 %v1862_v50 }
  0x6e   : > { %1734 = vmatprep.subr.bf16.mxu1 %v1939_v2 }
  0x6f   : > { %1707 = vmatpush3.bf16.msra.mxu0 %v1855_v42 }
  0x70   : > { %1708 = vmatprep.subr.bf16.mxu0 %v1939_v2 }
  0x71   : > { %1735 = vmatpush3.bf16.msra.mxu1 %v1863_v51 }
  0x72   : > { %1736 = vmatprep.subr.bf16.mxu1 %v1939_v2 }
  0x73   : > { %1709 = vmatpush3.bf16.msra.mxu0 %v1856_v44 }
  0x74   : > { %1710 = vmatprep.subr.bf16.mxu0 %v1939_v2 }
  0x75   : > { %1737 = vmatpush3.bf16.msra.mxu1 %v1864_v52 }
  0x76   : > { %1738 = vmatprep.subr.bf16.mxu1 %v1939_v2 }
  0x77   : > { %1711 = vmatpush3.bf16.msra.mxu0 %v1858_v46  ;;  %v1452_v46 = vld [vmem:[%s2340_s2] ss:$0 sm:$0xff] }
  0x78   : > { %1752 = vmatprep.subr.bf16.mxu0 %v1865_v53 }
  0x79   : > { %1739 = vmatpush3.bf16.msra.mxu1 %v1866_v55 }
  0x7a   : > { %1713 = vmatmul.mubr.bf16.vlgmr.msra.gmra.mrb[24].mxu0 %v2209_v43 }
  0x7b   : > { %1716 = vmatprep.mubr.msk.bf16.mxu0 %vm1940_vm0, %v1939_v2  ;;  %1753 = vmatpush3.bf16.msra.mxu0 %v1865_v53 }
  0x7c   : > { %1754 = vmatprep.subr.bf16.mxu0 %v1867_v54 }
  0x7f   : > { %1755 = vmatpush3.bf16.msra.mxu0 %v1867_v54 }
  0x80   : > { %1756 = vmatprep.subr.bf16.mxu0 %v1868_v56 }
  0x83   : > { %1757 = vmatpush3.bf16.msra.mxu0 %v1868_v56 }
  0x84   : > { %1758 = vmatprep.subr.bf16.mxu0 %v1869_v57 }
  0x87   : > { %1759 = vmatpush3.bf16.msra.mxu0 %v1869_v57 }
  0x88   : > { %1760 = vmatprep.subr.bf16.mxu0 %v1870_v58 }
  0x8b   : > { %1761 = vmatpush3.bf16.msra.mxu0 %v1870_v58 }
  0x8c   : > { %1762 = vmatprep.subr.bf16.mxu0 %v1871_v59 }
  0x8f   : > { %1763 = vmatpush3.bf16.msra.mxu0 %v1871_v59 }
  0x90   : > { %1764 = vmatprep.subr.bf16.mxu0 %v1872_v60 }
  0x93   : > { %1765 = vmatpush3.bf16.msra.mxu0 %v1872_v60 }
  0x94   : > { %1766 = vmatprep.subr.bf16.mxu0 %v1873_v61 }
  0x97   : > { %1767 = vmatpush3.bf16.msra.mxu0 %v1873_v61 }
 0x10d   : > { %v441_v62 = vpop.f32.mrb[0].mxu0 }
 0x10e   : > { %v1602_v63 = vpop.f32.mrb[1].mxu0  ;;  %v560_v0 = vpop.f32.mrb[0].mxu1 }
 0x10f   : > { %v443_v3 = vpop.f32.mrb[2].mxu0  ;;  %v1630_v4 = vpop.f32.mrb[1].mxu1 }
 0x110   : > { %v1603_v5 = vpop.f32.mrb[3].mxu0  ;;  %v562_v6 = vpop.f32.mrb[2].mxu1 }
 0x111   : > { %v1631_v7 = vpop.f32.mrb[3].mxu1  ;;  %v582_v9 = vrot.slane %v562_v6, 4 }
 0x115   : > { %v448_v10 = vpop.f32.mrb[4].mxu0 }
 0x116   : > { %v567_v11 = vpop.f32.mrb[4].mxu1  ;;  %v1606_v12 = vpop.f32.mrb[5].mxu0 }
 0x117   : > { %v583_v14 = vrot.slane %v567_v11, 4  ;;  %v1634_v15 = vpop.f32.mrb[5].mxu1  ;;  %v451_v16 = vpop.f32.mrb[6].mxu0 }
 0x118   : > { %v570_v17 = vpop.f32.mrb[6].mxu1  ;;  %v1607_v18 = vpop.f32.mrb[7].mxu0 }
 0x119   : > { %v584_v19 = vrot.slane %v570_v17, 4  ;;  %v1635_v20 = vpop.f32.mrb[7].mxu1  ;;  %v593_v21 = vsel %vm589_vm1, %v582_v9, %v583_v14 }
 0x11a   : > { %v594_v23 = vadd.f32 %v593_v21, %v443_v3 }
 0x11b   : > { %v592_v24 = vsel %vm589_vm1, %v583_v14, %v584_v19 }
 0x11c   : > { %v595_v25 = vadd.f32 %v592_v24, %v448_v10 }
 0x11d   : > { %v456_v26 = vpop.f32.mrb[8].mxu0 }
 0x11e   : > { %v575_v27 = vpop.f32.mrb[8].mxu1  ;;  %v1610_v28 = vpop.f32.mrb[9].mxu0 }
 0x11f   : > { %v585_v29 = vrot.slane %v575_v27, 4  ;;  %v1638_v30 = vpop.f32.mrb[9].mxu1  ;;  %v459_v31 = vpop.f32.mrb[10].mxu0 }
 0x120   : > { %v578_v32 = vpop.f32.mrb[10].mxu1  ;;  %v1611_v33 = vpop.f32.mrb[11].mxu0 }
 0x121   : > { %v586_v34 = vrot.slane %v578_v32, 4  ;;  %v1639_v35 = vpop.f32.mrb[11].mxu1  ;;  %v591_v36 = vsel %vm589_vm1, %v584_v19, %v585_v29 }
 0x122   : > { %v596_v37 = vadd.f32 %v591_v36, %v451_v16 }
 0x123   : > { %v590_v38 = vsel %vm589_vm1, %v585_v29, %v586_v34 }
 0x124   : > { %v597_v39 = vadd.f32 %v590_v38, %v456_v26 }
 0x12d   : > { %v696_v40 = vpop.f32.mrb[12].mxu0 }
 0x12e   : > { %v1658_v41 = vpop.f32.mrb[13].mxu0 }
 0x12f   : > { %v698_v42 = vpop.f32.mrb[14].mxu0  ;;  %v854_v24 = vpop.f32.mrb[12].mxu1 }
 0x130   : > { %v1659_v44 = vpop.f32.mrb[15].mxu0 }
 0x135   : > { %v702_v45 = vpop.f32.mrb[16].mxu0 }
 0x136   : > { %v717_v47 = vadd.f32 %v702_v45, %v594_v23  ;;  %v1662_v48 = vpop.f32.mrb[17].mxu0 }
 0x137   : > { %v705_v49 = vpop.f32.mrb[18].mxu0 }
 0x138   : > { %v728_v50 = vadd.f32 %v1452_v46, %v717_v47  ;;  %v718_v51 = vadd.f32 %v705_v49, %v595_v25  ;;  %v1663_v52 = vpop.f32.mrb[19].mxu0  ;;  %v1686_v25 = vpop.f32.mrb[13].mxu1 }
 0x139   : > { %v856_v26 = vpop.f32.mrb[14].mxu1 }
 0x13a   : > { %v736_v53 = vmul.f32 0.70710677, %v728_v50  ;;  %v729_v54 = vadd.f32 %v1452_v46, %v718_v51  ;;  %v732_v6 = vmul.f32 0.5, %v728_v50  ;;  %v1687_v27 = vpop.f32.mrb[15].mxu1 }
 0x13c   : > { %1874 = verf.f32 %v736_v53  ;;  %v737_v55 = vmul.f32 0.70710677, %v729_v54  ;;  %v733_v7 = vmul.f32 0.5, %v729_v54 }
 0x13d   : > { %v710_v56 = vpop.f32.mrb[20].mxu0 }
 0x13e   : > { %1876 = verf.f32 %v737_v55  ;;  %v719_v57 = vadd.f32 %v710_v56, %v596_v37  ;;  %v1666_v58 = vpop.f32.mrb[21].mxu0 }
 0x13f   : > { %v713_v59 = vpop.f32.mrb[22].mxu0 }
 0x140   : > { %v730_v60 = vadd.f32 %v1452_v46, %v719_v57  ;;  %v720_v61 = vadd.f32 %v713_v59, %v597_v39  ;;  %v1667_v62 = vpop.f32.mrb[23].mxu0 }
 0x142   : > { %v738_v63 = vmul.f32 0.70710677, %v730_v60  ;;  %v731_v0 = vadd.f32 %v1452_v46, %v720_v61  ;;  %v734_v17 = vmul.f32 0.5, %v730_v60 }
 0x144   : > { %1878 = verf.f32 %v738_v63  ;;  %v739_v1 = vmul.f32 0.70710677, %v731_v0  ;;  %v735_v18 = vmul.f32 0.5, %v731_v0 }
 0x146   : > { %v1875_v3 = vpop.eup %1874  ;;  %1880 = verf.f32 %v739_v1 }
 0x147   : > { %v744_v4 = vadd.f32 1.0, %v1875_v3 }
 0x148   : > { %v1877_v5 = vpop.eup %1876 }
 0x149   : > { %v745_v9 = vadd.f32 1.0, %v1877_v5  ;;  %v748_v10 = vmul.f32 %v744_v4, %v732_v6  ;;  %v1477_v4 = vld [vmem:[%s2342_s4] ss:$0 sm:$0xff] }
 0x14b   : > { %v749_v11 = vmul.f32 %v745_v9, %v733_v7 }
 0x14d   : > { %v752_v12 = vpack.c.bf16 %v749_v11, %v748_v10  ;;  %v973_v28 = vpop.f32.mrb[24].mxu0 }
 0x14e   : > { %v1879_v14 = vpop.eup %1878  ;;  %v1714_v29 = vpop.f32.mrb[25].mxu0 }
 0x14f   : > { %v746_v15 = vadd.f32 1.0, %v1879_v14  ;;  %1689 = vmatmul.mubr.bf16.gmra.mrb[16].mxu1 %v752_v12  ;;  %1717 = vmatmul.mubr.bf16.gmra.mrb[28].mxu0 %v752_v12  ;;  %v975_v30 = vpop.f32.mrb[26].mxu0 }
 0x150   : > { %v1881_v16 = vpop.eup %1880  ;;  %1692 = vmatprep.mubr.msk.bf16.mxu1 %vm1940_vm0, %v1939_v2  ;;  %1720 = vmatprep.mubr.msk.bf16.mxu0 %vm1940_vm0, %v1939_v2  ;;  %v995_v31 = vrot.slane %v975_v30, 4 }
 0x151   : > { %v747_v19 = vadd.f32 1.0, %v1881_v16  ;;  %v750_v20 = vmul.f32 %v746_v15, %v734_v17 }
 0x153   : > { %v751_v21 = vmul.f32 %v747_v19, %v735_v18 }
 0x155   : > { %v753_v23 = vpack.c.bf16 %v751_v21, %v750_v20 }
 0x157   : > { %755 = vst [vmem:[#allocation3] sm:$0xff] %v753_v23  ;;  %1693 = vmatmul.mubr.bf16.gmra.mrb[20].mxu1 %v753_v23  ;;  %1721 = vmatmul.mubr.bf16.gmra.mrb[32].mxu0 %v753_v23 }
 0x158   : > { %1740 = vmatprep.mubr.msk.bf16.mxu1 %vm1940_vm0, %v1939_v2  ;;  %1768 = vmatprep.mubr.bf16.mxu0 %v2105_v22  ;;  %v1715_v22 = vpop.f32.mrb[27].mxu0 }
 0x15f   : > { %1741 = vmatmul.mubr.bf16.vlgmr.msra.gmra.mrb[24].mxu1 %v2209_v43  ;;  %1769 = vmatmul.mubr.bf16.vlgmr.msra.gmra.mrb[36].mxu0 %v2069_v13 }
 0x160   : > { %1744 = vmatprep.mubr.msk.bf16.mxu1 %vm1940_vm0, %v1939_v2 }
 0x167   : > { %1745 = vmatmul.mubr.bf16.gmra.mrb[28].mxu1 %v752_v12 }
 0x168   : > { %1748 = vmatprep.mubr.msk.bf16.mxu1 %vm1940_vm0, %v1939_v2 }
 0x16f   : > { %1749 = vmatmul.mubr.bf16.gmra.mrb[32].mxu1 %v753_v23 }
 0x222   : > { %v861_v43 = vpop.f32.mrb[16].mxu1  ;;  %v980_v32 = vpop.f32.mrb[28].mxu0 }
 0x223   : > { %v996_v13 = vrot.slane %v980_v32, 4  ;;  %v1690_v33 = vpop.f32.mrb[17].mxu1  ;;  %v1718_v34 = vpop.f32.mrb[29].mxu0 }
 0x224   : > { %v864_v35 = vpop.f32.mrb[18].mxu1  ;;  %v983_v36 = vpop.f32.mrb[30].mxu0 }
 0x225   : > { %v997_v37 = vrot.slane %v983_v36, 4  ;;  %v1691_v38 = vpop.f32.mrb[19].mxu1  ;;  %v1719_v2 = vpop.f32.mrb[31].mxu0  ;;  %v1003_v39 = vsel %vm589_vm1, %v995_v31, %v996_v13 }
 0x226   : > { %v1004_v40 = vadd.f32 %v1003_v39, %v856_v26  ;;  %v1478_v26 = vld [vmem:[%s2344_s6] ss:$0 sm:$0xff] }
 0x227   : > { %v1002_v41 = vsel %vm589_vm1, %v996_v13, %v997_v37 }
 0x228   : > { %v1005_v42 = vadd.f32 %v1002_v41, %v861_v43 }
 0x22a   : > { %v869_v44 = vpop.f32.mrb[20].mxu1  ;;  %v988_v45 = vpop.f32.mrb[32].mxu0 }
 0x22b   : > { %v998_v46 = vrot.slane %v988_v45, 4  ;;  %v1694_v47 = vpop.f32.mrb[21].mxu1  ;;  %v1722_v48 = vpop.f32.mrb[33].mxu0 }
 0x22c   : > { %v872_v49 = vpop.f32.mrb[22].mxu1  ;;  %v991_v50 = vpop.f32.mrb[34].mxu0 }
 0x22d   : > { %v999_v51 = vrot.slane %v991_v50, 4  ;;  %v1695_v52 = vpop.f32.mrb[23].mxu1  ;;  %v1723_v53 = vpop.f32.mrb[35].mxu0  ;;  %v1001_v54 = vsel %vm589_vm1, %v997_v37, %v998_v46 }
 0x22e   : > { %v1006_v55 = vadd.f32 %v1001_v54, %v864_v35 }
 0x22f   : > { %v1000_v56 = vsel %vm589_vm1, %v998_v46, %v999_v51 }
 0x230   : > { %v1007_v57 = vadd.f32 %v1000_v56, %v869_v44 }
 0x232   : > { %v1106_v58 = vpop.f32.mrb[24].mxu1  ;;  %v1770_v59 = vpop.f32.mrb[36].mxu0 }
 0x233   : > { %v1742_v60 = vpop.f32.mrb[25].mxu1  ;;  %v1267_v61 = vpop.f32.mrb[37].mxu0  ;;  %v1276_v38 = vadd.f32 %v1770_v59, %v1478_v26 }
 0x234   : > { %v1108_v62 = vpop.f32.mrb[26].mxu1  ;;  %v1771_v63 = vpop.f32.mrb[38].mxu0  ;;  %v1268_v30 = vadd.f32 %v1478_v26, %v1267_v61 }
 0x235   : > { %v1743_v0 = vpop.f32.mrb[27].mxu1  ;;  %v1270_v1 = vpop.f32.mrb[39].mxu0  ;;  %v1279_v48 = vadd.f32 %v1771_v63, %v1478_v26 }
 0x236   : > { %v1271_v13 = vadd.f32 %v1478_v26, %v1270_v1 }
 0x23a   : > { %v1112_v3 = vpop.f32.mrb[28].mxu1 }
 0x23b   : > { %v1127_v5 = vadd.f32 %v1112_v3, %v1004_v40  ;;  %v1746_v6 = vpop.f32.mrb[29].mxu1 }
 0x23c   : > { %v1115_v7 = vpop.f32.mrb[30].mxu1 }
 0x23d   : > { %v1138_v9 = vadd.f32 %v1477_v4, %v1127_v5  ;;  %v1128_v8 = vadd.f32 %v1115_v7, %v1005_v42  ;;  %v1747_v10 = vpop.f32.mrb[31].mxu1 }
 0x23f   : > { %v1146_v11 = vmul.f32 0.70710677, %v1138_v9  ;;  %v1139_v12 = vadd.f32 %v1477_v4, %v1128_v8  ;;  %v1142_v28 = vmul.f32 0.5, %v1138_v9 }
 0x241   : > { %1882 = verf.f32 %v1146_v11  ;;  %v1147_v14 = vmul.f32 0.70710677, %v1139_v12  ;;  %v1143_v31 = vmul.f32 0.5, %v1139_v12 }
 0x242   : > { %v1120_v15 = vpop.f32.mrb[32].mxu1 }
 0x243   : > { %1884 = verf.f32 %v1147_v14  ;;  %v1129_v16 = vadd.f32 %v1120_v15, %v1006_v55  ;;  %v1750_v17 = vpop.f32.mrb[33].mxu1 }
 0x244   : > { %v1123_v18 = vpop.f32.mrb[34].mxu1 }
 0x245   : > { %v1140_v19 = vadd.f32 %v1477_v4, %v1129_v16  ;;  %v1130_v20 = vadd.f32 %v1123_v18, %v1007_v57  ;;  %v1751_v21 = vpop.f32.mrb[35].mxu1 }
 0x247   : > { %v1148_v23 = vmul.f32 0.70710677, %v1140_v19  ;;  %v1141_v24 = vadd.f32 %v1477_v4, %v1130_v20  ;;  %v1144_v2 = vmul.f32 0.5, %v1140_v19 }
 0x249   : > { %1886 = verf.f32 %v1148_v23  ;;  %v1149_v25 = vmul.f32 0.70710677, %v1141_v24  ;;  %v1145_v42 = vmul.f32 0.5, %v1141_v24 }
 0x24b   : > { %v1883_v27 = vpop.eup %1882  ;;  %1888 = verf.f32 %v1149_v25 }
 0x24c   : > { %v1154_v29 = vadd.f32 1.0, %v1883_v27 }
 0x24d   : > { %v1885_v22 = vpop.eup %1884 }
 0x24e   : > { %v1158_v43 = vmul.f32 %v1154_v29, %v1142_v28  ;;  %v1155_v32 = vadd.f32 1.0, %v1885_v22 }
 0x250   : > { %v1282_v33 = vadd.f32 %v1268_v30, %v1158_v43  ;;  %v1159_v34 = vmul.f32 %v1155_v32, %v1143_v31 }
 0x252   : > { %v1290_v35 = vmul.f32 0.70710677, %v1282_v33  ;;  %v1283_v36 = vadd.f32 %v1271_v13, %v1159_v34  ;;  %v1286_v55 = vmul.f32 0.5, %v1282_v33 }
 0x253   : > { %v1887_v37 = vpop.eup %1886 }
 0x254   : > { %v1156_v39 = vadd.f32 1.0, %v1887_v37  ;;  %1890 = verf.f32 %v1290_v35  ;;  %v1291_v40 = vmul.f32 0.70710677, %v1283_v36  ;;  %v1287_v56 = vmul.f32 0.5, %v1283_v36 }
 0x255   : > { %v1889_v41 = vpop.eup %1888 }
 0x256   : > { %v1160_v44 = vmul.f32 %v1156_v39, %v1144_v2  ;;  %v1157_v45 = vadd.f32 1.0, %v1889_v41  ;;  %1892 = verf.f32 %v1291_v40 }
 0x258   : > { %v1284_v46 = vadd.f32 %v1276_v38, %v1160_v44  ;;  %v1161_v47 = vmul.f32 %v1157_v45, %v1145_v42 }
 0x25a   : > { %v1292_v49 = vmul.f32 0.70710677, %v1284_v46  ;;  %v1285_v50 = vadd.f32 %v1279_v48, %v1161_v47  ;;  %v1288_v0 = vmul.f32 0.5, %v1284_v46 }
 0x25c   : > { %1894 = verf.f32 %v1292_v49  ;;  %v1293_v51 = vmul.f32 0.70710677, %v1285_v50  ;;  %v1289_v1 = vmul.f32 0.5, %v1285_v50 }
 0x25e   : > { %v1891_v52 = vpop.eup %1890  ;;  %1896 = verf.f32 %v1293_v51 }
 0x25f   : > { %v1298_v53 = vadd.f32 1.0, %v1891_v52 }
 0x260   : > { %v1893_v54 = vpop.eup %1892 }
 0x261   : > { %v1299_v57 = vadd.f32 1.0, %v1893_v54  ;;  %v1302_v58 = vmul.f32 %v1298_v53, %v1286_v55 }
 0x263   : > { %v1303_v59 = vmul.f32 %v1299_v57, %v1287_v56 }
 0x265   : > { %v1500_v60 = vpack.c.bf16 %v1303_v59, %v1302_v58 }
 0x266   : > { %v1895_v61 = vpop.eup %1894 }
 0x267   : > { %v1300_v62 = vadd.f32 1.0, %v1895_v61  ;;  %1501 = vst [vmem:[%s2019_s17] sm:$0xff] %v1500_v60  }
 0x268   : > { %v1897_v63 = vpop.eup %1896 }
 0x269   : > { %v1301_v3 = vadd.f32 1.0, %v1897_v63  ;;  %v1304_v4 = vmul.f32 %v1300_v62, %v1288_v0 }
 0x26b   : > { %v1305_v5 = vmul.f32 %v1301_v3, %v1289_v1 }
 0x26d   : > { %v1505_v6 = vpack.c.bf16 %v1305_v5, %v1304_v4 }
 0x26f   : > { %1507 = vst [vmem:[%s2019_s17 + $0x8] sm:$0xff] %v1505_v6  }
 0x270 PF: > { %s17_s28 = sadd.s32 1, %s1936_s28   ;;  %s2346_s24 = smov %s1928_s26 }
 0x271   : > { %p14_p8 = scmp.ge.s32.totalorder %s17_s28, 8   ;;  %s2347_s25 = smov %s1932_s27 }
 0x272   : > { %s2348_s26 = smov %s2351_s29  ;;  %s2349_s27 = smov %s2355_s30 }
 0x273   :  { %16 = sbr.rel (!%p14_p8) target bundleno = 3 (0x3), region = 82 }

// kernel: temporal_conv_net_forward.9
= control target key start
LH: loop header
LB: loop body
LE: loop exit
PB: predicated region body
PF: predicated region fallthrough
CT: control target
= control target key end

     0   :  { %s1424_s18 = smov 0   ;;  %s1426_s19 = smov 0   ;;  %s1648_s0 = inlined_call_operand.vmem [shape: bf16[2,96,128], index: 0, kind: input, shape index: {}]   ;;  %s1649_s1 = inlined_call_operand.vmem [shape: bf16[384,128], index: 1, kind: input, shape index: {}]   ;;  %s1650_s2 = inlined_call_operand.vmem [shape: f32[1,128], index: 2, kind: input, shape index: {}]   ;;  %s1651_s3 = inlined_call_operand.vmem [shape: bf16[384,128], index: 3, kind: input, shape index: {}]   ;;  %s1652_s4 = inlined_call_operand.vmem [shape: f32[1,128], index: 4, kind: input, shape index: {}]   ;;  %s1653_s5 = inlined_call_operand.vmem [shape: f32[2,96,128], index: 5, kind: output, shape index: {}]  }
   0x1   :  { %s1428_s20 = smov 0   ;;  %s1430_s21 = smov 0  }
   0x2   :  { %s1432_s22 = smov 0  }
   0x3 LB: > { %s24_s23 = sadd.s32 1, %s1383_s20  ;;  %s27_s24 = sadd.s32 1, %s1387_s21  ;;  %s1391_s22 = sphi %s1432_s22, %s15_s22   ;;  %s1387_s21 = sphi %s1430_s21, %s1657_s21   ;;  %s1383_s20 = sphi %s1428_s20, %s1656_s20   ;;  %s1379_s19 = sphi %s1426_s19, %s1655_s19   ;;  %s1375_s18 = sphi %s1424_s18, %s1654_s18  }
   0x4   : > { %p25_p0 = scmp.ge.s32.totalorder %s24_s23, 3  ;;  %p1059_p1 = scmp.ge.s32.totalorder %s1391_s22, 1 }
   0x5   : > { %p208_p2 = scmp.lt.s32.totalorder %s1391_s22, 7 }
   0x6   : > { %s1659_s23 = smov (%p25_p0, %s24_s23), 0  ;;  %s1661_s24 = smov (!%p25_p0, %s27_s24), %s1387_s21 }
   0x7   : > { %p209_p3 = pnand %p1059_p1, %p208_p2  ;;  %p29_p4 = scmp.ge.s32.totalorder %s1661_s24, 2 }
   0x8   : > { %s1060_s25 = sshll.u32 (!%p209_p3), %s1375_s18, 2  ;;  %p245_p5 = scmp.lt.s32.totalorder (!%p209_p3), %s1379_s19, 1 }
   0x9   : > { %s1663_s24 = smov (%p29_p4, %s1661_s24), 0  ;;  %212 = sbr.rel (%p209_p3) target bundleno = 560 (0x230), region = 40 }
   0xa   : > { %p247_p6 = scmp.lt.s32.totalorder (!%p209_p3), %s1060_s25, 11  ;;  %p1064_p7 = scmp.ne.s32.totalorder (!%p209_p3), %s1375_s18, 0 }
  0x10   : > { %s1665_s19 = smov (!%p245_p5, %s1379_s19), 1  ;;  %s1667_s25 = smov (!%p247_p6, %s1060_s25), 11 }
  0x11   : > { %s1235_s26 = smul.u32 12, %s1665_s19  ;;  %v1393_v0 = vmov (!%p1064_p7), 0  }
  0x12   : > { %268 = sbr.rel (%p1064_p7) target bundleno = 25 (0x19), region = 44  ;;  %269 = vst [vmem:[#allocation2] sm:$0xff] (!%p1064_p7), %v1393_v0  ;;  %270 = vst [vmem:[#allocation2 + $0x8] sm:$0xff] (!%p1064_p7), %v1393_v0 }
  0x13   : > { %s250_s27 = sadd.s32 %s1235_s26, %s1667_s25  ;;  %271 = vst [vmem:[#allocation3] sm:$0xff] (!%p1064_p7), %v1393_v0  ;;  %272 = vst [vmem:[#allocation3 + $0x8] sm:$0xff] (!%p1064_p7), %v1393_v0 }
  0x14   : > { %s1061_s28 = sshll.u32 %s250_s27, 2  ;;  %s1063_s29 = sshll.u32 %s250_s27, 3 }
  0x15   : > { %s1457_s7 = scalar_lea.vmem %s1648_s0, %s1061_s28  ;;  %s1462_s10 = scalar_lea.vmem %s1653_s5, %s1063_s29 }
  0x19 PF: > { %v1277_v1 = vld [vmem:[%s1649_s1 + $0x40] sm:$0xff]   ;;  %v1279_v3 = vld [vmem:[%s1649_s1 + $0x48] sm:$0xff]   ;;  %v1282_v6 = vld [vmem:[%s1649_s1 + $0x50] sm:$0xff]  }
  0x1a   : > { %v1278_v2 = vld [vmem:[%s1649_s1] sm:$0xff]   ;;  %1119 = vmatprep.subr.bf16.mxu0 %v1277_v1  ;;  %v1281_v5 = vld [vmem:[%s1649_s1 + $0x8] sm:$0xff]   ;;  %v1284_v8 = vld [vmem:[%s1649_s1 + $0x10] sm:$0xff]  }
  0x1b   : > { %1120 = vmatpush3.bf16.msra.mxu0 %v1278_v2  ;;  %v1280_v4 = vld [vmem:[%s1649_s1 + $0x80] sm:$0xff]   ;;  %v1283_v7 = vld [vmem:[%s1649_s1 + $0x88] sm:$0xff]   ;;  %v1285_v9 = vld [vmem:[%s1649_s1 + $0x58] sm:$0xff]  }
  0x1c   : > { %1121 = vmatprep.subr.bf16.mxu0 %v1279_v3  ;;  %1195 = vmatprep.subr.bf16.mxu1 %v1280_v4  ;;  %v1286_v10 = vld [vmem:[%s1649_s1 + $0x90] sm:$0xff]   ;;  %v1287_v11 = vld [vmem:[%s1649_s1 + $0x18] sm:$0xff]   ;;  %v1288_v12 = vld [vmem:[%s1649_s1 + $0x60] sm:$0xff]  }
  0x1d   : > { %1196 = vmatpush3.bf16.msra.mxu1 %v1280_v4  ;;  %v1289_v13 = vld [vmem:[%s1649_s1 + $0x98] sm:$0xff]   ;;  %v1290_v14 = vld [vmem:[%s1649_s1 + $0x20] sm:$0xff]   ;;  %v1291_v16 = vld [vmem:[%s1649_s1 + $0x68] sm:$0xff]  }
  0x1e   : > { %1197 = vmatprep.subr.bf16.mxu1 %v1283_v7  ;;  %v1292_v15 = vld [vmem:[%s1649_s1 + $0xa0] sm:$0xff]   ;;  %v1293_v17 = vld [vmem:[%s1649_s1 + $0x28] sm:$0xff]   ;;  %v1294_v19 = vld [vmem:[%s1649_s1 + $0x70] sm:$0xff]  }
  0x1f   : > { %1122 = vmatpush3.bf16.msra.mxu0 %v1281_v5  ;;  %v1295_v18 = vld [vmem:[%s1649_s1 + $0xa8] sm:$0xff]   ;;  %v1296_v20 = vld [vmem:[%s1649_s1 + $0x30] sm:$0xff]   ;;  %v1531_v24 = vld [vmem:[%s1457_s7] sm:$0xff]  }
  0x20   : > { %1123 = vmatprep.subr.bf16.mxu0 %v1282_v6  ;;  %v1298_v21 = vld [vmem:[%s1649_s1 + $0xb0] sm:$0xff]   ;;  %v1528_v22 = vld [vmem:[%s1457_s7 + $0x8] sm:$0xff]   ;;  %v1297_v25 = vld [vmem:[%s1649_s1 + $0x78] sm:$0xff]   ;;  %1211 = vmatprep.mubr.bf16.mxu1 %v1531_v24 }
  0x21   : > { %1198 = vmatpush3.bf16.msra.mxu1 %v1283_v7  ;;  %v278_v23 = vld [vmem:[#allocation2 + $0x8] sm:$0xff]  ;;  %v277_v26 = vld [vmem:[#allocation2] sm:$0xff]  ;;  %v1299_v27 = vld [vmem:[%s1649_s1 + $0x38] sm:$0xff]  }
  0x22   : > { %1199 = vmatprep.subr.bf16.mxu1 %v1286_v10  ;;  %524 = vmatprep.mubr.bf16.mxu0 %v278_v23  ;;  %292 = vst [vmem:[#allocation2 + $0x8] sm:$0xff] %v1528_v22  ;;  %291 = vst [vmem:[#allocation2] sm:$0xff] %v1531_v24  ;;  %v1302_v28 = vld [vmem:[%s1649_s1 + $0xb8] sm:$0xff]   ;;  %v1303_v29 = vld [vmem:[%s1651_s3 + $0x40] sm:$0xff]  }
  0x23   : > { %1124 = vmatpush3.bf16.msra.mxu0 %v1284_v8  ;;  %v1304_v30 = vld [vmem:[%s1651_s3] sm:$0xff]   ;;  %v1305_v31 = vld [vmem:[%s1651_s3 + $0x48] sm:$0xff]   ;;  %v1307_v33 = vld [vmem:[%s1651_s3 + $0x50] sm:$0xff]  }
  0x24   : > { %1125 = vmatprep.subr.bf16.mxu0 %v1285_v9  ;;  %v1306_v32 = vld [vmem:[%s1651_s3 + $0x8] sm:$0xff]   ;;  %v1308_v34 = vld [vmem:[%s1651_s3 + $0x10] sm:$0xff]   ;;  %v1309_v35 = vld [vmem:[%s1651_s3 + $0x58] sm:$0xff]  }
  0x25   : > { %1200 = vmatpush3.bf16.msra.mxu1 %v1286_v10  ;;  %v1310_v36 = vld [vmem:[%s1651_s3 + $0x18] sm:$0xff]   ;;  %v1311_v37 = vld [vmem:[%s1651_s3 + $0x80] sm:$0xff]   ;;  %v1314_v40 = vld [vmem:[%s1651_s3 + $0x88] sm:$0xff]  }
  0x26   : > { %1201 = vmatprep.subr.bf16.mxu1 %v1289_v13  ;;  %v1312_v38 = vld [vmem:[%s1651_s3 + $0x60] sm:$0xff]   ;;  %v1315_v41 = vld [vmem:[%s1651_s3 + $0x68] sm:$0xff]   ;;  %v1317_v43 = vld [vmem:[%s1651_s3 + $0x90] sm:$0xff]  }
  0x27   : > { %1126 = vmatpush3.bf16.msra.mxu0 %v1287_v11  ;;  %v1313_v39 = vld [vmem:[%s1651_s3 + $0x20] sm:$0xff]   ;;  %v1316_v42 = vld [vmem:[%s1651_s3 + $0x28] sm:$0xff]   ;;  %v1318_v44 = vld [vmem:[%s1651_s3 + $0x70] sm:$0xff]  }
  0x28   : > { %1127 = vmatprep.subr.bf16.mxu0 %v1288_v12  ;;  %v1319_v45 = vld [vmem:[%s1651_s3 + $0x30] sm:$0xff]   ;;  %v1320_v46 = vld [vmem:[%s1651_s3 + $0x98] sm:$0xff]   ;;  %v1323_v49 = vld [vmem:[%s1651_s3 + $0xa0] sm:$0xff]  }
  0x29   : > { %1202 = vmatpush3.bf16.msra.mxu1 %v1289_v13  ;;  %v1321_v47 = vld [vmem:[%s1651_s3 + $0x78] sm:$0xff]   ;;  %v612_v51 = vld [vmem:[#allocation3] sm:$0xff]  ;;  %v1324_v52 = vld [vmem:[%s1651_s3 + $0xa8] sm:$0xff]  }
  0x2a   : > { %1203 = vmatprep.subr.bf16.mxu1 %v1292_v15  ;;  %v1322_v48 = vld [vmem:[%s1651_s3 + $0x38] sm:$0xff]   ;;  %v1325_v53 = vld [vmem:[%s1651_s3 + $0xb0] sm:$0xff]   ;;  %v1067_v57 = vld [vmem:[%s1650_s2] ss:$0 sm:$0xff] }
  0x2b   : > { %1128 = vmatpush3.bf16.msra.mxu0 %v1290_v14  ;;  %v613_v50 = vld [vmem:[#allocation3 + $0x8] sm:$0xff] }
  0x2c   : > { %1129 = vmatprep.subr.bf16.mxu0 %v1291_v16  ;;  %v1326_v54 = vld [vmem:[%s1651_s3 + $0xb8] sm:$0xff]  }
  0x2d   : > { %1204 = vmatpush3.bf16.msra.mxu1 %v1292_v15 }
  0x2e   : > { %1205 = vmatprep.subr.bf16.mxu1 %v1295_v18 }
  0x2f   : > { %1130 = vmatpush3.bf16.msra.mxu0 %v1293_v17 }
  0x30   : > { %1131 = vmatprep.subr.bf16.mxu0 %v1294_v19 }
  0x31   : > { %1206 = vmatpush3.bf16.msra.mxu1 %v1295_v18 }
  0x32   : > { %1207 = vmatprep.subr.bf16.mxu1 %v1298_v21 }
  0x33   : > { %1132 = vmatpush3.bf16.msra.mxu0 %v1296_v20 }
  0x34   : > { %1133 = vmatprep.subr.bf16.mxu0 %v1297_v25 }
  0x35   : > { %1208 = vmatpush3.bf16.msra.mxu1 %v1298_v21 }
  0x36   : > { %1209 = vmatprep.subr.bf16.mxu1 %v1302_v28 }
  0x37   : > { %1134 = vmatpush3.bf16.msra.mxu0 %v1299_v27 }
  0x38   : > { %1157 = vmatprep.subr.bf16.mxu0 %v1303_v29 }
  0x39   : > { %1210 = vmatpush3.bf16.msra.mxu1 %v1302_v28 }
  0x3a   : > { %525 = vmatmul.mubr.bf16.vlgmr.msra.gmra.mrb[0].mxu0 %v277_v26  ;;  %1215 = vmatprep.subr.bf16.mxu1 %v1311_v37 }
  0x3b   : > { %532 = vmatprep.mubr.bf16.mxu0 %v1531_v24  ;;  %1158 = vmatpush3.bf16.msra.mxu0 %v1304_v30 }
  0x3c   : > { %1159 = vmatprep.subr.bf16.mxu0 %v1305_v31  ;;  %1212 = vmatmul.mubr.bf16.vlgmr.msra.gmra.mrb[0].mxu1 %v1528_v22 }
  0x3d   : > { %1216 = vmatpush3.bf16.msra.mxu1 %v1311_v37 }
  0x3e   : > { %1217 = vmatprep.subr.bf16.mxu1 %v1314_v40 }
  0x3f   : > { %1160 = vmatpush3.bf16.msra.mxu0 %v1306_v32 }
  0x40   : > { %1161 = vmatprep.subr.bf16.mxu0 %v1307_v33 }
  0x41   : > { %1218 = vmatpush3.bf16.msra.mxu1 %v1314_v40 }
  0x42   : > { %533 = vmatmul.mubr.bf16.gmra.mrb[4].mxu0 %v278_v23  ;;  %1219 = vmatprep.subr.bf16.mxu1 %v1317_v43 }
  0x43   : > { %1162 = vmatpush3.bf16.msra.mxu0 %v1308_v34  ;;  %847 = vmatprep.mubr.bf16.mxu0 %v613_v50 }
  0x44   : > { %1163 = vmatprep.subr.bf16.mxu0 %v1309_v35 }
  0x45   : > { %1220 = vmatpush3.bf16.msra.mxu1 %v1317_v43 }
  0x46   : > { %1221 = vmatprep.subr.bf16.mxu1 %v1320_v46 }
  0x47   : > { %1164 = vmatpush3.bf16.msra.mxu0 %v1310_v36 }
  0x48   : > { %1165 = vmatprep.subr.bf16.mxu0 %v1312_v38 }
  0x49   : > { %1222 = vmatpush3.bf16.msra.mxu1 %v1320_v46 }
  0x4a   : > { %1223 = vmatprep.subr.bf16.mxu1 %v1323_v49 }
  0x4b   : > { %1166 = vmatpush3.bf16.msra.mxu0 %v1313_v39 }
  0x4c   : > { %1167 = vmatprep.subr.bf16.mxu0 %v1315_v41 }
  0x4d   : > { %1224 = vmatpush3.bf16.msra.mxu1 %v1323_v49 }
  0x4e   : > { %1225 = vmatprep.subr.bf16.mxu1 %v1324_v52 }
  0x4f   : > { %1168 = vmatpush3.bf16.msra.mxu0 %v1316_v42 }
  0x50   : > { %1169 = vmatprep.subr.bf16.mxu0 %v1318_v44 }
  0x51   : > { %1226 = vmatpush3.bf16.msra.mxu1 %v1324_v52 }
  0x52   : > { %1227 = vmatprep.subr.bf16.mxu1 %v1325_v53 }
  0x53   : > { %1170 = vmatpush3.bf16.msra.mxu0 %v1319_v45 }
  0x54   : > { %1171 = vmatprep.subr.bf16.mxu0 %v1321_v47 }
  0x55   : > { %1228 = vmatpush3.bf16.msra.mxu1 %v1325_v53 }
  0x56   : > { %1229 = vmatprep.subr.bf16.mxu1 %v1326_v54 }
  0x57   : > { %1172 = vmatpush3.bf16.msra.mxu0 %v1322_v48 }
  0x59   : > { %1230 = vmatpush3.bf16.msra.mxu1 %v1326_v54 }
  0x5a   : > { %848 = vmatmul.mubr.bf16.vlgmr.msra.gmra.mrb[8].mxu0 %v612_v51 }
 0x10d   : > { %v1135_v55 = vpop.f32.mrb[0].mxu0 }
 0x10e   : > { %v1136_v56 = vpop.f32.mrb[1].mxu0 }
 0x10f   : > { %v1137_v58 = vadd.f32 %v1136_v56, %v1135_v55  ;;  %v1138_v59 = vpop.f32.mrb[2].mxu0  ;;  %v1213_v61 = vpop.f32.mrb[0].mxu1 }
 0x110   : > { %v1139_v60 = vpop.f32.mrb[3].mxu0  ;;  %v575_v0 = vpop.f32.mrb[1].mxu1 }
 0x111   : > { %v1140_v62 = vadd.f32 %v1139_v60, %v1138_v59  ;;  %v527_v63 = vadd.f32 %v1137_v58, %v1067_v57  ;;  %v1214_v1 = vpop.f32.mrb[2].mxu1 }
 0x112   : > { %v578_v4 = vpop.f32.mrb[3].mxu1 }
 0x113   : > { %v576_v2 = vadd.f32 %v575_v0, %v527_v63  ;;  %v530_v3 = vadd.f32 %v1140_v62, %v1067_v57 }
 0x115   : > { %v594_v5 = vmul.f32 0.70710677, %v576_v2  ;;  %v579_v6 = vadd.f32 %v578_v4, %v530_v3  ;;  %v1141_v7 = vpop.f32.mrb[4].mxu0  ;;  %v590_v25 = vmul.f32 0.5, %v576_v2 }
 0x116   : > { %v1142_v8 = vpop.f32.mrb[5].mxu0 }
 0x117   : > { %1329 = verf.f32 %v594_v5  ;;  %v595_v9 = vmul.f32 0.70710677, %v579_v6  ;;  %v1143_v10 = vadd.f32 %v1142_v8, %v1141_v7  ;;  %v1144_v11 = vpop.f32.mrb[6].mxu0  ;;  %v591_v26 = vmul.f32 0.5, %v579_v6 }
 0x118   : > { %v1145_v12 = vpop.f32.mrb[7].mxu0  ;;  %v935_v7 = vunpack.c.l.bf16 %v1528_v22 }
 0x119   : > { %1331 = verf.f32 %v595_v9  ;;  %v535_v13 = vadd.f32 %v1143_v10, %v1067_v57  ;;  %v1146_v14 = vadd.f32 %v1145_v12, %v1144_v11 }
 0x11b   : > { %v584_v15 = vadd.f32 %v1213_v61, %v535_v13  ;;  %v538_v16 = vadd.f32 %v1146_v14, %v1067_v57  ;;  %v933_v13 = vunpack.c.l.bf16 %v1531_v24 }
 0x11d   : > { %v596_v17 = vmul.f32 0.70710677, %v584_v15  ;;  %v587_v18 = vadd.f32 %v1214_v1, %v538_v16  ;;  %v592_v34 = vmul.f32 0.5, %v584_v15  ;;  %v936_v15 = vunpack.c.h.bf16 %v1528_v22 }
 0x11f   : > { %1333 = verf.f32 %v596_v17  ;;  %v597_v19 = vmul.f32 0.70710677, %v587_v18  ;;  %v593_v35 = vmul.f32 0.5, %v587_v18 }
 0x121   : > { %v1330_v20 = vpop.eup %1329  ;;  %1335 = verf.f32 %v597_v19 }
 0x122   : > { %v602_v21 = vadd.f32 1.0, %v1330_v20 }
 0x123   : > { %v1332_v23 = vpop.eup %1331 }
 0x124   : > { %v603_v27 = vadd.f32 1.0, %v1332_v23  ;;  %v606_v28 = vmul.f32 %v602_v21, %v590_v25  ;;  %v934_v23 = vunpack.c.h.bf16 %v1531_v24 }
 0x126   : > { %v607_v29 = vmul.f32 %v603_v27, %v591_v26 }
 0x128   : > { %v610_v30 = vpack.c.bf16 %v607_v29, %v606_v28 }
 0x129   : > { %v1334_v31 = vpop.eup %1333 }
 0x12a   : > { %v604_v32 = vadd.f32 1.0, %v1334_v31  ;;  %614 = vst [vmem:[#allocation3] sm:$0xff] %v610_v30  ;;  %855 = vmatprep.mubr.bf16.mxu0 %v610_v30  ;;  %1231 = vmatprep.mubr.bf16.mxu1 %v610_v30 }
 0x12b   : > { %v1336_v33 = vpop.eup %1335  ;;  %856 = vmatmul.mubr.bf16.gmra.mrb[12].mxu0 %v613_v50  ;;  %v1092_v50 = vld [vmem:[%s1652_s4] ss:$0 sm:$0xff] }
 0x12c   : > { %v605_v36 = vadd.f32 1.0, %v1336_v33  ;;  %v608_v37 = vmul.f32 %v604_v32, %v592_v34 }
 0x12d   : > { %v1173_v40 = vpop.f32.mrb[8].mxu0 }
 0x12e   : > { %v609_v38 = vmul.f32 %v605_v36, %v593_v35  ;;  %v1174_v41 = vpop.f32.mrb[9].mxu0 }
 0x12f   : > { %v1175_v42 = vadd.f32 %v1174_v41, %v1173_v40  ;;  %v1176_v43 = vpop.f32.mrb[10].mxu0 }
 0x130   : > { %v611_v39 = vpack.c.bf16 %v609_v38, %v608_v37  ;;  %v1177_v44 = vpop.f32.mrb[11].mxu0 }
 0x131   : > { %v1178_v45 = vadd.f32 %v1177_v44, %v1176_v43  ;;  %v850_v55 = vadd.f32 %v1175_v42, %v1092_v50 }
 0x132   : > { %615 = vst [vmem:[#allocation3 + $0x8] sm:$0xff] %v611_v39  ;;  %1232 = vmatmul.mubr.bf16.vlgmr.msra.gmra.mrb[4].mxu1 %v611_v39 }
 0x133   : > { %v853_v61 = vadd.f32 %v1178_v45, %v1092_v50 }
 0x1fe   : > { %v1179_v46 = vpop.f32.mrb[12].mxu0 }
 0x1ff   : > { %v1180_v47 = vpop.f32.mrb[13].mxu0 }
 0x200   : > { %v1181_v48 = vadd.f32 %v1180_v47, %v1179_v46  ;;  %v1182_v49 = vpop.f32.mrb[14].mxu0 }
 0x201   : > { %v1183_v51 = vpop.f32.mrb[15].mxu0 }
 0x202   : > { %v1184_v52 = vadd.f32 %v1183_v51, %v1182_v49  ;;  %v858_v53 = vadd.f32 %v1181_v48, %v1092_v50 }
 0x204   : > { %v861_v58 = vadd.f32 %v1184_v52, %v1092_v50 }
 0x205   : > { %v1233_v54 = vpop.f32.mrb[4].mxu1 }
 0x206   : > { %v907_v56 = vadd.f32 %v1233_v54, %v858_v53  ;;  %v898_v57 = vpop.f32.mrb[5].mxu1 }
 0x207   : > { %v899_v59 = vadd.f32 %v898_v57, %v850_v55  ;;  %v1234_v60 = vpop.f32.mrb[6].mxu1 }
 0x208   : > { %v919_v62 = vmul.f32 0.70710677, %v907_v56  ;;  %v910_v63 = vadd.f32 %v1234_v60, %v861_v58  ;;  %v901_v0 = vpop.f32.mrb[7].mxu1  ;;  %v915_v8 = vmul.f32 0.5, %v907_v56 }
 0x209   : > { %v917_v1 = vmul.f32 0.70710677, %v899_v59  ;;  %v902_v2 = vadd.f32 %v901_v0, %v853_v61  ;;  %v913_v11 = vmul.f32 0.5, %v899_v59 }
 0x20a   : > { %1337 = verf.f32 %v919_v62  ;;  %v920_v3 = vmul.f32 0.70710677, %v910_v63  ;;  %v916_v17 = vmul.f32 0.5, %v910_v63 }
 0x20b   : > { %1339 = verf.f32 %v917_v1  ;;  %v918_v4 = vmul.f32 0.70710677, %v902_v2  ;;  %v914_v20 = vmul.f32 0.5, %v902_v2 }
 0x20c   : > { %1341 = verf.f32 %v920_v3 }
 0x20d   : > { %1343 = verf.f32 %v918_v4 }
 0x214   : > { %v1338_v5 = vpop.eup %1337 }
 0x215   : > { %v1340_v6 = vpop.eup %1339  ;;  %v927_v9 = vadd.f32 1.0, %v1338_v5 }
 0x216   : > { %v1342_v10 = vpop.eup %1341  ;;  %v925_v12 = vadd.f32 1.0, %v1340_v6 }
 0x217   : > { %v1344_v14 = vpop.eup %1343  ;;  %v931_v16 = vmul.f32 %v927_v9, %v915_v8  ;;  %v928_v18 = vadd.f32 1.0, %v1342_v10 }
 0x218   : > { %v929_v19 = vmul.f32 %v925_v12, %v913_v11  ;;  %v926_v21 = vadd.f32 1.0, %v1344_v14 }
 0x219   : > { %v939_v25 = vadd.f32 %v935_v7, %v931_v16  ;;  %v932_v26 = vmul.f32 %v928_v18, %v916_v17 }
 0x21a   : > { %v937_v27 = vadd.f32 %v933_v13, %v929_v19  ;;  %v930_v28 = vmul.f32 %v926_v21, %v914_v20 }
 0x21b   : > { %v947_v29 = vmul.f32 0.70710677, %v939_v25  ;;  %v940_v30 = vadd.f32 %v936_v15, %v932_v26  ;;  %v943_v36 = vmul.f32 0.5, %v939_v25 }
 0x21c   : > { %v945_v31 = vmul.f32 0.70710677, %v937_v27  ;;  %v938_v32 = vadd.f32 %v934_v23, %v930_v28  ;;  %v941_v38 = vmul.f32 0.5, %v937_v27 }
 0x21d   : > { %1345 = verf.f32 %v947_v29  ;;  %v948_v33 = vmul.f32 0.70710677, %v940_v30  ;;  %v944_v42 = vmul.f32 0.5, %v940_v30 }
 0x21e   : > { %1347 = verf.f32 %v945_v31  ;;  %v946_v22 = vmul.f32 0.70710677, %v938_v32  ;;  %v942_v45 = vmul.f32 0.5, %v938_v32 }
 0x21f   : > { %1349 = verf.f32 %v948_v33 }
 0x220   : > { %1351 = verf.f32 %v946_v22 }
 0x227   : > { %v1346_v34 = vpop.eup %1345 }
 0x228   : > { %v1348_v35 = vpop.eup %1347  ;;  %v955_v24 = vadd.f32 1.0, %v1346_v34 }
 0x229   : > { %v1350_v37 = vpop.eup %1349  ;;  %v953_v39 = vadd.f32 1.0, %v1348_v35 }
 0x22a   : > { %v1352_v40 = vpop.eup %1351  ;;  %v959_v41 = vmul.f32 %v955_v24, %v943_v36  ;;  %v956_v43 = vadd.f32 1.0, %v1350_v37 }
 0x22b   : > { %v957_v44 = vmul.f32 %v953_v39, %v941_v38  ;;  %v954_v46 = vadd.f32 1.0, %v1352_v40 }
 0x22c   : > { %963 = vst [vmem:[%s1462_s10 + $0x10] sm:$0xff] %v959_v41  ;;  %v960_v47 = vmul.f32 %v956_v43, %v944_v42 }
 0x22d   : > { %961 = vst [vmem:[%s1462_s10] sm:$0xff] %v957_v44  ;;  %v958_v48 = vmul.f32 %v954_v46, %v942_v45 }
 0x22e   : > { %964 = vst [vmem:[%s1462_s10 + $0x18] sm:$0xff] %v960_v47 }
 0x22f   : > { %962 = vst [vmem:[%s1462_s10 + $0x8] sm:$0xff] %v958_v48 }
 0x230 PF: > { %s15_s22 = sadd.s32 1, %s1391_s22   ;;  %s1654_s18 = smov %s1383_s20 }
 0x231   : > { %p12_p8 = scmp.ge.s32.totalorder %s15_s22, 8   ;;  %s1655_s19 = smov %s1387_s21 }
 0x232   : > { %s1656_s20 = smov %s1659_s23  ;;  %s1657_s21 = smov %s1663_s24 }
 0x233   :  { %14 = sbr.rel (!%p12_p8) target bundleno = 3 (0x3), region = 74 }

</bundles_post_ra>
